<compile_context>
chip_gen: v7x
topology: tpu7x:2x2x1
jax: 0.10.0
libtpu: 0.0.40
codegen_flags: <defaults>
</compile_context>

<pallas_src>
import functools

import jax
import jax.numpy as jnp
from jax.experimental import pallas as pl
from jax.experimental.pallas import tpu as pltpu


KSIZE = 7  # PyTorch default kernel_size=7 (padding = 3)


def _round_up(x, m):
    return (x + m - 1) // m * m


# ---------------------------------------------------------------------------
# Fused kernel: channel max/mean -> in-kernel padded map -> 7x7 conv -> sigmoid
#               -> channel-broadcast gating multiply.   One batch image per step.
# ---------------------------------------------------------------------------
def _spatial_attention_kernel(w_ref, x_ref, o_ref, mp_ref, *, ksize):
    # w_ref : (2*ksize*ksize,) f32 in SMEM    (index = c*k*k + ky*k + kx)
    # x_ref : (1, C, H, W)   features (VMEM block)
    # o_ref : (1, C, H, W)   gated output
    # mp_ref: (2, H+2p, W+2p) f32 VMEM scratch holding the zero-padded max/avg maps
    pad = ksize // 2
    H = x_ref.shape[2]
    W = x_ref.shape[3]
    Wp = W + 2 * pad

    xb = x_ref[0].astype(jnp.float32)                 # (C, H, W)

    # ---- channel pooling + in-kernel zero padding (no HBM round trip) ----
    mp_ref[...] = jnp.zeros_like(mp_ref)              # border rows/cols = conv padding
    mp_ref[0, pad:pad + H, pad:pad + W] = jnp.max(xb, axis=0)
    mp_ref[1, pad:pad + H, pad:pad + W] = jnp.mean(xb, axis=0)

    # ---- 7x7 conv (2 -> 1 channel, no bias), restructured ----
    # 14 sublane-shifted full-width slab loads, 98 scalar*vector FMAs on those slabs,
    # then only `ksize` lane shifts when collapsing the per-kx partial sums.
    parts = [jnp.zeros((H, Wp), jnp.float32) for _ in range(ksize)]
    for c in range(2):
        for ky in range(ksize):
            slab = mp_ref[c, ky:ky + H, :]            # (H, Wp), one sublane-offset load
            base = c * ksize * ksize + ky * ksize
            for kx in range(ksize):
                parts[kx] = parts[kx] + w_ref[base + kx] * slab

    acc = parts[0][:, 0:W]
    for kx in range(1, ksize):
        acc = acc + parts[kx][:, kx:kx + W]           # lane shift + add (ksize total)

    gate = jax.nn.sigmoid(acc)                        # (H, W), f32

    # ---- spatial gating, broadcast over channels ----
    o_ref[0] = (x_ref[0].astype(jnp.float32) * gate[None, :, :]).astype(o_ref.dtype)


def spatial_attention_forward(x, w):
    """x: (B, C, H, W);  w: (1, 2, k, k) = Conv2d(2, 1, k, padding=k//2, bias=False).weight"""
    B, C, H, W = x.shape
    k = w.shape[-1]
    pad = k // 2
    Hp, Wp = H + 2 * pad, W + 2 * pad

    w_flat = w.reshape(-1).astype(jnp.float32)        # (2*k*k,) scalars for SMEM

    # VMEM budget: in + out blocks (double buffered) + padded-map scratch + conv working
    # set, with headroom; clamp to [16 MiB, 64 MiB] (v7x physical VMEM is 64 MiB).
    itemsize = jnp.dtype(x.dtype).itemsize
    blk = C * H * W * itemsize
    lane_wp = _round_up(Wp, 128)
    map_bytes = 2 * Hp * lane_wp * 4
    conv_work = (k + 2) * H * lane_wp * 4
    need = 4 * blk + map_bytes + conv_work + (2 << 20)
    vmem_limit = int(min(max(need, 16 << 20), 64 << 20))

    kernel = functools.partial(_spatial_attention_kernel, ksize=k)
    return pl.pallas_call(
        kernel,
        out_shape=jax.ShapeDtypeStruct((B, C, H, W), x.dtype),
        grid=(B,),
        in_specs=[
            pl.BlockSpec(memory_space=pltpu.MemorySpace.SMEM),   # conv weights (scalars)
            pl.BlockSpec((1, C, H, W), lambda b: (b, 0, 0, 0)),  # features, streamed once
        ],
        out_specs=pl.BlockSpec((1, C, H, W), lambda b: (b, 0, 0, 0)),
        scratch_shapes=[pltpu.VMEM((2, Hp, Wp), jnp.float32)],
        compiler_params=pltpu.CompilerParams(
            dimension_semantics=("parallel",),
            vmem_limit_bytes=vmem_limit,
        ),
    )(w_flat, x)


# ---------------------------------------------------------------------------
# Pure-JAX reference (same math as the PyTorch module) for verification.
# ---------------------------------------------------------------------------
def spatial_attention_ref(x, w):
    k = w.shape[-1]
    pad = k // 2
    B, C, H, W = x.shape
    mx = jnp.max(x, axis=1, keepdims=True)
    av = jnp.mean(x, axis=1, keepdims=True)
    m = jnp.concatenate([mx, av], axis=1)                              # (B, 2, H, W)
    mp = jnp.pad(m, ((0, 0), (0, 0), (pad, pad), (pad, pad)))
    acc = jnp.zeros((B, H, W), jnp.float32)
    for c in range(2):
        for ky in range(k):
            for kx in range(k):
                acc = acc + w[0, c, ky, kx] * mp[:, c, ky:ky + H, kx:kx + W]
    return x * jax.nn.sigmoid(acc)[:, None]


if __name__ == "__main__":
    key = jax.random.PRNGKey(0)
    kx_, kw_ = jax.random.split(key)

    B, C, H, W = 2, 8, 32, 32
    x = jax.random.normal(kx_, (B, C, H, W), jnp.float32)
    # PyTorch Conv2d(2, 1, 7, padding=3, bias=False) weight layout: (1, 2, 7, 7)
    w = jax.random.normal(kw_, (1, 2, KSIZE, KSIZE), jnp.float32) / ((2 * KSIZE * KSIZE) ** 0.5)

    fwd = jax.jit(spatial_attention_forward)
    y = jax.block_until_ready(fwd(x, w))

    assert y.shape == (B, C, H, W), y.shape
    assert bool(jnp.all(jnp.isfinite(y)))

    y_ref = spatial_attention_ref(x, w)
    err = float(jnp.max(jnp.abs(y - y_ref)))
    assert err < 1e-4, f"max abs error vs reference: {err}"

    print("KERNEL_OK")
</pallas_src>

<mosaic_0001>
module attributes {stable_mosaic.version = 11 : i64} {
  func.func @_spatial_attention_kernel(%arg0: i32, %arg1: memref<98xf32, #tpu.memory_space<smem>>, %arg2: memref<1x8x32x32xf32, #tpu.memory_space<vmem>>, %arg3: memref<1x8x32x32xf32, #tpu.memory_space<vmem>>, %arg4: memref<2x38x38xf32, #tpu.memory_space<vmem>>) attributes {dimension_semantics = [#tpu.dimension_semantics<parallel>], iteration_bounds = array<i64: 2>, scalar_prefetch = 0 : i64, scratch_operands = 1 : i64, tpu.core_type = #tpu.core_type<tc>, window_params = [{transform_indices = @transform_0, window_bounds = array<i64: 98>}, {transform_indices = @transform_1, window_bounds = array<i64: 1, 8, 32, 32>}, {transform_indices = @transform_2, window_bounds = array<i64: 1, 8, 32, 32>}]} {
    %c0 = arith.constant 0 : index
    %c0_0 = arith.constant 0 : index
    %c0_1 = arith.constant 0 : index
    %c0_2 = arith.constant 0 : index
    %0 = vector.load %arg2[%c0, %c0_0, %c0_1, %c0_2] : memref<1x8x32x32xf32, #tpu.memory_space<vmem>>, vector<1x8x32x32xf32>
    %1 = vector.shape_cast %0 : vector<1x8x32x32xf32> to vector<8x32x32xf32>
    %cst = arith.constant 0.000000e+00 : f32
    %2 = vector.broadcast %cst : f32 to vector<2x38x38xf32>
    %c0_3 = arith.constant 0 : index
    %c0_4 = arith.constant 0 : index
    %c0_5 = arith.constant 0 : index
    %3 = vector.load %arg4[%c0_3, %c0_4, %c0_5] : memref<2x38x38xf32, #tpu.memory_space<vmem>>, vector<2x38x38xf32>
    tpu.vector_store %arg4[%c0_3, %c0_4, %c0_5], %2 {strides = array<i32>} : memref<2x38x38xf32, #tpu.memory_space<vmem>>, vector<2x38x38xf32>,
    %cst_6 = arith.constant dense<0xFF800000> : vector<32x32xf32>
    %4 = vector.multi_reduction <maximumf>, %1, %cst_6 [0] : vector<8x32x32xf32> to vector<32x32xf32>
    %c0_7 = arith.constant 0 : index
    %c3 = arith.constant 3 : index
    %c3_8 = arith.constant 3 : index
    %5 = vector.load %arg4[%c0_7, %c3, %c3_8] : memref<2x38x38xf32, #tpu.memory_space<vmem>>, vector<1x32x32xf32>
    %6 = vector.shape_cast %5 : vector<1x32x32xf32> to vector<32x32xf32>
    %7 = vector.shape_cast %4 : vector<32x32xf32> to vector<1x32x32xf32>
    tpu.vector_store %arg4[%c0_7, %c3, %c3_8], %7 {strides = array<i32>} : memref<2x38x38xf32, #tpu.memory_space<vmem>>, vector<1x32x32xf32>,
    %cst_9 = arith.constant dense<0.000000e+00> : vector<32x32xf32>
    %8 = vector.multi_reduction <add>, %1, %cst_9 [0] : vector<8x32x32xf32> to vector<32x32xf32>
    %cst_10 = arith.constant 8.000000e+00 : f32
    %9 = vector.broadcast %cst_10 : f32 to vector<32x32xf32>
    %10 = arith.divf %8, %9 : vector<32x32xf32>
    %c1 = arith.constant 1 : index
    %c3_11 = arith.constant 3 : index
    %c3_12 = arith.constant 3 : index
    %11 = vector.load %arg4[%c1, %c3_11, %c3_12] : memref<2x38x38xf32, #tpu.memory_space<vmem>>, vector<1x32x32xf32>
    %12 = vector.shape_cast %11 : vector<1x32x32xf32> to vector<32x32xf32>
    %13 = vector.shape_cast %10 : vector<32x32xf32> to vector<1x32x32xf32>
    tpu.vector_store %arg4[%c1, %c3_11, %c3_12], %13 {strides = array<i32>} : memref<2x38x38xf32, #tpu.memory_space<vmem>>, vector<1x32x32xf32>,
    %cst_13 = arith.constant 0.000000e+00 : f32
    %14 = vector.broadcast %cst_13 : f32 to vector<32x38xf32>
    %cst_14 = arith.constant 0.000000e+00 : f32
    %15 = vector.broadcast %cst_14 : f32 to vector<32x38xf32>
    %cst_15 = arith.constant 0.000000e+00 : f32
    %16 = vector.broadcast %cst_15 : f32 to vector<32x38xf32>
    %cst_16 = arith.constant 0.000000e+00 : f32
    %17 = vector.broadcast %cst_16 : f32 to vector<32x38xf32>
    %cst_17 = arith.constant 0.000000e+00 : f32
    %18 = vector.broadcast %cst_17 : f32 to vector<32x38xf32>
    %cst_18 = arith.constant 0.000000e+00 : f32
    %19 = vector.broadcast %cst_18 : f32 to vector<32x38xf32>
    %cst_19 = arith.constant 0.000000e+00 : f32
    %20 = vector.broadcast %cst_19 : f32 to vector<32x38xf32>
    %c0_20 = arith.constant 0 : index
    %c0_21 = arith.constant 0 : index
    %c0_22 = arith.constant 0 : index
    %21 = vector.load %arg4[%c0_20, %c0_21, %c0_22] : memref<2x38x38xf32, #tpu.memory_space<vmem>>, vector<1x32x38xf32>
    %22 = vector.shape_cast %21 : vector<1x32x38xf32> to vector<32x38xf32>
    %c0_23 = arith.constant 0 : index
    %23 = memref.load %arg1[%c0_23] : memref<98xf32, #tpu.memory_space<smem>>
    %24 = vector.broadcast %23 : f32 to vector<32x38xf32>
    %25 = arith.mulf %24, %22 : vector<32x38xf32>
    %26 = arith.addf %14, %25 : vector<32x38xf32>
    %c1_24 = arith.constant 1 : index
    %27 = memref.load %arg1[%c1_24] : memref<98xf32, #tpu.memory_space<smem>>
    %28 = vector.broadcast %27 : f32 to vector<32x38xf32>
    %29 = arith.mulf %28, %22 : vector<32x38xf32>
    %30 = arith.addf %15, %29 : vector<32x38xf32>
    %c2 = arith.constant 2 : index
    %31 = memref.load %arg1[%c2] : memref<98xf32, #tpu.memory_space<smem>>
    %32 = vector.broadcast %31 : f32 to vector<32x38xf32>
    %33 = arith.mulf %32, %22 : vector<32x38xf32>
    %34 = arith.addf %16, %33 : vector<32x38xf32>
    %c3_25 = arith.constant 3 : index
    %35 = memref.load %arg1[%c3_25] : memref<98xf32, #tpu.memory_space<smem>>
    %36 = vector.broadcast %35 : f32 to vector<32x38xf32>
    %37 = arith.mulf %36, %22 : vector<32x38xf32>
    %38 = arith.addf %17, %37 : vector<32x38xf32>
    %c4 = arith.constant 4 : index
    %39 = memref.load %arg1[%c4] : memref<98xf32, #tpu.memory_space<smem>>
    %40 = vector.broadcast %39 : f32 to vector<32x38xf32>
    %41 = arith.mulf %40, %22 : vector<32x38xf32>
    %42 = arith.addf %18, %41 : vector<32x38xf32>
    %c5 = arith.constant 5 : index
    %43 = memref.load %arg1[%c5] : memref<98xf32, #tpu.memory_space<smem>>
    %44 = vector.broadcast %43 : f32 to vector<32x38xf32>
    %45 = arith.mulf %44, %22 : vector<32x38xf32>
    %46 = arith.addf %19, %45 : vector<32x38xf32>
    %c6 = arith.constant 6 : index
    %47 = memref.load %arg1[%c6] : memref<98xf32, #tpu.memory_space<smem>>
    %48 = vector.broadcast %47 : f32 to vector<32x38xf32>
    %49 = arith.mulf %48, %22 : vector<32x38xf32>
    %50 = arith.addf %20, %49 : vector<32x38xf32>
    %c0_26 = arith.constant 0 : index
    %c1_27 = arith.constant 1 : index
    %c0_28 = arith.constant 0 : index
    %51 = vector.load %arg4[%c0_26, %c1_27, %c0_28] : memref<2x38x38xf32, #tpu.memory_space<vmem>>, vector<1x32x38xf32>
    %52 = vector.shape_cast %51 : vector<1x32x38xf32> to vector<32x38xf32>
    %c7 = arith.constant 7 : index
    %53 = memref.load %arg1[%c7] : memref<98xf32, #tpu.memory_space<smem>>
    %54 = vector.broadcast %53 : f32 to vector<32x38xf32>
    %55 = arith.mulf %54, %52 : vector<32x38xf32>
    %56 = arith.addf %26, %55 : vector<32x38xf32>
    %c8 = arith.constant 8 : index
    %57 = memref.load %arg1[%c8] : memref<98xf32, #tpu.memory_space<smem>>
    %58 = vector.broadcast %57 : f32 to vector<32x38xf32>
    %59 = arith.mulf %58, %52 : vector<32x38xf32>
    %60 = arith.addf %30, %59 : vector<32x38xf32>
    %c9 = arith.constant 9 : index
    %61 = memref.load %arg1[%c9] : memref<98xf32, #tpu.memory_space<smem>>
    %62 = vector.broadcast %61 : f32 to vector<32x38xf32>
    %63 = arith.mulf %62, %52 : vector<32x38xf32>
    %64 = arith.addf %34, %63 : vector<32x38xf32>
    %c10 = arith.constant 10 : index
    %65 = memref.load %arg1[%c10] : memref<98xf32, #tpu.memory_space<smem>>
    %66 = vector.broadcast %65 : f32 to vector<32x38xf32>
    %67 = arith.mulf %66, %52 : vector<32x38xf32>
    %68 = arith.addf %38, %67 : vector<32x38xf32>
    %c11 = arith.constant 11 : index
    %69 = memref.load %arg1[%c11] : memref<98xf32, #tpu.memory_space<smem>>
    %70 = vector.broadcast %69 : f32 to vector<32x38xf32>
    %71 = arith.mulf %70, %52 : vector<32x38xf32>
    %72 = arith.addf %42, %71 : vector<32x38xf32>
    %c12 = arith.constant 12 : index
    %73 = memref.load %arg1[%c12] : memref<98xf32, #tpu.memory_space<smem>>
    %74 = vector.broadcast %73 : f32 to vector<32x38xf32>
    %75 = arith.mulf %74, %52 : vector<32x38xf32>
    %76 = arith.addf %46, %75 : vector<32x38xf32>
    %c13 = arith.constant 13 : index
    %77 = memref.load %arg1[%c13] : memref<98xf32, #tpu.memory_space<smem>>
    %78 = vector.broadcast %77 : f32 to vector<32x38xf32>
    %79 = arith.mulf %78, %52 : vector<32x38xf32>
    %80 = arith.addf %50, %79 : vector<32x38xf32>
    %c0_29 = arith.constant 0 : index
    %c2_30 = arith.constant 2 : index
    %c0_31 = arith.constant 0 : index
    %81 = vector.load %arg4[%c0_29, %c2_30, %c0_31] : memref<2x38x38xf32, #tpu.memory_space<vmem>>, vector<1x32x38xf32>
    %82 = vector.shape_cast %81 : vector<1x32x38xf32> to vector<32x38xf32>
    %c14 = arith.constant 14 : index
    %83 = memref.load %arg1[%c14] : memref<98xf32, #tpu.memory_space<smem>>
    %84 = vector.broadcast %83 : f32 to vector<32x38xf32>
    %85 = arith.mulf %84, %82 : vector<32x38xf32>
    %86 = arith.addf %56, %85 : vector<32x38xf32>
    %c15 = arith.constant 15 : index
    %87 = memref.load %arg1[%c15] : memref<98xf32, #tpu.memory_space<smem>>
    %88 = vector.broadcast %87 : f32 to vector<32x38xf32>
    %89 = arith.mulf %88, %82 : vector<32x38xf32>
    %90 = arith.addf %60, %89 : vector<32x38xf32>
    %c16 = arith.constant 16 : index
    %91 = memref.load %arg1[%c16] : memref<98xf32, #tpu.memory_space<smem>>
    %92 = vector.broadcast %91 : f32 to vector<32x38xf32>
    %93 = arith.mulf %92, %82 : vector<32x38xf32>
    %94 = arith.addf %64, %93 : vector<32x38xf32>
    %c17 = arith.constant 17 : index
    %95 = memref.load %arg1[%c17] : memref<98xf32, #tpu.memory_space<smem>>
    %96 = vector.broadcast %95 : f32 to vector<32x38xf32>
    %97 = arith.mulf %96, %82 : vector<32x38xf32>
    %98 = arith.addf %68, %97 : vector<32x38xf32>
    %c18 = arith.constant 18 : index
    %99 = memref.load %arg1[%c18] : memref<98xf32, #tpu.memory_space<smem>>
    %100 = vector.broadcast %99 : f32 to vector<32x38xf32>
    %101 = arith.mulf %100, %82 : vector<32x38xf32>
    %102 = arith.addf %72, %101 : vector<32x38xf32>
    %c19 = arith.constant 19 : index
    %103 = memref.load %arg1[%c19] : memref<98xf32, #tpu.memory_space<smem>>
    %104 = vector.broadcast %103 : f32 to vector<32x38xf32>
    %105 = arith.mulf %104, %82 : vector<32x38xf32>
    %106 = arith.addf %76, %105 : vector<32x38xf32>
    %c20 = arith.constant 20 : index
    %107 = memref.load %arg1[%c20] : memref<98xf32, #tpu.memory_space<smem>>
    %108 = vector.broadcast %107 : f32 to vector<32x38xf32>
    %109 = arith.mulf %108, %82 : vector<32x38xf32>
    %110 = arith.addf %80, %109 : vector<32x38xf32>
    %c0_32 = arith.constant 0 : index
    %c3_33 = arith.constant 3 : index
    %c0_34 = arith.constant 0 : index
    %111 = vector.load %arg4[%c0_32, %c3_33, %c0_34] : memref<2x38x38xf32, #tpu.memory_space<vmem>>, vector<1x32x38xf32>
    %112 = vector.shape_cast %111 : vector<1x32x38xf32> to vector<32x38xf32>
    %c21 = arith.constant 21 : index
    %113 = memref.load %arg1[%c21] : memref<98xf32, #tpu.memory_space<smem>>
    %114 = vector.broadcast %113 : f32 to vector<32x38xf32>
    %115 = arith.mulf %114, %112 : vector<32x38xf32>
    %116 = arith.addf %86, %115 : vector<32x38xf32>
    %c22 = arith.constant 22 : index
    %117 = memref.load %arg1[%c22] : memref<98xf32, #tpu.memory_space<smem>>
    %118 = vector.broadcast %117 : f32 to vector<32x38xf32>
    %119 = arith.mulf %118, %112 : vector<32x38xf32>
    %120 = arith.addf %90, %119 : vector<32x38xf32>
    %c23 = arith.constant 23 : index
    %121 = memref.load %arg1[%c23] : memref<98xf32, #tpu.memory_space<smem>>
    %122 = vector.broadcast %121 : f32 to vector<32x38xf32>
    %123 = arith.mulf %122, %112 : vector<32x38xf32>
    %124 = arith.addf %94, %123 : vector<32x38xf32>
    %c24 = arith.constant 24 : index
    %125 = memref.load %arg1[%c24] : memref<98xf32, #tpu.memory_space<smem>>
    %126 = vector.broadcast %125 : f32 to vector<32x38xf32>
    %127 = arith.mulf %126, %112 : vector<32x38xf32>
    %128 = arith.addf %98, %127 : vector<32x38xf32>
    %c25 = arith.constant 25 : index
    %129 = memref.load %arg1[%c25] : memref<98xf32, #tpu.memory_space<smem>>
    %130 = vector.broadcast %129 : f32 to vector<32x38xf32>
    %131 = arith.mulf %130, %112 : vector<32x38xf32>
    %132 = arith.addf %102, %131 : vector<32x38xf32>
    %c26 = arith.constant 26 : index
    %133 = memref.load %arg1[%c26] : memref<98xf32, #tpu.memory_space<smem>>
    %134 = vector.broadcast %133 : f32 to vector<32x38xf32>
    %135 = arith.mulf %134, %112 : vector<32x38xf32>
    %136 = arith.addf %106, %135 : vector<32x38xf32>
    %c27 = arith.constant 27 : index
    %137 = memref.load %arg1[%c27] : memref<98xf32, #tpu.memory_space<smem>>
    %138 = vector.broadcast %137 : f32 to vector<32x38xf32>
    %139 = arith.mulf %138, %112 : vector<32x38xf32>
    %140 = arith.addf %110, %139 : vector<32x38xf32>
    %c0_35 = arith.constant 0 : index
    %c4_36 = arith.constant 4 : index
    %c0_37 = arith.constant 0 : index
    %141 = vector.load %arg4[%c0_35, %c4_36, %c0_37] : memref<2x38x38xf32, #tpu.memory_space<vmem>>, vector<1x32x38xf32>
    %142 = vector.shape_cast %141 : vector<1x32x38xf32> to vector<32x38xf32>
    %c28 = arith.constant 28 : index
    %143 = memref.load %arg1[%c28] : memref<98xf32, #tpu.memory_space<smem>>
    %144 = vector.broadcast %143 : f32 to vector<32x38xf32>
    %145 = arith.mulf %144, %142 : vector<32x38xf32>
    %146 = arith.addf %116, %145 : vector<32x38xf32>
    %c29 = arith.constant 29 : index
    %147 = memref.load %arg1[%c29] : memref<98xf32, #tpu.memory_space<smem>>
    %148 = vector.broadcast %147 : f32 to vector<32x38xf32>
    %149 = arith.mulf %148, %142 : vector<32x38xf32>
    %150 = arith.addf %120, %149 : vector<32x38xf32>
    %c30 = arith.constant 30 : index
    %151 = memref.load %arg1[%c30] : memref<98xf32, #tpu.memory_space<smem>>
    %152 = vector.broadcast %151 : f32 to vector<32x38xf32>
    %153 = arith.mulf %152, %142 : vector<32x38xf32>
    %154 = arith.addf %124, %153 : vector<32x38xf32>
    %c31 = arith.constant 31 : index
    %155 = memref.load %arg1[%c31] : memref<98xf32, #tpu.memory_space<smem>>
    %156 = vector.broadcast %155 : f32 to vector<32x38xf32>
    %157 = arith.mulf %156, %142 : vector<32x38xf32>
    %158 = arith.addf %128, %157 : vector<32x38xf32>
    %c32 = arith.constant 32 : index
    %159 = memref.load %arg1[%c32] : memref<98xf32, #tpu.memory_space<smem>>
    %160 = vector.broadcast %159 : f32 to vector<32x38xf32>
    %161 = arith.mulf %160, %142 : vector<32x38xf32>
    %162 = arith.addf %132, %161 : vector<32x38xf32>
    %c33 = arith.constant 33 : index
    %163 = memref.load %arg1[%c33] : memref<98xf32, #tpu.memory_space<smem>>
    %164 = vector.broadcast %163 : f32 to vector<32x38xf32>
    %165 = arith.mulf %164, %142 : vector<32x38xf32>
    %166 = arith.addf %136, %165 : vector<32x38xf32>
    %c34 = arith.constant 34 : index
    %167 = memref.load %arg1[%c34] : memref<98xf32, #tpu.memory_space<smem>>
    %168 = vector.broadcast %167 : f32 to vector<32x38xf32>
    %169 = arith.mulf %168, %142 : vector<32x38xf32>
    %170 = arith.addf %140, %169 : vector<32x38xf32>
    %c0_38 = arith.constant 0 : index
    %c5_39 = arith.constant 5 : index
    %c0_40 = arith.constant 0 : index
    %171 = vector.load %arg4[%c0_38, %c5_39, %c0_40] : memref<2x38x38xf32, #tpu.memory_space<vmem>>, vector<1x32x38xf32>
    %172 = vector.shape_cast %171 : vector<1x32x38xf32> to vector<32x38xf32>
    %c35 = arith.constant 35 : index
    %173 = memref.load %arg1[%c35] : memref<98xf32, #tpu.memory_space<smem>>
    %174 = vector.broadcast %173 : f32 to vector<32x38xf32>
    %175 = arith.mulf %174, %172 : vector<32x38xf32>
    %176 = arith.addf %146, %175 : vector<32x38xf32>
    %c36 = arith.constant 36 : index
    %177 = memref.load %arg1[%c36] : memref<98xf32, #tpu.memory_space<smem>>
    %178 = vector.broadcast %177 : f32 to vector<32x38xf32>
    %179 = arith.mulf %178, %172 : vector<32x38xf32>
    %180 = arith.addf %150, %179 : vector<32x38xf32>
    %c37 = arith.constant 37 : index
    %181 = memref.load %arg1[%c37] : memref<98xf32, #tpu.memory_space<smem>>
    %182 = vector.broadcast %181 : f32 to vector<32x38xf32>
    %183 = arith.mulf %182, %172 : vector<32x38xf32>
    %184 = arith.addf %154, %183 : vector<32x38xf32>
    %c38 = arith.constant 38 : index
    %185 = memref.load %arg1[%c38] : memref<98xf32, #tpu.memory_space<smem>>
    %186 = vector.broadcast %185 : f32 to vector<32x38xf32>
    %187 = arith.mulf %186, %172 : vector<32x38xf32>
    %188 = arith.addf %158, %187 : vector<32x38xf32>
    %c39 = arith.constant 39 : index
    %189 = memref.load %arg1[%c39] : memref<98xf32, #tpu.memory_space<smem>>
    %190 = vector.broadcast %189 : f32 to vector<32x38xf32>
    %191 = arith.mulf %190, %172 : vector<32x38xf32>
    %192 = arith.addf %162, %191 : vector<32x38xf32>
    %c40 = arith.constant 40 : index
    %193 = memref.load %arg1[%c40] : memref<98xf32, #tpu.memory_space<smem>>
    %194 = vector.broadcast %193 : f32 to vector<32x38xf32>
    %195 = arith.mulf %194, %172 : vector<32x38xf32>
    %196 = arith.addf %166, %195 : vector<32x38xf32>
    %c41 = arith.constant 41 : index
    %197 = memref.load %arg1[%c41] : memref<98xf32, #tpu.memory_space<smem>>
    %198 = vector.broadcast %197 : f32 to vector<32x38xf32>
    %199 = arith.mulf %198, %172 : vector<32x38xf32>
    %200 = arith.addf %170, %199 : vector<32x38xf32>
    %c0_41 = arith.constant 0 : index
    %c6_42 = arith.constant 6 : index
    %c0_43 = arith.constant 0 : index
    %201 = vector.load %arg4[%c0_41, %c6_42, %c0_43] : memref<2x38x38xf32, #tpu.memory_space<vmem>>, vector<1x32x38xf32>
    %202 = vector.shape_cast %201 : vector<1x32x38xf32> to vector<32x38xf32>
    %c42 = arith.constant 42 : index
    %203 = memref.load %arg1[%c42] : memref<98xf32, #tpu.memory_space<smem>>
    %204 = vector.broadcast %203 : f32 to vector<32x38xf32>
    %205 = arith.mulf %204, %202 : vector<32x38xf32>
    %206 = arith.addf %176, %205 : vector<32x38xf32>
    %c43 = arith.constant 43 : index
    %207 = memref.load %arg1[%c43] : memref<98xf32, #tpu.memory_space<smem>>
    %208 = vector.broadcast %207 : f32 to vector<32x38xf32>
    %209 = arith.mulf %208, %202 : vector<32x38xf32>
    %210 = arith.addf %180, %209 : vector<32x38xf32>
    %c44 = arith.constant 44 : index
    %211 = memref.load %arg1[%c44] : memref<98xf32, #tpu.memory_space<smem>>
    %212 = vector.broadcast %211 : f32 to vector<32x38xf32>
    %213 = arith.mulf %212, %202 : vector<32x38xf32>
    %214 = arith.addf %184, %213 : vector<32x38xf32>
    %c45 = arith.constant 45 : index
    %215 = memref.load %arg1[%c45] : memref<98xf32, #tpu.memory_space<smem>>
    %216 = vector.broadcast %215 : f32 to vector<32x38xf32>
    %217 = arith.mulf %216, %202 : vector<32x38xf32>
    %218 = arith.addf %188, %217 : vector<32x38xf32>
    %c46 = arith.constant 46 : index
    %219 = memref.load %arg1[%c46] : memref<98xf32, #tpu.memory_space<smem>>
    %220 = vector.broadcast %219 : f32 to vector<32x38xf32>
    %221 = arith.mulf %220, %202 : vector<32x38xf32>
    %222 = arith.addf %192, %221 : vector<32x38xf32>
    %c47 = arith.constant 47 : index
    %223 = memref.load %arg1[%c47] : memref<98xf32, #tpu.memory_space<smem>>
    %224 = vector.broadcast %223 : f32 to vector<32x38xf32>
    %225 = arith.mulf %224, %202 : vector<32x38xf32>
    %226 = arith.addf %196, %225 : vector<32x38xf32>
    %c48 = arith.constant 48 : index
    %227 = memref.load %arg1[%c48] : memref<98xf32, #tpu.memory_space<smem>>
    %228 = vector.broadcast %227 : f32 to vector<32x38xf32>
    %229 = arith.mulf %228, %202 : vector<32x38xf32>
    %230 = arith.addf %200, %229 : vector<32x38xf32>
    %c1_44 = arith.constant 1 : index
    %c0_45 = arith.constant 0 : index
    %c0_46 = arith.constant 0 : index
    %231 = vector.load %arg4[%c1_44, %c0_45, %c0_46] : memref<2x38x38xf32, #tpu.memory_space<vmem>>, vector<1x32x38xf32>
    %232 = vector.shape_cast %231 : vector<1x32x38xf32> to vector<32x38xf32>
    %c49 = arith.constant 49 : index
    %233 = memref.load %arg1[%c49] : memref<98xf32, #tpu.memory_space<smem>>
    %234 = vector.broadcast %233 : f32 to vector<32x38xf32>
    %235 = arith.mulf %234, %232 : vector<32x38xf32>
    %236 = arith.addf %206, %235 : vector<32x38xf32>
    %c50 = arith.constant 50 : index
    %237 = memref.load %arg1[%c50] : memref<98xf32, #tpu.memory_space<smem>>
    %238 = vector.broadcast %237 : f32 to vector<32x38xf32>
    %239 = arith.mulf %238, %232 : vector<32x38xf32>
    %240 = arith.addf %210, %239 : vector<32x38xf32>
    %c51 = arith.constant 51 : index
    %241 = memref.load %arg1[%c51] : memref<98xf32, #tpu.memory_space<smem>>
    %242 = vector.broadcast %241 : f32 to vector<32x38xf32>
    %243 = arith.mulf %242, %232 : vector<32x38xf32>
    %244 = arith.addf %214, %243 : vector<32x38xf32>
    %c52 = arith.constant 52 : index
    %245 = memref.load %arg1[%c52] : memref<98xf32, #tpu.memory_space<smem>>
    %246 = vector.broadcast %245 : f32 to vector<32x38xf32>
    %247 = arith.mulf %246, %232 : vector<32x38xf32>
    %248 = arith.addf %218, %247 : vector<32x38xf32>
    %c53 = arith.constant 53 : index
    %249 = memref.load %arg1[%c53] : memref<98xf32, #tpu.memory_space<smem>>
    %250 = vector.broadcast %249 : f32 to vector<32x38xf32>
    %251 = arith.mulf %250, %232 : vector<32x38xf32>
    %252 = arith.addf %222, %251 : vector<32x38xf32>
    %c54 = arith.constant 54 : index
    %253 = memref.load %arg1[%c54] : memref<98xf32, #tpu.memory_space<smem>>
    %254 = vector.broadcast %253 : f32 to vector<32x38xf32>
    %255 = arith.mulf %254, %232 : vector<32x38xf32>
    %256 = arith.addf %226, %255 : vector<32x38xf32>
    %c55 = arith.constant 55 : index
    %257 = memref.load %arg1[%c55] : memref<98xf32, #tpu.memory_space<smem>>
    %258 = vector.broadcast %257 : f32 to vector<32x38xf32>
    %259 = arith.mulf %258, %232 : vector<32x38xf32>
    %260 = arith.addf %230, %259 : vector<32x38xf32>
    %c1_47 = arith.constant 1 : index
    %c1_48 = arith.constant 1 : index
    %c0_49 = arith.constant 0 : index
    %261 = vector.load %arg4[%c1_47, %c1_48, %c0_49] : memref<2x38x38xf32, #tpu.memory_space<vmem>>, vector<1x32x38xf32>
    %262 = vector.shape_cast %261 : vector<1x32x38xf32> to vector<32x38xf32>
    %c56 = arith.constant 56 : index
    %263 = memref.load %arg1[%c56] : memref<98xf32, #tpu.memory_space<smem>>
    %264 = vector.broadcast %263 : f32 to vector<32x38xf32>
    %265 = arith.mulf %264, %262 : vector<32x38xf32>
    %266 = arith.addf %236, %265 : vector<32x38xf32>
    %c57 = arith.constant 57 : index
    %267 = memref.load %arg1[%c57] : memref<98xf32, #tpu.memory_space<smem>>
    %268 = vector.broadcast %267 : f32 to vector<32x38xf32>
    %269 = arith.mulf %268, %262 : vector<32x38xf32>
    %270 = arith.addf %240, %269 : vector<32x38xf32>
    %c58 = arith.constant 58 : index
    %271 = memref.load %arg1[%c58] : memref<98xf32, #tpu.memory_space<smem>>
    %272 = vector.broadcast %271 : f32 to vector<32x38xf32>
    %273 = arith.mulf %272, %262 : vector<32x38xf32>
    %274 = arith.addf %244, %273 : vector<32x38xf32>
    %c59 = arith.constant 59 : index
    %275 = memref.load %arg1[%c59] : memref<98xf32, #tpu.memory_space<smem>>
    %276 = vector.broadcast %275 : f32 to vector<32x38xf32>
    %277 = arith.mulf %276, %262 : vector<32x38xf32>
    %278 = arith.addf %248, %277 : vector<32x38xf32>
    %c60 = arith.constant 60 : index
    %279 = memref.load %arg1[%c60] : memref<98xf32, #tpu.memory_space<smem>>
    %280 = vector.broadcast %279 : f32 to vector<32x38xf32>
    %281 = arith.mulf %280, %262 : vector<32x38xf32>
    %282 = arith.addf %252, %281 : vector<32x38xf32>
    %c61 = arith.constant 61 : index
    %283 = memref.load %arg1[%c61] : memref<98xf32, #tpu.memory_space<smem>>
    %284 = vector.broadcast %283 : f32 to vector<32x38xf32>
    %285 = arith.mulf %284, %262 : vector<32x38xf32>
    %286 = arith.addf %256, %285 : vector<32x38xf32>
    %c62 = arith.constant 62 : index
    %287 = memref.load %arg1[%c62] : memref<98xf32, #tpu.memory_space<smem>>
    %288 = vector.broadcast %287 : f32 to vector<32x38xf32>
    %289 = arith.mulf %288, %262 : vector<32x38xf32>
    %290 = arith.addf %260, %289 : vector<32x38xf32>
    %c1_50 = arith.constant 1 : index
    %c2_51 = arith.constant 2 : index
    %c0_52 = arith.constant 0 : index
    %291 = vector.load %arg4[%c1_50, %c2_51, %c0_52] : memref<2x38x38xf32, #tpu.memory_space<vmem>>, vector<1x32x38xf32>
    %292 = vector.shape_cast %291 : vector<1x32x38xf32> to vector<32x38xf32>
    %c63 = arith.constant 63 : index
    %293 = memref.load %arg1[%c63] : memref<98xf32, #tpu.memory_space<smem>>
    %294 = vector.broadcast %293 : f32 to vector<32x38xf32>
    %295 = arith.mulf %294, %292 : vector<32x38xf32>
    %296 = arith.addf %266, %295 : vector<32x38xf32>
    %c64 = arith.constant 64 : index
    %297 = memref.load %arg1[%c64] : memref<98xf32, #tpu.memory_space<smem>>
    %298 = vector.broadcast %297 : f32 to vector<32x38xf32>
    %299 = arith.mulf %298, %292 : vector<32x38xf32>
    %300 = arith.addf %270, %299 : vector<32x38xf32>
    %c65 = arith.constant 65 : index
    %301 = memref.load %arg1[%c65] : memref<98xf32, #tpu.memory_space<smem>>
    %302 = vector.broadcast %301 : f32 to vector<32x38xf32>
    %303 = arith.mulf %302, %292 : vector<32x38xf32>
    %304 = arith.addf %274, %303 : vector<32x38xf32>
    %c66 = arith.constant 66 : index
    %305 = memref.load %arg1[%c66] : memref<98xf32, #tpu.memory_space<smem>>
    %306 = vector.broadcast %305 : f32 to vector<32x38xf32>
    %307 = arith.mulf %306, %292 : vector<32x38xf32>
    %308 = arith.addf %278, %307 : vector<32x38xf32>
    %c67 = arith.constant 67 : index
    %309 = memref.load %arg1[%c67] : memref<98xf32, #tpu.memory_space<smem>>
    %310 = vector.broadcast %309 : f32 to vector<32x38xf32>
    %311 = arith.mulf %310, %292 : vector<32x38xf32>
    %312 = arith.addf %282, %311 : vector<32x38xf32>
    %c68 = arith.constant 68 : index
    %313 = memref.load %arg1[%c68] : memref<98xf32, #tpu.memory_space<smem>>
    %314 = vector.broadcast %313 : f32 to vector<32x38xf32>
    %315 = arith.mulf %314, %292 : vector<32x38xf32>
    %316 = arith.addf %286, %315 : vector<32x38xf32>
    %c69 = arith.constant 69 : index
    %317 = memref.load %arg1[%c69] : memref<98xf32, #tpu.memory_space<smem>>
    %318 = vector.broadcast %317 : f32 to vector<32x38xf32>
    %319 = arith.mulf %318, %292 : vector<32x38xf32>
    %320 = arith.addf %290, %319 : vector<32x38xf32>
    %c1_53 = arith.constant 1 : index
    %c3_54 = arith.constant 3 : index
    %c0_55 = arith.constant 0 : index
    %321 = vector.load %arg4[%c1_53, %c3_54, %c0_55] : memref<2x38x38xf32, #tpu.memory_space<vmem>>, vector<1x32x38xf32>
    %322 = vector.shape_cast %321 : vector<1x32x38xf32> to vector<32x38xf32>
    %c70 = arith.constant 70 : index
    %323 = memref.load %arg1[%c70] : memref<98xf32, #tpu.memory_space<smem>>
    %324 = vector.broadcast %323 : f32 to vector<32x38xf32>
    %325 = arith.mulf %324, %322 : vector<32x38xf32>
    %326 = arith.addf %296, %325 : vector<32x38xf32>
    %c71 = arith.constant 71 : index
    %327 = memref.load %arg1[%c71] : memref<98xf32, #tpu.memory_space<smem>>
    %328 = vector.broadcast %327 : f32 to vector<32x38xf32>
    %329 = arith.mulf %328, %322 : vector<32x38xf32>
    %330 = arith.addf %300, %329 : vector<32x38xf32>
    %c72 = arith.constant 72 : index
    %331 = memref.load %arg1[%c72] : memref<98xf32, #tpu.memory_space<smem>>
    %332 = vector.broadcast %331 : f32 to vector<32x38xf32>
    %333 = arith.mulf %332, %322 : vector<32x38xf32>
    %334 = arith.addf %304, %333 : vector<32x38xf32>
    %c73 = arith.constant 73 : index
    %335 = memref.load %arg1[%c73] : memref<98xf32, #tpu.memory_space<smem>>
    %336 = vector.broadcast %335 : f32 to vector<32x38xf32>
    %337 = arith.mulf %336, %322 : vector<32x38xf32>
    %338 = arith.addf %308, %337 : vector<32x38xf32>
    %c74 = arith.constant 74 : index
    %339 = memref.load %arg1[%c74] : memref<98xf32, #tpu.memory_space<smem>>
    %340 = vector.broadcast %339 : f32 to vector<32x38xf32>
    %341 = arith.mulf %340, %322 : vector<32x38xf32>
    %342 = arith.addf %312, %341 : vector<32x38xf32>
    %c75 = arith.constant 75 : index
    %343 = memref.load %arg1[%c75] : memref<98xf32, #tpu.memory_space<smem>>
    %344 = vector.broadcast %343 : f32 to vector<32x38xf32>
    %345 = arith.mulf %344, %322 : vector<32x38xf32>
    %346 = arith.addf %316, %345 : vector<32x38xf32>
    %c76 = arith.constant 76 : index
    %347 = memref.load %arg1[%c76] : memref<98xf32, #tpu.memory_space<smem>>
    %348 = vector.broadcast %347 : f32 to vector<32x38xf32>
    %349 = arith.mulf %348, %322 : vector<32x38xf32>
    %350 = arith.addf %320, %349 : vector<32x38xf32>
    %c1_56 = arith.constant 1 : index
    %c4_57 = arith.constant 4 : index
    %c0_58 = arith.constant 0 : index
    %351 = vector.load %arg4[%c1_56, %c4_57, %c0_58] : memref<2x38x38xf32, #tpu.memory_space<vmem>>, vector<1x32x38xf32>
    %352 = vector.shape_cast %351 : vector<1x32x38xf32> to vector<32x38xf32>
    %c77 = arith.constant 77 : index
    %353 = memref.load %arg1[%c77] : memref<98xf32, #tpu.memory_space<smem>>
    %354 = vector.broadcast %353 : f32 to vector<32x38xf32>
    %355 = arith.mulf %354, %352 : vector<32x38xf32>
    %356 = arith.addf %326, %355 : vector<32x38xf32>
    %c78 = arith.constant 78 : index
    %357 = memref.load %arg1[%c78] : memref<98xf32, #tpu.memory_space<smem>>
    %358 = vector.broadcast %357 : f32 to vector<32x38xf32>
    %359 = arith.mulf %358, %352 : vector<32x38xf32>
    %360 = arith.addf %330, %359 : vector<32x38xf32>
    %c79 = arith.constant 79 : index
    %361 = memref.load %arg1[%c79] : memref<98xf32, #tpu.memory_space<smem>>
    %362 = vector.broadcast %361 : f32 to vector<32x38xf32>
    %363 = arith.mulf %362, %352 : vector<32x38xf32>
    %364 = arith.addf %334, %363 : vector<32x38xf32>
    %c80 = arith.constant 80 : index
    %365 = memref.load %arg1[%c80] : memref<98xf32, #tpu.memory_space<smem>>
    %366 = vector.broadcast %365 : f32 to vector<32x38xf32>
    %367 = arith.mulf %366, %352 : vector<32x38xf32>
    %368 = arith.addf %338, %367 : vector<32x38xf32>
    %c81 = arith.constant 81 : index
    %369 = memref.load %arg1[%c81] : memref<98xf32, #tpu.memory_space<smem>>
    %370 = vector.broadcast %369 : f32 to vector<32x38xf32>
    %371 = arith.mulf %370, %352 : vector<32x38xf32>
    %372 = arith.addf %342, %371 : vector<32x38xf32>
    %c82 = arith.constant 82 : index
    %373 = memref.load %arg1[%c82] : memref<98xf32, #tpu.memory_space<smem>>
    %374 = vector.broadcast %373 : f32 to vector<32x38xf32>
    %375 = arith.mulf %374, %352 : vector<32x38xf32>
    %376 = arith.addf %346, %375 : vector<32x38xf32>
    %c83 = arith.constant 83 : index
    %377 = memref.load %arg1[%c83] : memref<98xf32, #tpu.memory_space<smem>>
    %378 = vector.broadcast %377 : f32 to vector<32x38xf32>
    %379 = arith.mulf %378, %352 : vector<32x38xf32>
    %380 = arith.addf %350, %379 : vector<32x38xf32>
    %c1_59 = arith.constant 1 : index
    %c5_60 = arith.constant 5 : index
    %c0_61 = arith.constant 0 : index
    %381 = vector.load %arg4[%c1_59, %c5_60, %c0_61] : memref<2x38x38xf32, #tpu.memory_space<vmem>>, vector<1x32x38xf32>
    %382 = vector.shape_cast %381 : vector<1x32x38xf32> to vector<32x38xf32>
    %c84 = arith.constant 84 : index
    %383 = memref.load %arg1[%c84] : memref<98xf32, #tpu.memory_space<smem>>
    %384 = vector.broadcast %383 : f32 to vector<32x38xf32>
    %385 = arith.mulf %384, %382 : vector<32x38xf32>
    %386 = arith.addf %356, %385 : vector<32x38xf32>
    %c85 = arith.constant 85 : index
    %387 = memref.load %arg1[%c85] : memref<98xf32, #tpu.memory_space<smem>>
    %388 = vector.broadcast %387 : f32 to vector<32x38xf32>
    %389 = arith.mulf %388, %382 : vector<32x38xf32>
    %390 = arith.addf %360, %389 : vector<32x38xf32>
    %c86 = arith.constant 86 : index
    %391 = memref.load %arg1[%c86] : memref<98xf32, #tpu.memory_space<smem>>
    %392 = vector.broadcast %391 : f32 to vector<32x38xf32>
    %393 = arith.mulf %392, %382 : vector<32x38xf32>
    %394 = arith.addf %364, %393 : vector<32x38xf32>
    %c87 = arith.constant 87 : index
    %395 = memref.load %arg1[%c87] : memref<98xf32, #tpu.memory_space<smem>>
    %396 = vector.broadcast %395 : f32 to vector<32x38xf32>
    %397 = arith.mulf %396, %382 : vector<32x38xf32>
    %398 = arith.addf %368, %397 : vector<32x38xf32>
    %c88 = arith.constant 88 : index
    %399 = memref.load %arg1[%c88] : memref<98xf32, #tpu.memory_space<smem>>
    %400 = vector.broadcast %399 : f32 to vector<32x38xf32>
    %401 = arith.mulf %400, %382 : vector<32x38xf32>
    %402 = arith.addf %372, %401 : vector<32x38xf32>
    %c89 = arith.constant 89 : index
    %403 = memref.load %arg1[%c89] : memref<98xf32, #tpu.memory_space<smem>>
    %404 = vector.broadcast %403 : f32 to vector<32x38xf32>
    %405 = arith.mulf %404, %382 : vector<32x38xf32>
    %406 = arith.addf %376, %405 : vector<32x38xf32>
    %c90 = arith.constant 90 : index
    %407 = memref.load %arg1[%c90] : memref<98xf32, #tpu.memory_space<smem>>
    %408 = vector.broadcast %407 : f32 to vector<32x38xf32>
    %409 = arith.mulf %408, %382 : vector<32x38xf32>
    %410 = arith.addf %380, %409 : vector<32x38xf32>
    %c1_62 = arith.constant 1 : index
    %c6_63 = arith.constant 6 : index
    %c0_64 = arith.constant 0 : index
    %411 = vector.load %arg4[%c1_62, %c6_63, %c0_64] : memref<2x38x38xf32, #tpu.memory_space<vmem>>, vector<1x32x38xf32>
    %412 = vector.shape_cast %411 : vector<1x32x38xf32> to vector<32x38xf32>
    %c91 = arith.constant 91 : index
    %413 = memref.load %arg1[%c91] : memref<98xf32, #tpu.memory_space<smem>>
    %414 = vector.broadcast %413 : f32 to vector<32x38xf32>
    %415 = arith.mulf %414, %412 : vector<32x38xf32>
    %416 = arith.addf %386, %415 : vector<32x38xf32>
    %c92 = arith.constant 92 : index
    %417 = memref.load %arg1[%c92] : memref<98xf32, #tpu.memory_space<smem>>
    %418 = vector.broadcast %417 : f32 to vector<32x38xf32>
    %419 = arith.mulf %418, %412 : vector<32x38xf32>
    %420 = arith.addf %390, %419 : vector<32x38xf32>
    %c93 = arith.constant 93 : index
    %421 = memref.load %arg1[%c93] : memref<98xf32, #tpu.memory_space<smem>>
    %422 = vector.broadcast %421 : f32 to vector<32x38xf32>
    %423 = arith.mulf %422, %412 : vector<32x38xf32>
    %424 = arith.addf %394, %423 : vector<32x38xf32>
    %c94 = arith.constant 94 : index
    %425 = memref.load %arg1[%c94] : memref<98xf32, #tpu.memory_space<smem>>
    %426 = vector.broadcast %425 : f32 to vector<32x38xf32>
    %427 = arith.mulf %426, %412 : vector<32x38xf32>
    %428 = arith.addf %398, %427 : vector<32x38xf32>
    %c95 = arith.constant 95 : index
    %429 = memref.load %arg1[%c95] : memref<98xf32, #tpu.memory_space<smem>>
    %430 = vector.broadcast %429 : f32 to vector<32x38xf32>
    %431 = arith.mulf %430, %412 : vector<32x38xf32>
    %432 = arith.addf %402, %431 : vector<32x38xf32>
    %c96 = arith.constant 96 : index
    %433 = memref.load %arg1[%c96] : memref<98xf32, #tpu.memory_space<smem>>
    %434 = vector.broadcast %433 : f32 to vector<32x38xf32>
    %435 = arith.mulf %434, %412 : vector<32x38xf32>
    %436 = arith.addf %406, %435 : vector<32x38xf32>
    %c97 = arith.constant 97 : index
    %437 = memref.load %arg1[%c97] : memref<98xf32, #tpu.memory_space<smem>>
    %438 = vector.broadcast %437 : f32 to vector<32x38xf32>
    %439 = arith.mulf %438, %412 : vector<32x38xf32>
    %440 = arith.addf %410, %439 : vector<32x38xf32>
    %441 = vector.extract_strided_slice %416 {offsets = [0, 0], sizes = [32, 32], strides = [1, 1]} : vector<32x38xf32> to vector<32x32xf32>
    %442 = vector.extract_strided_slice %420 {offsets = [0, 1], sizes = [32, 32], strides = [1, 1]} : vector<32x38xf32> to vector<32x32xf32>
    %443 = arith.addf %441, %442 : vector<32x32xf32>
    %444 = vector.extract_strided_slice %424 {offsets = [0, 2], sizes = [32, 32], strides = [1, 1]} : vector<32x38xf32> to vector<32x32xf32>
    %445 = arith.addf %443, %444 : vector<32x32xf32>
    %446 = vector.extract_strided_slice %428 {offsets = [0, 3], sizes = [32, 32], strides = [1, 1]} : vector<32x38xf32> to vector<32x32xf32>
    %447 = arith.addf %445, %446 : vector<32x32xf32>
    %448 = vector.extract_strided_slice %432 {offsets = [0, 4], sizes = [32, 32], strides = [1, 1]} : vector<32x38xf32> to vector<32x32xf32>
    %449 = arith.addf %447, %448 : vector<32x32xf32>
    %450 = vector.extract_strided_slice %436 {offsets = [0, 5], sizes = [32, 32], strides = [1, 1]} : vector<32x38xf32> to vector<32x32xf32>
    %451 = arith.addf %449, %450 : vector<32x32xf32>
    %452 = vector.extract_strided_slice %440 {offsets = [0, 6], sizes = [32, 32], strides = [1, 1]} : vector<32x38xf32> to vector<32x32xf32>
    %453 = arith.addf %451, %452 : vector<32x32xf32>
    %454 = arith.negf %453 : vector<32x32xf32>
    %455 = math.exp %454 : vector<32x32xf32>
    %cst_65 = arith.constant 1.000000e+00 : f32
    %456 = vector.broadcast %cst_65 : f32 to vector<32x32xf32>
    %457 = arith.addf %456, %455 : vector<32x32xf32>
    %458 = arith.divf %456, %457 : vector<32x32xf32>
    %c0_66 = arith.constant 0 : index
    %c0_67 = arith.constant 0 : index
    %c0_68 = arith.constant 0 : index
    %c0_69 = arith.constant 0 : index
    %459 = vector.load %arg2[%c0_66, %c0_67, %c0_68, %c0_69] : memref<1x8x32x32xf32, #tpu.memory_space<vmem>>, vector<1x8x32x32xf32>
    %460 = vector.shape_cast %459 : vector<1x8x32x32xf32> to vector<8x32x32xf32>
    %461 = vector.shape_cast %458 : vector<32x32xf32> to vector<1x32x32xf32>
    %462 = vector.broadcast %461 : vector<1x32x32xf32> to vector<8x32x32xf32>
    %463 = arith.mulf %460, %462 : vector<8x32x32xf32>
    %c0_70 = arith.constant 0 : index
    %c0_71 = arith.constant 0 : index
    %c0_72 = arith.constant 0 : index
    %c0_73 = arith.constant 0 : index
    %464 = vector.load %arg3[%c0_70, %c0_71, %c0_72, %c0_73] : memref<1x8x32x32xf32, #tpu.memory_space<vmem>>, vector<1x8x32x32xf32>
    %465 = vector.shape_cast %464 : vector<1x8x32x32xf32> to vector<8x32x32xf32>
    %466 = vector.shape_cast %463 : vector<8x32x32xf32> to vector<1x8x32x32xf32>
    tpu.vector_store %arg3[%c0_70, %c0_71, %c0_72, %c0_73], %466 {strides = array<i32>} : memref<1x8x32x32xf32, #tpu.memory_space<vmem>>, vector<1x8x32x32xf32>,
    return
  }
  func.func @transform_0(%arg0: i32) -> i32 {
    %c0_i32 = arith.constant 0 : i32
    %c0_i32_0 = arith.constant 0 : i32
    return %c0_i32 : i32
  }
  func.func @transform_1(%arg0: i32) -> (i32, i32, i32, i32) {
    %c0_i32 = arith.constant 0 : i32
    %c0_i32_0 = arith.constant 0 : i32
    %c0_i32_1 = arith.constant 0 : i32
    %c0_i32_2 = arith.constant 0 : i32
    return %arg0, %c0_i32, %c0_i32_0, %c0_i32_1 : i32, i32, i32, i32
  }
  func.func @transform_2(%arg0: i32) -> (i32, i32, i32, i32) {
    %c0_i32 = arith.constant 0 : i32
    %c0_i32_0 = arith.constant 0 : i32
    %c0_i32_1 = arith.constant 0 : i32
    %c0_i32_2 = arith.constant 0 : i32
    return %arg0, %c0_i32, %c0_i32_0, %c0_i32_1 : i32, i32, i32, i32
  }
}

</mosaic_0001>

<bundles_post_ra>
// kernel: spatial_attention_forward.1
= control target key start
LH: loop header
LB: loop body
LE: loop exit
PB: predicated region body
PF: predicated region fallthrough
CT: control target
= control target key end

     0   :  { %s4184_s0 = inlined_call_operand.vmem [shape: f32[98], index: 0, kind: input, shape index: {}]   ;;  %s4185_s1 = inlined_call_operand.hbm [shape: f32[2,8,32,32], index: 1, kind: input, shape index: {}]   ;;  %s4186_s2 = inlined_call_operand.hbm [shape: f32[2,8,32,32], index: 2, kind: output, shape index: {}]  }
   0x1   :  { %4365 = sst [smem:[#allocation148_spill]] %s4184_s0 }
   0x2   :  { %4366 = sst [smem:[#allocation149_spill]] %s4185_s1 }
   0x3   :  { %4367 = sst [smem:[#allocation150_spill]] %s4186_s2 }
   0x4   :  { %7 = vsyncpa [#allocation6], 0 }
   0x5   :  { %8 = vsyncpa [#allocation4], 0 }
   0x6   :  { %10 = vsyncpa [#allocation4 + $0x1], 0 }
   0x7   :  { %11 = vsyncpa [#allocation5], 0 }
   0x8   :  { %13 = vsyncpa [#allocation5 + $0x1], 0  ;;  %s2170_s9 = smov 0   ;;  %s2172_s10 = smov 0  }
   0x9   :  { %s2174_s11 = smov 0   ;;  %s2176_s12 = smov 0  }
   0xa LB: > { %4368 = sst [smem:[#allocation12_spill]] %s2126_s9  ;;  %s2191_s13 = sadd.s32 4294967295, %s2138_s12   ;;  %s2138_s12 = sphi %s2176_s12, %s4738_s12   ;;  %s2134_s11 = sphi %s2174_s11, %s4741_s11   ;;  %s2130_s10 = sphi %s2172_s10, %s4740_s10   ;;  %s2126_s9 = sphi %s2170_s9, %s4739_s9  }
   0xb   : > { %4369 = sst [smem:[#allocation13_spill]] %s2130_s10  ;;  %s1763_s14 = sadd.s32 4294967294, %s2138_s12  }
   0xc   : > { %4370 = sst [smem:[#allocation14_spill]] %s2134_s11  ;;  %s2195_s15 = sadd.s32 1, %s2138_s12  }
   0xd   : > { %4371 = sst [smem:[#allocation15_spill]] %s2138_s12  ;;  %s47_s16 = sadd.s32 1, %s2134_s11 }
   0xe   : > { %4372 = sst [smem:[#allocation16_spill]] %s2191_s13  ;;  %s44_s17 = ssub.s32 %s2138_s12, %s2195_s15 }
   0xf   : > { %4373 = sst [smem:[#allocation17_spill]] %s2195_s15  ;;  %p54_p0 = scmp.ne.s32.totalorder %s2134_s11, %s2130_s10 }
  0x10   : > { %p45_p1 = scmp.eq.s32.totalorder %s44_s17, 0  ;;  %p55_p2 = scmp.eq.s32.totalorder %s2138_s12, 0 }
  0x11   : > { %p60_p3 = scmp.ne.s32.totalorder %s2130_s10, %s2126_s9  ;;  %p4188_p4 = scmp.eq.s32.totalorder %s2191_s13, 0 }
  0x12   : > { %s2207_s18 = scalar_select %p45_p1, %s2134_s11, %s47_s16  }
  0x13   : > { %p2209_p5 = por %p55_p2, %p54_p0  ;;  %p2215_p6 = por %p4188_p4, %p60_p3 }
  0x14   : > { %4374 = sst [smem:[#allocation18_spill]] %s2207_s18  ;;  %p84_p7 = scmp.eq.s32.totalorder %s2191_s13, 1 }
  0x15   : > { %s4376_s20 = scalar_select %p2215_p6, 1, 0 }
  0x16   : > { %p90_p8 = scmp.eq.s32.totalorder %s1763_s14, 1  ;;  %p1764_p9 = scmp.ge.s32.totalorder %s2138_s12, 1 }
  0x17   : > { %p97_p10 = scmp.lt.s32.totalorder %s2138_s12, 3  ;;  %p2222_p11 = por %p84_p7, %p54_p0 }
  0x18   : > { %p2226_p12 = por %p90_p8, %p60_p3  ;;  %s4382_s0 = sld [smem:[#allocation148_spill]] }
  0x19   : > { %s4377_s21 = scalar_select %p2222_p11, 1, 0 }
  0x1a   : > { %s4379_s22 = scalar_select %p2226_p12, 1, 0 }
  0x1b   : > { %4378 = sst [smem:[#allocation19_spill]] %s4377_s21  ;;  %p2230_p13 = pnand %p1764_p9, %p97_p10 }
  0x1c   : > { %4380 = sst [smem:[#allocation20_spill]] %s4379_s22  ;;  %p1903_p2 = scmp.lt.s32.totalorder %s2138_s12, 2 }
  0x1d   : > { %p1890_p1 = pneg %p2230_p13  ;;  %s121_s28 = sand.u32 1, %s2134_s11  }
  0x1e   : > { %s110_s26 = sshll.u32 %s4382_s0, 4  ;;  %p2250_p3 = pnand %p1903_p2, %p2209_p5  ;;  %s111_s26 = int_to_ptr.vmem [resolvable:$true] %s110_s26 }
  0x1f   : > { %p2243_p7 = pnand %p1890_p1, %p4188_p4  ;;  %s1767_s30 = sshll.u32 %s121_s28, 8 }
  0x20   : > { %s2023_s3 = scalar_lea.vmem %s111_s26, 16  ;;  %p2031_p12 = scmp.lt.s32.totalorder %s111_s26, %s111_s26 }
  0x21   : > { %p2024_p8 = scmp.ne.s32.totalorder %s111_s26, %s2023_s3  ;;  %p2025_p9 = pneg %p2243_p7 }
  0x22   : > { %p2032_p11 = scmp.lt.s32.totalorder %s2023_s3, %s2023_s3 }
  0x23   : > { %p2026_p10 = pnand %p2025_p9, %p2024_p8 }
  0x24   : > { %p2033_p1 = por %p2032_p11, %p2031_p12 }
  0x25   : > { %p2027_p0 = pneg %p2026_p10 }
  0x27   : > { %p2034_p4 = pnand %p2033_p1, %p2027_p0 }
  0x29   : > { %2037 = shalt.err (!%p2034_p4)
}
  0x2a   : > { %s2140_s4 = smov [#allocation3]   ;;  %s1880_s5 = sshll.u32 %s2138_s12, 12 }
  0x2b   : > { %1893 = dma.vmem_to_smem (!%p2243_p7), %s111_s26, 16, %s2140_s4, [#allocation6]  }
  0x2c   : > { %s125_s6 = scalar_lea.vmem [#allocation7], %s1767_s30  ;;  %s4385_s1 = sld [smem:[#allocation149_spill]] }
  0x2d   : > { %s132_s7 = sshll.u32 %s125_s6, 4  ;;  %s2266_s17 = scalar_lea.sflag [#allocation4], %s121_s28  ;;  %s2264_s7 = int_to_ptr.vmem [resolvable:$true] %s132_s7 }
  0x2e   : > { %p2040_p5 = pneg %p2250_p3 }
  0x32   : > { %s2262_s16 = scalar_lea.hbm %s4385_s1, %s1880_s5  ;;  %s2043_s26 = scalar_lea.hbm %s4385_s1, 8192 }
  0x33   : > { %s2038_s19 = scalar_lea.hbm %s2262_s16, 4096  ;;  %p2044_p0 = scmp.lt.u32.totalorder %s2262_s16, %s4385_s1 }
  0x34   : > { %p2039_p4 = scmp.ne.s32.totalorder %s2262_s16, %s2038_s19  ;;  %p2045_p2 = scmp.lt.u32.totalorder %s2043_s26, %s2038_s19 }
  0x35   : > { %p2047_p8 = scmp.lt.u32.totalorder %s2038_s19, %s2262_s16 }
  0x36   : > { %p2041_p11 = pnand %p2040_p5, %p2039_p4  ;;  %p2046_p7 = por %p2045_p2, %p2044_p0 }
  0x38   : > { %p2042_p12 = pneg %p2041_p11  ;;  %p2048_p9 = por %p2047_p8, %p2046_p7 }
  0x3a   : > { %p2049_p10 = pnand %p2048_p9, %p2042_p12 }
  0x3c   : > { %2052 = shalt.err (!%p2049_p10)
}
  0x3d   : > { %s2053_s28 = scalar_lea.vmem %s2264_s7, 4096  ;;  %s2141_s3 = smov [#allocation7]  }
  0x3e   : > { %p2054_p1 = scmp.ne.s32.totalorder %s2264_s7, %s2053_s28  ;;  %s2058_s4 = sshll.u32 %s2141_s3, 4  ;;  %s2059_s4 = int_to_ptr.vmem [resolvable:$false] %s2058_s4 }
  0x3f   : > { %s2060_s5 = scalar_lea.vmem %s2059_s4, 8192  ;;  %p2061_p6 = scmp.lt.s32.totalorder %s2264_s7, %s2059_s4 }
  0x40   : > { %p2056_p4 = pnand %p2054_p1, %p2040_p5  ;;  %p2062_p0 = scmp.lt.s32.totalorder %s2060_s5, %s2053_s28 }
  0x42   : > { %p2057_p11 = pneg %p2056_p4  ;;  %p2063_p2 = por %p2062_p0, %p2061_p6 }
  0x44   : > { %p2064_p7 = pnand %p2063_p2, %p2057_p11 }
  0x46   : > { %2067 = shalt.err (!%p2064_p7)
}
  0x47   : > { %s2142_s6 = smov 128   ;;  %s2143_s8 = smov 8  }
  0x48   : > { %1897 = dma.hbm_to_vmem [thread:$0]  (!%p2250_p3), %s2262_s16, 4096, %s2264_s7, %s2266_s17, %s2142_s6, %s2142_s6, %s2143_s8  }
  0x49   : > { %144 = sbr.rel (%p2230_p13) target bundleno = 587 (0x24b), region = 28 }
  0x50   : > { %p4386_p5 = scmp.eq.s32.totalorder %s2191_s13, 0 }
  0x52   : > { %2113 = dma.done.wait (%p4386_p5), [#allocation6], 16   ;;  %p4387_p12 = pmov %p4386_p5 }
  0x53   : > { %s2301_s14 = sand.u32 1, %s2130_s10   ;;  %p4390_p6 = scmp.ne.s32.totalorder %s4376_s20, 0 }
  0x54   : > { %2115 = vsyncadd (%p4387_p12), [#allocation6], 4294967280  ;;  %4388 = sst [smem:[#allocation21_spill]] %s2301_s14  ;;  %s4190_s19 = sshll.u32 %s2301_s14, 8 }
  0x55   : > { %s151_s24 = scalar_lea.sflag [#allocation4], %s2301_s14  ;;  %s2307_s29 = scalar_lea.vmem [#allocation7], %s4190_s19 }
  0x56   : > { %4389 = sst [smem:[#allocation22_spill]] %s2307_s29 }
  0x57   : > { %2117 = dma.done.wait (%p4390_p6), %s151_s24, 4096  }
  0x58   : > { %2119 = vsyncadd (%p4390_p6), %s151_s24, 4294963200 }
  0x59   : > { %159 = sfence }
  0x5a   : > { %v178_v0 = vld [vmem:[%s2307_s29 + $0x10] sm:$0xff]  ;;  %vm220_vm0 = vcmask 261120   ;;  %v176_v10 = vld [vmem:[%s2307_s29] sm:$0xff]  ;;  %v2368_v37 = vld [vmem:[%s2307_s29 + $0x18] sm:$0xff]  ;;  %s2144_s20 = smov 3   ;;  %vm208_vm1 = vcmask 310272  }
  0x5b   : > { %v182_v1 = vld [vmem:[%s2307_s29 + $0x30] sm:$0xff]  ;;  %v251_v4 = vsel %vm220_vm0, %v178_v0, -inf  ;;  %v180_v13 = vld [vmem:[%s2307_s29 + $0x20] sm:$0xff]  ;;  %v221_v20 = vsel %vm220_vm0, %v176_v10, -inf  ;;  %v2352_v29 = vsel %vm220_vm0, %v178_v0, 0.0  ;;  %v2371_v38 = vld [vmem:[%s2307_s29 + $0x38] sm:$0xff] }
  0x5c   : > { %v186_v2 = vld [vmem:[%s2307_s29 + $0x50] sm:$0xff]  ;;  %v252_v5 = vsel %vm220_vm0, %v182_v1, -inf  ;;  %v184_v14 = vld [vmem:[%s2307_s29 + $0x40] sm:$0xff]  ;;  %v222_v26 = vsel %vm220_vm0, %v180_v13, -inf  ;;  %v2355_v30 = vsel %vm220_vm0, %v182_v1, 0.0  ;;  %v2374_v39 = vld [vmem:[%s2307_s29 + $0x58] sm:$0xff] }
  0x5d   : > { %v190_v3 = vld [vmem:[%s2307_s29 + $0x70] sm:$0xff]  ;;  %v254_v6 = vsel %vm220_vm0, %v186_v2, -inf  ;;  %v253_v9 = vmax.f32 %v251_v4, %v252_v5  ;;  %v188_v19 = vld [vmem:[%s2307_s29 + $0x60] sm:$0xff]  ;;  %v224_v27 = vsel %vm220_vm0, %v184_v14, -inf  ;;  %v223_v32 = vmax.f32 %v221_v20, %v222_v26  ;;  %v2384_v48 = vld [vmem:[%s2307_s29 + $0x78] sm:$0xff]  ;;  %s2501_s23 = sld [smem:[#allocation3 + $0x1]] }
  0x5e   : > { %v2321_v7 = vld [vmem:[%s2307_s29 + $0x90] sm:$0xff]  ;;  %v256_v12 = vsel %vm220_vm0, %v190_v3, -inf  ;;  %v192_v23 = vld [vmem:[%s2307_s29 + $0x80] sm:$0xff]  ;;  %v2361_v34 = vsel %vm220_vm0, %v186_v2, 0.0  ;;  %v2364_v35 = vsel %vm220_vm0, %v190_v3, 0.0  ;;  %v226_v36 = vsel %vm220_vm0, %v188_v19, -inf }
  0x5f   : > { %v2324_v8 = vld [vmem:[%s2307_s29 + $0xb0] sm:$0xff]  ;;  %v255_v16 = vmax.f32 %v253_v9, %v254_v6  ;;  %v258_v17 = vsel %vm220_vm0, %v2321_v7, -inf  ;;  %v196_v24 = vld [vmem:[%s2307_s29 + $0xa0] sm:$0xff]  ;;  %v225_v40 = vmax.f32 %v223_v32, %v224_v27  ;;  %v228_v41 = vsel %vm220_vm0, %v192_v23, -inf  ;;  %v177_v53 = vld [vmem:[%s2307_s29 + $0x8] sm:$0xff]  ;;  %s2503_s7 = sld [smem:[#allocation3 + $0x8]] }
  0x60   : > { %v2328_v11 = vld [vmem:[%s2307_s29 + $0xd0] sm:$0xff]  ;;  %v260_v18 = vsel %vm220_vm0, %v2324_v8, -inf  ;;  %v200_v25 = vld [vmem:[%s2307_s29 + $0xc0] sm:$0xff]  ;;  %v230_v42 = vsel %vm220_vm0, %v196_v24, -inf  ;;  %v302_v46 = vsel %vm220_vm0, %v176_v10, 0.0  ;;  %v303_v47 = vsel %vm220_vm0, %v180_v13, 0.0 }
  0x61   : > { %v2334_v15 = vld [vmem:[%s2307_s29 + $0xf0] sm:$0xff]  ;;  %v257_v21 = vmax.f32 %v255_v16, %v256_v12  ;;  %v262_v22 = vsel %vm220_vm0, %v2328_v11, -inf  ;;  %v2358_v31 = vld [vmem:[%s2307_s29 + $0xe0] sm:$0xff]  ;;  %v232_v43 = vsel %vm220_vm0, %v200_v25, -inf  ;;  %v227_v49 = vmax.f32 %v225_v40, %v226_v36  ;;  %v181_v54 = vld [vmem:[%s2307_s29 + $0x28] sm:$0xff]  ;;  %s2505_s16 = sld [smem:[#allocation3 + $0xf]] }
  0x62   : > { %v264_v28 = vsel %vm220_vm0, %v2334_v15, -inf  ;;  %v234_v45 = vsel %vm220_vm0, %v2358_v31, -inf  ;;  %v266_v50 = vsel %vm220_vm0, %v2368_v37, -inf  ;;  %v267_v51 = vsel %vm220_vm0, %v2371_v38, -inf  ;;  %v2399_v58 = vld [vmem:[%s2307_s29 + $0x98] sm:$0xff]  ;;  %v185_v60 = vld [vmem:[%s2307_s29 + $0x48] sm:$0xff] }
  0x63   : > { %v259_v33 = vmax.f32 %v257_v21, %v258_v17  ;;  %v269_v52 = vsel %vm220_vm0, %v2374_v39, -inf  ;;  %v305_v56 = vsel %vm220_vm0, %v184_v14, 0.0  ;;  %v2396_v57 = vsel %vm220_vm0, %v188_v19, 0.0  ;;  %v2409_v0 = vld [vmem:[%s2307_s29 + $0xb8] sm:$0xff]  ;;  %v189_v2 = vld [vmem:[%s2307_s29 + $0x68] sm:$0xff]  ;;  %s2507_s17 = sld [smem:[#allocation3 + $0x16]] }
  0x64   : > { %v268_v59 = vmax.f32 %v266_v50, %v267_v51  ;;  %v229_v61 = vmax.f32 %v227_v49, %v228_v41  ;;  %v2403_v62 = vsel %vm220_vm0, %v192_v23, 0.0  ;;  %v2406_v63 = vsel %vm220_vm0, %v196_v24, 0.0  ;;  %v2415_v4 = vld [vmem:[%s2307_s29 + $0xd8] sm:$0xff]  ;;  %v193_v13 = vld [vmem:[%s2307_s29 + $0x88] sm:$0xff]  ;;  %s2509_s25 = sld [smem:[#allocation3 + $0x2]]  ;;  %s2511_s26 = sld [smem:[#allocation3 + $0x1d]] }
  0x65   : > { %v261_v44 = vmax.f32 %v259_v33, %v260_v18  ;;  %v271_v1 = vsel %vm220_vm0, %v2384_v48, -inf  ;;  %v236_v6 = vsel %vm220_vm0, %v177_v53, -inf  ;;  %v237_v9 = vsel %vm220_vm0, %v181_v54, -inf  ;;  %v2428_v18 = vld [vmem:[%s2307_s29 + $0xf8] sm:$0xff]  ;;  %v197_v24 = vld [vmem:[%s2307_s29 + $0xa8] sm:$0xff]  ;;  %s2513_s27 = sld [smem:[#allocation3 + $0x9]] }
  0x66   : > { %v270_v5 = vmax.f32 %v268_v59, %v269_v52  ;;  %v231_v10 = vmax.f32 %v229_v61, %v230_v42  ;;  %v273_v12 = vsel %vm220_vm0, %v2399_v58, -inf  ;;  %v238_v14 = vmax.f32 %v236_v6, %v237_v9  ;;  %v201_v26 = vld [vmem:[%s2307_s29 + $0xc8] sm:$0xff]  ;;  %s2515_s30 = sld [smem:[#allocation3 + $0x24]]  ;;  %s2517_s28 = sld [smem:[#allocation3 + $0x2b]] }
  0x67   : > { %v263_v55 = vmax.f32 %v261_v44, %v262_v22  ;;  %v239_v16 = vsel %vm220_vm0, %v185_v60, -inf  ;;  %v2425_v17 = vsel %vm220_vm0, %v200_v25, 0.0  ;;  %v275_v20 = vsel %vm220_vm0, %v2409_v0, -inf  ;;  %v205_v52 = vld [vmem:[%s2307_s29 + $0xe8] sm:$0xff]  ;;  %s2519_s3 = sld [smem:[#allocation3 + $0x10]]  ;;  %s2521_s4 = sld [smem:[#allocation3 + $0x17]] }
  0x68   : > { %v272_v19 = vmax.f32 %v270_v5, %v271_v1  ;;  %v241_v21 = vsel %vm220_vm0, %v189_v2, -inf  ;;  %v233_v22 = vmax.f32 %v231_v10, %v232_v43  ;;  %v277_v23 = vsel %vm220_vm0, %v2415_v4, -inf  ;;  %s2523_s5 = sld [smem:[#allocation3 + $0x1e]]  ;;  %s2525_s6 = sld [smem:[#allocation3 + $0x25]] }
  0x69   : > { %v265_v3 = vmax.f32 %v263_v55, %v264_v28  ;;  %v240_v27 = vmax.f32 %v238_v14, %v239_v16  ;;  %v317_v25 = vsel %vm220_vm0, %v177_v53, 0.0  ;;  %v243_v32 = vsel %vm220_vm0, %v193_v13, -inf  ;;  %s2527_s8 = sld [smem:[#allocation3 + $0x32]]  ;;  %s2529_s24 = sld [smem:[#allocation3 + $0x39]] }
  0x6a   : > { %v274_v28 = vmax.f32 %v272_v19, %v273_v12  ;;  %v318_v33 = vsel %vm220_vm0, %v181_v54, 0.0  ;;  %v320_v36 = vsel %vm220_vm0, %v185_v60, 0.0  ;;  %v235_v40 = vmax.f32 %v233_v22, %v234_v45  ;;  %s2533_s19 = sld [smem:[#allocation3 + $0x2c]]  ;;  %s2535_s0 = sld [smem:[#allocation3 + $0x47]] }
  0x6b   : > { %289 = vrot.lane.b32.xlu1 %v265_v3, %s2144_s20  ;;  %v279_v41 = vsel %vm220_vm0, %v2428_v18, -inf  ;;  %v242_v42 = vmax.f32 %v240_v27, %v241_v21  ;;  %v319_v43 = vadd.f32 %v318_v33, %v317_v25  ;;  %v245_v49 = vsel %vm220_vm0, %v197_v24, -inf  ;;  %s2537_s1 = sld [smem:[#allocation3 + $0x4e]]  ;;  %s2539_s18 = sld [smem:[#allocation3 + $0x55]] }
  0x6c   : > { %v276_v44 = vmax.f32 %v274_v28, %v275_v20  ;;  %v247_v50 = vsel %vm220_vm0, %v201_v26, -inf  ;;  %v322_v51 = vsel %vm220_vm0, %v189_v2, 0.0  ;;  %285 = vrot.lane.b32.xlu0 %v235_v40, %s2144_s20  ;;  %v304_v55 = vadd.f32 %v303_v47, %v302_v46  ;;  %s2541_s11 = sld [smem:[#allocation3 + $0x5c]]  ;;  %s2543_s10 = sld [smem:[#allocation3 + $0x33]] }
  0x6d   : > { %v244_v53 = vmax.f32 %v242_v42, %v243_v32  ;;  %v321_v54 = vadd.f32 %v320_v36, %v319_v43  ;;  %v347_v45 = vsel %vm220_vm0, %v2368_v37, 0.0  ;;  %v324_v60 = vsel %vm220_vm0, %v193_v13, 0.0  ;;  %s2545_s15 = sld [smem:[#allocation3 + $0x3a]]  ;;  %s2547_s12 = sld [smem:[#allocation3 + $0x41]] }
  0x6e   : > { %v278_v59 = vmax.f32 %v276_v44, %v277_v23  ;;  %v348_v61 = vsel %vm220_vm0, %v2371_v38, 0.0  ;;  %v350_v1 = vsel %vm220_vm0, %v2374_v39, 0.0  ;;  %v306_v5 = vadd.f32 %v305_v56, %v304_v55  ;;  %s2549_s22 = sld [smem:[#allocation3 + $0x48]]  ;;  %s2551_s9 = sld [smem:[#allocation3 + $0x4f]] }
  0x6f   : > { %v246_v3 = vmax.f32 %v244_v53, %v245_v49  ;;  %v323_v2 = vadd.f32 %v322_v51, %v321_v54  ;;  %v349_v6 = vadd.f32 %v348_v61, %v347_v45  ;;  %v249_v10 = vsel %vm220_vm0, %v205_v52, -inf  ;;  %s2553_s21 = sld [smem:[#allocation3 + $0x56]]  ;;  %s2555_s2 = sld [smem:[#allocation3 + $0x5d]] }
  0x70   : > { %v280_v9 = vmax.f32 %v278_v59, %v279_v41  ;;  %v326_v46 = vsel %vm220_vm0, %v197_v24, 0.0  ;;  %v352_v37 = vsel %vm220_vm0, %v2384_v48, 0.0  ;;  %v308_v13 = vadd.f32 %v2396_v57, %v306_v5  ;;  %s2557_s13 = sld [smem:[#allocation3 + $0x3]]  ;;  %s2559_s14 = sld [smem:[#allocation3 + $0xa]] }
  0x71   : > { %v248_v47 = vmax.f32 %v246_v3, %v247_v50  ;;  %v325_v12 = vadd.f32 %v324_v60, %v323_v2  ;;  %v351_v38 = vadd.f32 %v350_v1, %v349_v6  ;;  %v328_v39 = vsel %vm220_vm0, %v201_v26, 0.0  ;;  %s2561_s29 = sld [smem:[#allocation3 + $0x11]] }
  0x72   : > { %291 = vrot.lane.b32.xlu1 %v280_v9, %s2144_s20  ;;  %v354_v56 = vsel %vm220_vm0, %v2399_v58, 0.0  ;;  %v334_v14 = vadd.f32 %v2355_v30, %v2352_v29  ;;  %v310_v20 = vadd.f32 %v2403_v62, %v308_v13  ;;  %v2145_v21 = vmov 0.0   ;;  %4391 = sst [smem:[#allocation23_spill]] %s2541_s11  ;;  %s2563_s11 = sld [smem:[#allocation3 + $0x18]] }
  0x73   : > { %v250_v16 = vmax.f32 %v248_v47, %v249_v10  ;;  %v327_v19 = vadd.f32 %v326_v46, %v325_v12  ;;  %v353_v48 = vadd.f32 %v352_v37, %v351_v38  ;;  %211 = vst.msk [vmem:[#allocation2 + $0x10] sm:$0xff] %vm208_vm1, %v2145_v21  ;;  %212 = vst.msk [vmem:[#allocation2 + $0x18] sm:$0xff] %vm208_vm1, %v2145_v21  ;;  %v330_v29 = vsel %vm220_vm0, %v205_v52, 0.0  ;;  %4392 = sst [smem:[#allocation24_spill]] %s2543_s10  ;;  %s2565_s10 = sld [smem:[#allocation3 + $0x1f]] }
  0x74   : > { %209 = vst.msk [vmem:[#allocation2] sm:$0xff] %vm208_vm1, %v2145_v21  ;;  %210 = vst.msk [vmem:[#allocation2 + $0x8] sm:$0xff] %vm208_vm1, %v2145_v21  ;;  %v356_v30 = vsel %vm220_vm0, %v2409_v0, 0.0  ;;  %v336_v57 = vadd.f32 %v2361_v34, %v334_v14  ;;  %vm213_vm2 = vcmask 308224   ;;  %v339_v58 = vsel %vm220_vm0, %v2321_v7, 0.0  ;;  %4393 = sst [smem:[#allocation25_spill]] %s2545_s15 }
  0x75   : > { %215 = vst.msk [vmem:[#allocation2 + $0x28] sm:$0xff] %vm208_vm1, %v2145_v21  ;;  %216 = vst.msk [vmem:[#allocation2 + $0x30] sm:$0xff] %vm208_vm1, %v2145_v21  ;;  %287 = vrot.lane.b32.xlu0 %v250_v16, %s2144_s20  ;;  %v329_v62 = vadd.f32 %v328_v39, %v327_v19  ;;  %v312_v22 = vadd.f32 %v2406_v63, %v310_v20  ;;  %v355_v23 = vadd.f32 %v354_v56, %v353_v48  ;;  %4394 = sst [smem:[#allocation26_spill]] %s2547_s12  ;;  %s2569_s12 = sld [smem:[#allocation3 + $0x2d]]  ;;  %vm297_vm3 = vcmask 285720  }
  0x76   : > { %217 = vst.msk [vmem:[#allocation2 + $0x38] sm:$0xff] %vm208_vm1, %v2145_v21  ;;  %218 = vst.msk [vmem:[#allocation2 + $0x40] sm:$0xff] %vm208_vm1, %v2145_v21  ;;  %v315_v24 = vsel %vm220_vm0, %v2358_v31, 0.0  ;;  %v358_v0 = vsel %vm220_vm0, %v2415_v4, 0.0  ;;  %v338_v34 = vadd.f32 %v2364_v35, %v336_v57  ;;  %v341_v26 = vsel %vm220_vm0, %v2324_v8, 0.0  ;;  %4395 = sst [smem:[#allocation27_spill]] %s2551_s9 }
  0x77   : > { %214 = vst.msk [vmem:[#allocation2 + $0x20] sm:$0x3f] %vm213_vm2, %v2145_v21  ;;  %219 = vst.msk [vmem:[#allocation2 + $0x48] sm:$0x3f] %vm213_vm2, %v2145_v21  ;;  %v331_v7 = vadd.f32 %v330_v29, %v329_v62  ;;  %v314_v27 = vadd.f32 %v2425_v17, %v312_v22  ;;  %v357_v25 = vadd.f32 %v356_v30, %v355_v23  ;;  %v360_v63 = vsel %vm220_vm0, %v2428_v18, 0.0  ;;  %4396 = sst [smem:[#allocation28_spill]] %s2553_s21 }
  0x78   : > { %v340_v28 = vadd.f32 %v339_v58, %v338_v34  ;;  %v343_v32 = vsel %vm220_vm0, %v2328_v11, 0.0  ;;  %v345_v35 = vsel %vm220_vm0, %v2334_v15, 0.0  ;;  %4397 = sst [smem:[#allocation29_spill]] %s2555_s2  ;;  %s2567_s15 = sld [smem:[#allocation3 + $0x26]]  ;;  %v2600_v11 = vstv %s2501_s23 }
  0x79   : > { %v364_v31 = vmul.f32 0.125, %v331_v7  ;;  %v316_v33 = vadd.f32 %v315_v24, %v314_v27  ;;  %v359_v36 = vadd.f32 %v358_v0, %v357_v25  ;;  %4398 = sst [smem:[#allocation30_spill]] %s2557_s13  ;;  %s2571_s9 = sld [smem:[#allocation3 + $0x34]]  ;;  %v2607_v15 = vstv %s2503_s7 }
  0x7a   : > { %v342_v4 = vadd.f32 %v341_v26, %v340_v28  ;;  %4399 = sst [smem:[#allocation31_spill]] %s2561_s29  ;;  %s2575_s2 = sld [smem:[#allocation3 + $0x42]]  ;;  %v2610_v43 = vstv %s2505_s16  ;;  %v2613_v44 = vstv %s2507_s17  ;;  %v2616_v49 = vstv %s2511_s26 }
  0x7b   : > { %373 = vrot.lane.b32.xlu1 %v364_v31, %s2144_s20  ;;  %v363_v8 = vmul.f32 0.125, %v316_v33  ;;  %v361_v40 = vadd.f32 %v360_v63, %v359_v36  ;;  %4400 = sst [smem:[#allocation32_spill]] %s2563_s11  ;;  %s2573_s21 = sld [smem:[#allocation3 + $0x3b]]  ;;  %v2623_v50 = vstv %s2515_s30  ;;  %v2626_v51 = vstv %s2517_s28 }
  0x7c   : > { %v344_v17 = vadd.f32 %v343_v32, %v342_v4  ;;  %4401 = sst [smem:[#allocation33_spill]] %s2565_s10  ;;  %s2577_s13 = sld [smem:[#allocation3 + $0x49]]  ;;  %v2629_v52 = vstv %s2509_s25  ;;  %v2632_v53 = vstv %s2513_s27  ;;  %v2639_v55 = vstv %s2527_s8 }
  0x7d   : > { %371 = vrot.lane.b32.xlu0 %v363_v8, %s2144_s20  ;;  %v366_v41 = vmul.f32 0.125, %v361_v40  ;;  %4403 = sst [smem:[#allocation35_spill]] %s2569_s12  ;;  %s2579_s29 = sld [smem:[#allocation3 + $0x50]]  ;;  %v2642_v45 = vstv %s2519_s3  ;;  %v2645_v59 = vstv %s2521_s4  ;;  %v2648_v60 = vstv %s2523_s5 }
  0x7e   : > { %v346_v18 = vadd.f32 %v345_v35, %v344_v17  ;;  %4402 = sst [smem:[#allocation34_spill]] %s2567_s15  ;;  %s2581_s11 = sld [smem:[#allocation3 + $0x57]]  ;;  %v2656_v61 = vstv %s2529_s24  ;;  %v2662_v3 = vstv %s2525_s6  ;;  %v2665_v2 = vstv %s2533_s19 }
  0x7f   : > { %377 = vrot.lane.b32.xlu1 %v366_v41, %s2144_s20  ;;  %s2583_s15 = sld [smem:[#allocation3 + $0x5e]]  ;;  %s2585_s12 = sld [smem:[#allocation3 + $0x4]]  ;;  %4418 = vst [vmem:[#allocation44_spill] sm:$0xff] %v2662_v3  ;;  %4420 = vst [vmem:[#allocation45_spill] sm:$0xff] %v2665_v2  ;;  %v2672_v5 = vstv %s2535_s0  ;;  %v2675_v6 = vstv %s2537_s1  ;;  %v2678_v9 = vstv %s2539_s18 }
  0x80   : > { %v365_v42 = vmul.f32 0.125, %v346_v18  ;;  %4405 = sst [smem:[#allocation37_spill]] %s2575_s2  ;;  %s2587_s10 = sld [smem:[#allocation3 + $0xb]]  ;;  %v2697_v12 = vstv %s2549_s22  ;;  %v2720_v16 = vstv %s2559_s14  ;;  %v2743_v30 = vstv %s2571_s9 }
  0x81   : > { %4404 = sst [smem:[#allocation36_spill]] %s2573_s21  ;;  %s2589_s21 = sld [smem:[#allocation3 + $0x12]]  ;;  %4439 = vst [vmem:[#allocation48_spill] sm:$0xff] %v2720_v16  ;;  %4448 = vst [vmem:[#allocation54_spill] sm:$0xff] %v2743_v30 }
  0x82   : > { %375 = vrot.lane.b32.xlu0 %v365_v42, %s2144_s20  ;;  %s2531_s20 = sld [smem:[#allocation3 + $0x40]]  ;;  %4406 = sst [smem:[#allocation38_spill]] %s2577_s13 }
  0x83   : > { %4407 = sst [smem:[#allocation39_spill]] %s2579_s29  ;;  %s2591_s2 = sld [smem:[#allocation3 + $0x19]] }
  0x84   : > { %4408 = sst [smem:[#allocation40_spill]] %s2581_s11  ;;  %s2593_s13 = sld [smem:[#allocation3 + $0x20]] }
  0x85   : > { %4409 = sst [smem:[#allocation41_spill]] %s2585_s12  ;;  %s2595_s29 = sld [smem:[#allocation3 + $0x27]]  ;;  %v2769_v24 = vstv %s2583_s15 }
  0x86   : > { %4410 = sst [smem:[#allocation42_spill]] %s2587_s10  ;;  %s2602_s12 = sld [smem:[#allocation3 + $0x35]]  ;;  %4455 = vst [vmem:[#allocation60_spill] sm:$0xff] %v2769_v24 }
  0x87   : > { %s2597_s11 = sld [smem:[#allocation3 + $0x2e]]  ;;  %s2604_s10 = sld [smem:[#allocation3 + $0x3c]]  ;;  %v2778_v26 = vstv %s2589_s21 }
  0x88   : > { %s2620_s23 = sld [smem:[#allocation3 + $0x4a]]  ;;  %s2634_s7 = sld [smem:[#allocation3 + $0x51]]  ;;  %v2659_v1 = vstv %s2531_s20  ;;  %4459 = vst [vmem:[#allocation63_spill] sm:$0xff] %v2778_v26 }
  0x89   : > { %s2636_s16 = sld [smem:[#allocation3 + $0x58]]  ;;  %s4412_s17 = sld [smem:[#allocation23_spill]]  ;;  %v2781_v7 = vstv %s2591_s2 }
  0x8a   : > { %s4413_s25 = sld [smem:[#allocation24_spill]]  ;;  %s2650_s26 = sld [smem:[#allocation3 + $0x5f]]  ;;  %4461 = vst [vmem:[#allocation64_spill] sm:$0xff] %v2781_v7  ;;  %v2784_v27 = vstv %s2593_s13 }
  0x8b   : > { %s4415_s27 = sld [smem:[#allocation25_spill]]  ;;  %s4417_s28 = sld [smem:[#allocation26_spill]]  ;;  %4462 = vst [vmem:[#allocation65_spill] sm:$0xff] %v2784_v27  ;;  %v2787_v25 = vstv %s2595_s29 }
  0x8c   : > { %s2652_s30 = sld [smem:[#allocation3 + $0x5]]  ;;  %s4419_s3 = sld [smem:[#allocation27_spill]]  ;;  %4464 = vst [vmem:[#allocation66_spill] sm:$0xff] %v2787_v25  ;;  %v2793_v32 = vstv %s2602_s12 }
  0x8d   : > { %4411 = sst [smem:[#allocation43_spill]] %s2597_s11  ;;  %s2618_s11 = sld [smem:[#allocation3 + $0x43]]  ;;  %4467 = vst [vmem:[#allocation68_spill] sm:$0xff] %v2793_v32  ;;  %v2796_v31 = vstv %s2604_s10 }
  0x8e   : > { %s4421_s4 = sld [smem:[#allocation28_spill]]  ;;  %s2667_s5 = sld [smem:[#allocation3 + $0xc]]  ;;  %4468 = vst [vmem:[#allocation69_spill] sm:$0xff] %v2796_v31  ;;  %v2802_v36 = vstv %s2620_s23  ;;  %v2810_v4 = vstv %s2634_s7 }
  0x8f   : > { %s4423_s8 = sld [smem:[#allocation29_spill]]  ;;  %v2681_v10 = vstv %s4412_s17  ;;  %s2683_s6 = sld [smem:[#allocation3 + $0x1a]]  ;;  %4470 = vst [vmem:[#allocation71_spill] sm:$0xff] %v2802_v36  ;;  %4472 = vst [vmem:[#allocation72_spill] sm:$0xff] %v2810_v4  ;;  %v2813_v35 = vstv %s2636_s16 }
  0x90   : > { %4414 = sst [smem:[#allocation23_spill]] %s2650_s26  ;;  %s2685_s24 = sld [smem:[#allocation3 + $0x21]]  ;;  %v2688_v46 = vstv %s4413_s25  ;;  %4474 = vst [vmem:[#allocation73_spill] sm:$0xff] %v2813_v35 }
  0x91   : > { %s2669_s26 = sld [smem:[#allocation3 + $0x13]]  ;;  %s4427_s20 = sld [smem:[#allocation32_spill]]  ;;  %v2691_v37 = vstv %s4415_s27  ;;  %v2694_v47 = vstv %s4417_s28 }
  0x92   : > { %4416 = sst [smem:[#allocation24_spill]] %s2652_s30  ;;  %s4424_s30 = sld [smem:[#allocation30_spill]]  ;;  %v2704_v13 = vstv %s4419_s3 }
  0x93   : > { %s4425_s19 = sld [smem:[#allocation31_spill]]  ;;  %s2699_s0 = sld [smem:[#allocation3 + $0x28]]  ;;  %v2799_v33 = vstv %s2618_s11 }
  0x94   : > { %4422 = sst [smem:[#allocation25_spill]] %s2667_s5  ;;  %s4430_s1 = sld [smem:[#allocation34_spill]]  ;;  %v2707_v38 = vstv %s4421_s4  ;;  %4469 = vst [vmem:[#allocation70_spill] sm:$0xff] %v2799_v33 }
  0x95   : > { %s4428_s5 = sld [smem:[#allocation33_spill]]  ;;  %s2701_s18 = sld [smem:[#allocation3 + $0x2f]]  ;;  %v2710_v39 = vstv %s4423_s8  ;;  %v2828_v42 = vstv %s2683_s6 }
  0x96   : > { %4426 = sst [smem:[#allocation26_spill]] %s2685_s24  ;;  %s4431_s17 = sld [smem:[#allocation35_spill]]  ;;  %4433 = vst [vmem:[#allocation46_spill] sm:$0xff] %v2710_v39  ;;  %4479 = vst [vmem:[#allocation78_spill] sm:$0xff] %v2828_v42 }
  0x97   : > { %s4432_s25 = sld [smem:[#allocation36_spill]]  ;;  %s2715_s27 = sld [smem:[#allocation3 + $0x36]]  ;;  %v2726_v20 = vstv %s4427_s20  ;;  %v2825_v18 = vstv %s2669_s26 }
  0x98   : > { %v2713_v56 = vstv %s4424_s30  ;;  %s4435_s22 = sld [smem:[#allocation37_spill]]  ;;  %s2717_s28 = sld [smem:[#allocation3 + $0x3d]]  ;;  %4442 = vst [vmem:[#allocation50_spill] sm:$0xff] %v2726_v20  ;;  %4478 = vst [vmem:[#allocation77_spill] sm:$0xff] %v2825_v18 }
  0x99   : > { %4429 = sst [smem:[#allocation27_spill]] %s2699_s0  ;;  %4434 = vst [vmem:[#allocation47_spill] sm:$0xff] %v2713_v56  ;;  %s4437_s0 = sld [smem:[#allocation38_spill]]  ;;  %v2723_v19 = vstv %s4425_s19 }
  0x9a   : > { %s4438_s24 = sld [smem:[#allocation39_spill]]  ;;  %s4440_s3 = sld [smem:[#allocation40_spill]]  ;;  %4441 = vst [vmem:[#allocation49_spill] sm:$0xff] %v2723_v19  ;;  %v2737_v21 = vstv %s4430_s1 }
  0x9b   : > { %v2729_v48 = vstv %s4428_s5  ;;  %s2731_s30 = sld [smem:[#allocation3 + $0x44]]  ;;  %s4444_s4 = sld [smem:[#allocation41_spill]]  ;;  %4446 = vst [vmem:[#allocation52_spill] sm:$0xff] %v2737_v21 }
  0x9c   : > { %4443 = vst [vmem:[#allocation51_spill] sm:$0xff] %v2729_v48  ;;  %s2733_s8 = sld [smem:[#allocation3 + $0x6]]  ;;  %v2740_v29 = vstv %s4431_s17  ;;  %s4450_s14 = sld [smem:[#allocation43_spill]] }
  0x9d   : > { %4447 = vst [vmem:[#allocation53_spill] sm:$0xff] %v2740_v29  ;;  %v2746_v57 = vstv %s4432_s25  ;;  %s2748_s5 = sld [smem:[#allocation3 + $0x4b]]  ;;  %s2750_s19 = sld [smem:[#allocation3 + $0x52]]  ;;  %v2846_v18 = vstv %s2715_s27 }
  0x9e   : > { %4436 = sst [smem:[#allocation28_spill]] %s2717_s28  ;;  %s4445_s28 = sld [smem:[#allocation42_spill]]  ;;  %4449 = vst [vmem:[#allocation55_spill] sm:$0xff] %v2746_v57  ;;  %v2753_v58 = vstv %s4435_s22  ;;  %4486 = vst [vmem:[#allocation85_spill] sm:$0xff] %v2846_v18 }
  0x9f   : > { %4451 = vst [vmem:[#allocation56_spill] sm:$0xff] %v2753_v58  ;;  %v2756_v62 = vstv %s4437_s0  ;;  %s2764_s9 = sld [smem:[#allocation3 + $0x59]]  ;;  %s2766_s20 = sld [smem:[#allocation3 + $0x60]] }
  0xa0   : > { %4452 = vst [vmem:[#allocation57_spill] sm:$0xff] %v2756_v62  ;;  %v2759_v22 = vstv %s4438_s24  ;;  %v2762_v23 = vstv %s4440_s3  ;;  %s4458_s0 = sld [smem:[#allocation23_spill]]  ;;  %s4460_s24 = sld [smem:[#allocation24_spill]] }
  0xa1   : > { %4453 = vst [vmem:[#allocation58_spill] sm:$0xff] %v2759_v22  ;;  %4454 = vst [vmem:[#allocation59_spill] sm:$0xff] %v2762_v23  ;;  %v2772_v0 = vstv %s4444_s4  ;;  %s4463_s1 = sld [smem:[#allocation25_spill]]  ;;  %s4466_s15 = sld [smem:[#allocation26_spill]]  ;;  %v2857_v33 = vstv %s2731_s30 }
  0xa2   : > { %4456 = vst [vmem:[#allocation61_spill] sm:$0xff] %v2772_v0  ;;  %v2790_v63 = vstv %s4450_s14  ;;  %s2804_s2 = sld [smem:[#allocation3 + $0xd]]  ;;  %s4471_s13 = sld [smem:[#allocation27_spill]]  ;;  %4488 = vst [vmem:[#allocation87_spill] sm:$0xff] %v2857_v33  ;;  %v2860_v31 = vstv %s2733_s8 }
  0xa3   : > { %4465 = vst [vmem:[#allocation67_spill] sm:$0xff] %v2790_v63  ;;  %s2806_s21 = sld [smem:[#allocation3 + $0x14]]  ;;  %s4473_s29 = sld [smem:[#allocation28_spill]]  ;;  %4489 = vst [vmem:[#allocation88_spill] sm:$0xff] %v2860_v31  ;;  %v2863_v32 = vstv %s2748_s5 }
  0xa4   : > { %v2775_v34 = vstv %s4445_s28  ;;  %4490 = vst [vmem:[#allocation89_spill] sm:$0xff] %v2863_v32  ;;  %s2146_s10 = smov 127   ;;  %s2147_s11 = smov 126  }
  0xa5   : > { %4457 = vst [vmem:[#allocation62_spill] sm:$0xff] %v2775_v34  ;;  %s2148_s12 = smov 125   ;;  %s2149_s23 = smov 124  }
  0xa6   : > { %v2816_v8 = vstv %s4458_s0  ;;  %v2819_v40 = vstv %s4460_s24  ;;  %s3548_s7 = sld [smem:[#allocation3 + $0x1b]]  ;;  %s3563_s16 = sld [smem:[#allocation3 + $0x22]] }
  0xa7   : > { %4475 = vst [vmem:[#allocation74_spill] sm:$0xff] %v2816_v8  ;;  %4476 = vst [vmem:[#allocation75_spill] sm:$0xff] %v2819_v40  ;;  %v2822_v41 = vstv %s4463_s1  ;;  %s3579_s26 = sld [smem:[#allocation3 + $0x29]]  ;;  %s3591_s6 = sld [smem:[#allocation3 + $0x30]] }
  0xa8   : > { %4477 = vst [vmem:[#allocation76_spill] sm:$0xff] %v2822_v41  ;;  %v2840_v35 = vstv %s4471_s13  ;;  %v2843_v41 = vstv %s2701_s18  ;;  %v2904_v23 = vstv %s2804_s2  ;;  %s3593_s18 = sld [smem:[#allocation3 + $0x37]]  ;;  %s3608_s17 = sld [smem:[#allocation3 + $0x3e]] }
  0xa9   : > { %4484 = vst [vmem:[#allocation83_spill] sm:$0xff] %v2840_v35  ;;  %4485 = vst [vmem:[#allocation84_spill] sm:$0xff] %v2843_v41  ;;  %v2849_v4 = vstv %s4473_s29  ;;  %v2866_v35 = vstv %s2750_s19  ;;  %v2869_v41 = vstv %s2764_s9  ;;  %v2907_v22 = vstv %s2806_s21  ;;  %s2150_s25 = smov 123   ;;  %s3626_s27 = sld [smem:[#allocation3 + $0x45]] }
  0xaa   : > { %4487 = vst [vmem:[#allocation86_spill] sm:$0xff] %v2849_v4  ;;  %4491 = vst [vmem:[#allocation90_spill] sm:$0xff] %v2866_v35  ;;  %v2872_v4 = vstv %s2766_s20  ;;  %s3645_s22 = sld [smem:[#allocation3 + $0x4c]]  ;;  %s3659_s28 = sld [smem:[#allocation3 + $0x53]] }
  0xab   : > { %4492 = vst [vmem:[#allocation91_spill] sm:$0xff] %v2869_v41  ;;  %4493 = vst [vmem:[#allocation92_spill] sm:$0xff] %v2872_v4  ;;  %s3677_s3 = sld [smem:[#allocation3 + $0x5a]]  ;;  %s3682_s30 = sld [smem:[#allocation3 + $0x61]] }
  0xac   : > { %4502 = vst [vmem:[#allocation101_spill] sm:$0xff] %v2904_v23  ;;  %4503 = vst [vmem:[#allocation102_spill] sm:$0xff] %v2907_v22  ;;  %s2151_s4 = smov 122   ;;  %s392_s8 = sld [smem:[#allocation3]] }
  0xad   : > { %s1780_s14 = sld [smem:[#allocation3 + $0x7]]  ;;  %s1787_s5 = sld [smem:[#allocation3 + $0xe]] }
  0xae   : > { %s1794_s19 = sld [smem:[#allocation3 + $0x15]]  ;;  %s1801_s9 = sld [smem:[#allocation3 + $0x1c]] }
  0xaf   : > { %s1808_s20 = sld [smem:[#allocation3 + $0x23]]  ;;  %s1815_s0 = sld [smem:[#allocation3 + $0x2a]] }
  0xb0   : > { %s1822_s24 = sld [smem:[#allocation3 + $0x31]]  ;;  %s1829_s1 = sld [smem:[#allocation3 + $0x38]] }
  0xb1   : > { %s1843_s2 = sld [smem:[#allocation3 + $0x46]]  ;;  %s1850_s13 = sld [smem:[#allocation3 + $0x4d]] }
  0xb2   : > { %s1857_s21 = sld [smem:[#allocation3 + $0x54]]  ;;  %s1864_s29 = sld [smem:[#allocation3 + $0x5b]] }
  0xdd   : > { %v290_v54 = vpop.permute.xlu1 %289 }
  0xde   : > { %300 = vst.msk [vmem:[#allocation2 + $0x13] sm:$0xff] %vm297_vm3, %v290_v54  ;;  %v286_v14 = vpop.permute.xlu0 %285  ;;  %v2831_v54 = vstv %s4466_s15  ;;  %s1836_s15 = sld [smem:[#allocation3 + $0x3f]] }
  0xdf   : > { %298 = vst.msk [vmem:[#allocation2 + $0x3] sm:$0xff] %vm297_vm3, %v286_v14  ;;  %4480 = vst [vmem:[#allocation79_spill] sm:$0xff] %v2831_v54 }
  0xe4   : > { %v292_v28 = vpop.permute.xlu1 %291 }
  0xe5   : > { %301 = vst.msk [vmem:[#allocation2 + $0x1b] sm:$0xff] %vm297_vm3, %v292_v28  ;;  %v612_v17 = vld [vmem:[#allocation2 + $0x13] sm:$0xff] }
  0xe6   : > { %v2833_v14 = vld [vmem:[#allocation2] sm:$0xff]  ;;  %v2879_v33 = vmul.f32 %v2613_v44, %v612_v17  ;;  %v2882_v31 = vmul.f32 %v2645_v59, %v612_v17  ;;  %v2889_v4 = vmul.f32 %v2726_v20, %v612_v17  ;;  %v2901_v24 = vmul.f32 %v2828_v42, %v612_v17 }
  0xe7   : > { %4481 = vst [vmem:[#allocation80_spill] sm:$0xff] %v2833_v14  ;;  %v2835_v28 = vld [vmem:[#allocation2 + $0x1] sm:$0xff]  ;;  %v288_v8 = vpop.permute.xlu0 %287  ;;  %v404_v54 = vmul.f32 %v2600_v11, %v2833_v14  ;;  %v414_v35 = vmul.f32 %v2629_v52, %v2833_v14  ;;  %v2928_v23 = vmul.f32 %v2713_v56, %v2833_v14 }
  0xe8   : > { %4482 = vst [vmem:[#allocation81_spill] sm:$0xff] %v2835_v28  ;;  %v2837_v40 = vld [vmem:[#allocation2 + $0x2] sm:$0xff]  ;;  %299 = vst.msk [vmem:[#allocation2 + $0xb] sm:$0xff] %vm297_vm3, %v288_v8  ;;  %v478_v36 = vmul.f32 %v2607_v15, %v2835_v28  ;;  %v488_v41 = vmul.f32 %v2632_v53, %v2835_v28 }
  0xe9   : > { %4483 = vst [vmem:[#allocation82_spill] sm:$0xff] %v2837_v40  ;;  %v2874_v8 = vld [vmem:[#allocation2 + $0x3] sm:$0xff]  ;;  %v552_v63 = vmul.f32 %v2610_v43, %v2837_v40  ;;  %4495 = vst [vmem:[#allocation94_spill] sm:$0xff] %v2882_v31  ;;  %v2936_v42 = vmul.f32 %v2723_v19, %v2837_v40 }
  0xea   : > { %4494 = vst [vmem:[#allocation93_spill] sm:$0xff] %v2874_v8  ;;  %v482_v18 = vadd.f32 %v478_v36, %v404_v54  ;;  %4496 = vst [vmem:[#allocation95_spill] sm:$0xff] %v2889_v4  ;;  %v2892_v36 = vmul.f32 %v2781_v7, %v612_v17  ;;  %v626_v4 = vmul.f32 %v2613_v44, %v2874_v8 }
  0xeb   : > { %4501 = vst [vmem:[#allocation100_spill] sm:$0xff] %v2901_v24  ;;  %v2924_v22 = vmul.f32 %v2645_v59, %v2874_v8  ;;  %4506 = vst [vmem:[#allocation105_spill] sm:$0xff] %v2928_v23  ;;  %v2932_v24 = vmul.f32 %v2720_v16, %v2835_v28  ;;  %v492_v21 = vadd.f32 %v488_v41, %v414_v35 }
  0xec   : > { %4497 = vst [vmem:[#allocation96_spill] sm:$0xff] %v2892_v36  ;;  %v2894_v54 = vld [vmem:[#allocation2 + $0x18] sm:$0xff]  ;;  %v556_v27 = vadd.f32 %v552_v63, %v482_v18  ;;  %v562_v63 = vmul.f32 %v2642_v45, %v2837_v40  ;;  %4508 = vst [vmem:[#allocation107_spill] sm:$0xff] %v2936_v42  ;;  %v2948_v16 = vmul.f32 %v2726_v20, %v2874_v8 }
  0xed   : > { %4498 = vst [vmem:[#allocation97_spill] sm:$0xff] %v2894_v54  ;;  %v2896_v32 = vld [vmem:[#allocation2 + $0x19] sm:$0xff]  ;;  %v374_v62 = vpop.permute.xlu1 %373  ;;  %v407_v36 = vmul.f32 %v2600_v11, %v2894_v54  ;;  %4507 = vst [vmem:[#allocation106_spill] sm:$0xff] %v2932_v24 }
  0xee   : > { %4499 = vst [vmem:[#allocation98_spill] sm:$0xff] %v2896_v32  ;;  %v2898_v25 = vld [vmem:[#allocation2 + $0x1a] sm:$0xff]  ;;  %v481_v7 = vmul.f32 %v2607_v15, %v2896_v32  ;;  %385 = vst.msk [vmem:[#allocation2 + $0x33] sm:$0xff] %vm297_vm3, %v374_v62  ;;  %v630_v31 = vadd.f32 %v626_v4, %v556_v27  ;;  %v2973_v27 = vmul.f32 %v2772_v0, %v2833_v14 }
  0xef   : > { %4500 = vst [vmem:[#allocation99_spill] sm:$0xff] %v2898_v25  ;;  %v2917_v18 = vld [vmem:[#allocation2 + $0x1b] sm:$0xff]  ;;  %v2938_v58 = vld [vmem:[#allocation2 + $0x8] sm:$0xff]  ;;  %v2940_v57 = vld [vmem:[#allocation2 + $0x10] sm:$0xff]  ;;  %v372_v30 = vpop.permute.xlu0 %371  ;;  %v555_v56 = vmul.f32 %v2610_v43, %v2898_v25 }
  0xf0   : > { %4504 = vst [vmem:[#allocation103_spill] sm:$0xff] %v2917_v18  ;;  %v2919_v17 = vld [vmem:[#allocation2 + $0x14] sm:$0xff]  ;;  %4509 = vst [vmem:[#allocation108_spill] sm:$0xff] %v2938_v58  ;;  %v2942_v62 = vld [vmem:[#allocation2 + $0x9] sm:$0xff]  ;;  %v485_v29 = vadd.f32 %v481_v7, %v407_v36  ;;  %v405_v7 = vmul.f32 %v2600_v11, %v2938_v58  ;;  %v406_v35 = vmul.f32 %v2600_v11, %v2940_v57 }
  0xf1   : > { %4505 = vst [vmem:[#allocation104_spill] sm:$0xff] %v2919_v17  ;;  %4510 = vst [vmem:[#allocation109_spill] sm:$0xff] %v2942_v62  ;;  %v2950_v48 = vld [vmem:[#allocation2 + $0x11] sm:$0xff]  ;;  %v479_v36 = vmul.f32 %v2607_v15, %v2942_v62  ;;  %v2965_v8 = vld [vmem:[#allocation2 + $0x4] sm:$0xff]  ;;  %v378_v20 = vpop.permute.xlu1 %377 }
  0xf2   : > { %4511 = vst [vmem:[#allocation110_spill] sm:$0xff] %v2948_v16  ;;  %v2952_v19 = vld [vmem:[#allocation2 + $0xa] sm:$0xff]  ;;  %v2954_v42 = vld [vmem:[#allocation2 + $0x12] sm:$0xff]  ;;  %384 = vst.msk [vmem:[#allocation2 + $0x2b] sm:$0xff] %vm297_vm3, %v372_v30  ;;  %v480_v16 = vmul.f32 %v2607_v15, %v2950_v48  ;;  %v559_v25 = vadd.f32 %v555_v56, %v485_v29  ;;  %v629_v30 = vmul.f32 %v2613_v44, %v2917_v18 }
  0xf3   : > { %4512 = vst [vmem:[#allocation111_spill] sm:$0xff] %v2954_v42  ;;  %v2963_v41 = vld [vmem:[#allocation2 + $0xb] sm:$0xff]  ;;  %4513 = vst [vmem:[#allocation112_spill] sm:$0xff] %v2965_v8  ;;  %v2975_v4 = vld [vmem:[#allocation2 + $0x1c] sm:$0xff]  ;;  %v700_v11 = vmul.f32 %v2616_v49, %v2965_v8  ;;  %v483_v54 = vadd.f32 %v479_v36, %v405_v7  ;;  %v553_v15 = vmul.f32 %v2610_v43, %v2952_v19 }
  0xf4   : > { %4514 = vst [vmem:[#allocation113_spill] sm:$0xff] %v2973_v27  ;;  %4515 = vst [vmem:[#allocation114_spill] sm:$0xff] %v2975_v4  ;;  %v2980_v32 = vld [vmem:[#allocation2 + $0x5] sm:$0xff]  ;;  %v2984_v56 = vld [vmem:[#allocation2 + $0x15] sm:$0xff]  ;;  %v2988_v29 = vmul.f32 %v2775_v34, %v2835_v28  ;;  %v484_v0 = vadd.f32 %v480_v16, %v406_v35  ;;  %v702_v27 = vmul.f32 %v2616_v49, %v2919_v17  ;;  %v376_v39 = vpop.permute.xlu0 %375 }
  0xf5   : > { %387 = vst.msk [vmem:[#allocation2 + $0x43] sm:$0xff] %vm297_vm3, %v378_v20  ;;  %4516 = vst [vmem:[#allocation115_spill] sm:$0xff] %v2980_v32  ;;  %v2990_v14 = vld [vmem:[#allocation2 + $0x6] sm:$0xff]  ;;  %v554_v20 = vmul.f32 %v2610_v43, %v2954_v42  ;;  %v2996_v18 = vld [vmem:[#allocation2 + $0x16] sm:$0xff]  ;;  %v566_v7 = vadd.f32 %v562_v63, %v492_v21  ;;  %v704_v26 = vadd.f32 %v700_v11, %v630_v31 }
  0xf6   : > { %4517 = vst [vmem:[#allocation116_spill] sm:$0xff] %v2984_v56  ;;  %4518 = vst [vmem:[#allocation117_spill] sm:$0xff] %v2988_v29  ;;  %v2998_v36 = vld [vmem:[#allocation2 + $0xc] sm:$0xff]  ;;  %v774_v28 = vmul.f32 %v2623_v50, %v2980_v32  ;;  %v557_v34 = vadd.f32 %v553_v15, %v483_v54  ;;  %v627_v16 = vmul.f32 %v2613_v44, %v2963_v41  ;;  %v3004_v35 = vld [vmem:[#allocation2 + $0x1d] sm:$0xff] }
  0xf7   : > { %4519 = vst [vmem:[#allocation118_spill] sm:$0xff] %v2990_v14  ;;  %4520 = vst [vmem:[#allocation119_spill] sm:$0xff] %v2996_v18  ;;  %v3007_v43 = vld [vmem:[#allocation2 + $0xd] sm:$0xff]  ;;  %v558_v29 = vadd.f32 %v554_v20, %v484_v0  ;;  %v776_v21 = vmul.f32 %v2623_v50, %v2984_v56  ;;  %v633_v63 = vadd.f32 %v629_v30, %v559_v25  ;;  %v3019_v17 = vld [vmem:[#allocation2 + $0x1e] sm:$0xff] }
  0xf8   : > { %4521 = vst [vmem:[#allocation120_spill] sm:$0xff] %v3004_v35  ;;  %386 = vst.msk [vmem:[#allocation2 + $0x3b] sm:$0xff] %vm297_vm3, %v376_v39  ;;  %v703_v31 = vmul.f32 %v2616_v49, %v2975_v4  ;;  %v778_v11 = vadd.f32 %v774_v28, %v704_v26  ;;  %v848_v54 = vmul.f32 %v2626_v51, %v2990_v14  ;;  %v3015_v44 = vld [vmem:[#allocation2 + $0xe] sm:$0xff] }
  0xf9   : > { %4522 = vst [vmem:[#allocation121_spill] sm:$0xff] %v3007_v43  ;;  %v631_v15 = vadd.f32 %v627_v16, %v557_v34  ;;  %4523 = vst [vmem:[#allocation122_spill] sm:$0xff] %v3015_v44  ;;  %v850_v39 = vmul.f32 %v2626_v51, %v2996_v18  ;;  %v3021_v0 = vld [vmem:[#allocation2 + $0x28] sm:$0xff]  ;;  %v701_v26 = vmul.f32 %v2616_v49, %v2998_v36  ;;  %v3039_v42 = vld [vmem:[#allocation2 + $0x33] sm:$0xff] }
  0xfa   : > { %4524 = vst [vmem:[#allocation123_spill] sm:$0xff] %v3019_v17  ;;  %4525 = vst [vmem:[#allocation124_spill] sm:$0xff] %v3021_v0  ;;  %v3023_v20 = vld [vmem:[#allocation2 + $0x29] sm:$0xff]  ;;  %v632_v28 = vadd.f32 %v2879_v33, %v558_v29  ;;  %v777_v34 = vmul.f32 %v2623_v50, %v3004_v35  ;;  %v640_v30 = vadd.f32 %v2924_v22, %v566_v7  ;;  %v3067_v24 = vld [vmem:[#allocation2 + $0x32] sm:$0xff] }
  0xfb   : > { %4526 = vst [vmem:[#allocation125_spill] sm:$0xff] %v3023_v20  ;;  %v3025_v25 = vld [vmem:[#allocation2 + $0x2a] sm:$0xff]  ;;  %v852_v16 = vadd.f32 %v848_v54, %v778_v11  ;;  %v922_v4 = vmul.f32 %v2639_v55, %v3021_v0  ;;  %v996_v18 = vmul.f32 %v2656_v61, %v3023_v20  ;;  %v775_v56 = vmul.f32 %v2623_v50, %v3007_v43 }
  0xfc   : > { %4527 = vst [vmem:[#allocation126_spill] sm:$0xff] %v3039_v42  ;;  %v705_v49 = vadd.f32 %v701_v26, %v631_v15  ;;  %v849_v33 = vmul.f32 %v2626_v51, %v3015_v44  ;;  %v3043_v29 = vld [vmem:[#allocation2 + $0x30] sm:$0xff]  ;;  %v707_v35 = vadd.f32 %v703_v31, %v633_v63  ;;  %v851_v22 = vmul.f32 %v2626_v51, %v3019_v17 }
  0xfd   : > { %4528 = vst [vmem:[#allocation127_spill] sm:$0xff] %v3043_v29  ;;  %v926_v7 = vadd.f32 %v922_v4, %v852_v16  ;;  %v1070_v11 = vmul.f32 %v2659_v1, %v3025_v25  ;;  %v3049_v54 = vld [vmem:[#allocation2 + $0x2b] sm:$0xff]  ;;  %v710_v50 = vmul.f32 %v2648_v60, %v2965_v8  ;;  %v784_v15 = vmul.f32 %v2662_v3, %v2980_v32 }
  0xfe   : > { %4529 = vst [vmem:[#allocation128_spill] sm:$0xff] %v3049_v54  ;;  %v3051_v40 = vld [vmem:[#allocation2 + $0x2c] sm:$0xff]  ;;  %v779_v63 = vadd.f32 %v775_v56, %v705_v49  ;;  %v923_v51 = vmul.f32 %v2639_v55, %v3043_v29  ;;  %v1145_v4 = vmul.f32 %v2672_v5, %v3039_v42  ;;  %v706_v31 = vadd.f32 %v702_v27, %v632_v28  ;;  %v3081_v42 = vld [vmem:[#allocation2 + $0x43] sm:$0xff] }
  0xff   : > { %4530 = vst [vmem:[#allocation129_spill] sm:$0xff] %v3051_v40  ;;  %v3057_v26 = vld [vmem:[#allocation2 + $0x2d] sm:$0xff]  ;;  %v1000_v16 = vadd.f32 %v996_v18, %v926_v7  ;;  %4534 = vst [vmem:[#allocation133_spill] sm:$0xff] %v3067_v24  ;;  %v714_v8 = vadd.f32 %v710_v50, %v640_v30  ;;  %v858_v32 = vmul.f32 %v2665_v2, %v2990_v14  ;;  %v3079_v28 = vld [vmem:[#allocation2 + $0x38] sm:$0xff] }
 0x100   : > { %4531 = vst [vmem:[#allocation130_spill] sm:$0xff] %v3057_v26  ;;  %v3063_v17 = vld [vmem:[#allocation2 + $0x2e] sm:$0xff]  ;;  %v3073_v56 = vmul.f32 %v2629_v52, %v2938_v58  ;;  %v1144_v49 = vmul.f32 %v2672_v5, %v3049_v54  ;;  %v1218_v18 = vmul.f32 %v2675_v6, %v3051_v40  ;;  %v853_v27 = vadd.f32 %v849_v33, %v779_v63  ;;  %v3083_v30 = vld [vmem:[#allocation2 + $0x44] sm:$0xff] }
 0x101   : > { %4532 = vst [vmem:[#allocation131_spill] sm:$0xff] %v3063_v17  ;;  %v3065_v44 = vld [vmem:[#allocation2 + $0x31] sm:$0xff]  ;;  %4535 = vst [vmem:[#allocation134_spill] sm:$0xff] %v3079_v28  ;;  %v781_v7 = vadd.f32 %v777_v34, %v707_v35  ;;  %v1074_v50 = vadd.f32 %v1070_v11, %v1000_v16  ;;  %v1292_v14 = vmul.f32 %v2678_v9, %v3057_v26  ;;  %v3095_v34 = vld [vmem:[#allocation2 + $0x39] sm:$0xff] }
 0x102   : > { %4533 = vst [vmem:[#allocation132_spill] sm:$0xff] %v3065_v44  ;;  %4536 = vst [vmem:[#allocation135_spill] sm:$0xff] %v3081_v42  ;;  %v780_v58 = vadd.f32 %v776_v21, %v706_v31  ;;  %v924_v29 = vmul.f32 %v2639_v55, %v3079_v28  ;;  %v1366_v2 = vmul.f32 %v2681_v10, %v3063_v17  ;;  %v3097_v11 = vld [vmem:[#allocation2 + $0x40] sm:$0xff] }
 0x103   : > { %4537 = vst [vmem:[#allocation136_spill] sm:$0xff] %v3083_v30  ;;  %v927_v23 = vadd.f32 %v923_v51, %v853_v27  ;;  %v997_v33 = vmul.f32 %v2656_v61, %v3065_v44  ;;  %v1071_v35 = vmul.f32 %v2659_v1, %v3067_v24  ;;  %4538 = vst [vmem:[#allocation137_spill] sm:$0xff] %v3095_v34  ;;  %v3099_v63 = vld [vmem:[#allocation2 + $0x41] sm:$0xff]  ;;  %v3107_v44 = vld [vmem:[#allocation2 + $0x34] sm:$0xff] }
 0x104   : > { %4539 = vst [vmem:[#allocation138_spill] sm:$0xff] %v3097_v11  ;;  %v1148_v21 = vadd.f32 %v1144_v49, %v1074_v50  ;;  %v854_v31 = vadd.f32 %v850_v39, %v780_v58  ;;  %v3101_v16 = vld [vmem:[#allocation2 + $0x42] sm:$0xff]  ;;  %v1147_v28 = vmul.f32 %v2672_v5, %v3081_v42  ;;  %v1221_v51 = vmul.f32 %v2675_v6, %v3083_v30  ;;  %v3109_v24 = vld [vmem:[#allocation2 + $0x3a] sm:$0xff] }
 0x105   : > { %4540 = vst [vmem:[#allocation139_spill] sm:$0xff] %v3101_v16  ;;  %v1001_v27 = vadd.f32 %v997_v33, %v927_v23  ;;  %4541 = vst [vmem:[#allocation140_spill] sm:$0xff] %v3107_v44  ;;  %v855_v17 = vadd.f32 %v851_v22, %v781_v7  ;;  %v925_v3 = vmul.f32 %v2639_v55, %v3097_v11  ;;  %v3119_v33 = vld [vmem:[#allocation2 + $0x35] sm:$0xff] }
 0x106   : > { %4542 = vst [vmem:[#allocation141_spill] sm:$0xff] %v3109_v24  ;;  %v999_v58 = vmul.f32 %v2656_v61, %v3099_v63  ;;  %v1222_v39 = vadd.f32 %v1218_v18, %v1148_v21  ;;  %v928_v49 = vadd.f32 %v924_v29, %v854_v31  ;;  %v998_v50 = vmul.f32 %v2656_v61, %v3095_v34  ;;  %v3121_v42 = vld [vmem:[#allocation2 + $0x3b] sm:$0xff] }
 0x107   : > { %v1073_v30 = vmul.f32 %v2659_v1, %v3101_v16  ;;  %v1075_v23 = vadd.f32 %v1071_v35, %v1001_v27  ;;  %4543 = vst [vmem:[#allocation142_spill] sm:$0xff] %v3119_v33  ;;  %4544 = vst [vmem:[#allocation143_spill] sm:$0xff] %v3121_v42  ;;  %v929_v22 = vadd.f32 %v925_v3, %v855_v17  ;;  %v3129_v31 = vld [vmem:[#allocation2 + $0x3c] sm:$0xff]  ;;  %v3131_v27 = vld [vmem:[#allocation2 + $0x45] sm:$0xff] }
 0x108   : > { %v788_v7 = vadd.f32 %v784_v15, %v714_v8  ;;  %v932_v55 = vmul.f32 %v2688_v46, %v3021_v0  ;;  %v1296_v11 = vadd.f32 %v1292_v14, %v1222_v39  ;;  %v1219_v29 = vmul.f32 %v2675_v6, %v3107_v44  ;;  %4545 = vst [vmem:[#allocation144_spill] sm:$0xff] %v3129_v31  ;;  %v3137_v17 = vld [vmem:[#allocation2 + $0x36] sm:$0xff] }
 0x109   : > { %v1002_v18 = vadd.f32 %v998_v50, %v928_v49  ;;  %v1072_v61 = vmul.f32 %v2659_v1, %v3109_v24  ;;  %v1149_v21 = vadd.f32 %v1145_v4, %v1075_v23  ;;  %v1003_v35 = vadd.f32 %v999_v58, %v929_v22  ;;  %4546 = vst [vmem:[#allocation145_spill] sm:$0xff] %v3137_v17  ;;  %v3141_v39 = vld [vmem:[#allocation2 + $0x3d] sm:$0xff] }
 0x10a   : > { %v862_v16 = vadd.f32 %v858_v32, %v788_v7  ;;  %v1006_v3 = vmul.f32 %v2691_v37, %v3023_v20  ;;  %v1370_v8 = vadd.f32 %v1366_v2, %v1296_v11  ;;  %v1293_v14 = vmul.f32 %v2678_v9, %v3119_v33  ;;  %4547 = vst [vmem:[#allocation146_spill] sm:$0xff] %v3141_v39 }
 0x10b   : > { %v1076_v15 = vadd.f32 %v1072_v61, %v1002_v18  ;;  %v1146_v1 = vmul.f32 %v2672_v5, %v3121_v42  ;;  %v1223_v4 = vadd.f32 %v1219_v29, %v1149_v21  ;;  %v1077_v58 = vadd.f32 %v1073_v30, %v1003_v35  ;;  %v3158_v18 = vld [vmem:[#allocation2 + $0x46] sm:$0xff] }
 0x10c   : > { %v936_v49 = vadd.f32 %v932_v55, %v862_v16  ;;  %v1080_v32 = vmul.f32 %v2694_v47, %v3025_v25  ;;  %1428 = vrot.lane.b32.xlu0 %v1370_v8, %s2146_s10  ;;  %v1220_v11 = vmul.f32 %v2675_v6, %v3129_v31  ;;  %v1295_v50 = vmul.f32 %v2678_v9, %v3131_v27  ;;  %v3154_v16 = vld [vmem:[#allocation2 + $0x3e] sm:$0xff] }
 0x10d   : > { %v1150_v2 = vadd.f32 %v1146_v1, %v1076_v15  ;;  %v489_v5 = vmul.f32 %v2632_v53, %v2942_v62  ;;  %v1297_v23 = vadd.f32 %v1293_v14, %v1223_v4  ;;  %v1367_v30 = vmul.f32 %v2681_v10, %v3137_v17  ;;  %4548 = vst [vmem:[#allocation147_spill] sm:$0xff] %v3154_v16 }
 0x10e   : > { %v1151_v22 = vadd.f32 %v1147_v28, %v1077_v58  ;;  %v1010_v7 = vadd.f32 %v1006_v3, %v936_v49  ;;  %v1294_v29 = vmul.f32 %v2678_v9, %v3141_v39  ;;  %v563_v61 = vmul.f32 %v2642_v45, %v2952_v19 }
 0x10f   : > { %v1224_v55 = vadd.f32 %v1220_v11, %v1150_v2  ;;  %v493_v6 = vadd.f32 %v489_v5, %v3073_v56  ;;  %v1371_v21 = vadd.f32 %v1367_v30, %v1297_v23  ;;  %v1154_v14 = vmul.f32 %v2697_v12, %v3049_v54  ;;  %v4549_v30 = vld [vmem:[#allocation44_spill] sm:$0xff] }
 0x110   : > { %v1225_v35 = vadd.f32 %v1221_v51, %v1151_v22  ;;  %v1084_v8 = vadd.f32 %v1080_v32, %v1010_v7  ;;  %v1368_v28 = vmul.f32 %v2681_v10, %v3154_v16  ;;  %v637_v9 = vmul.f32 %v2645_v59, %v2963_v41  ;;  %v4550_v7 = vld [vmem:[#allocation105_spill] sm:$0xff] }
 0x111   : > { %v1298_v15 = vadd.f32 %v1294_v29, %v1224_v55  ;;  %v567_v3 = vadd.f32 %v563_v61, %v493_v6  ;;  %1430 = vrot.lane.b32.xlu1 %v1371_v21, %s2146_s10  ;;  %v1369_v1 = vmul.f32 %v2681_v10, %v3158_v18  ;;  %v1228_v51 = vmul.f32 %v2704_v13, %v3051_v40  ;;  %v4551_v55 = vld [vmem:[#allocation106_spill] sm:$0xff]  ;;  %v4553_v61 = vld [vmem:[#allocation63_spill] sm:$0xff] }
 0x112   : > { %v1299_v56 = vadd.f32 %v1295_v50, %v1225_v35  ;;  %v1158_v4 = vadd.f32 %v1154_v14, %v1084_v8  ;;  %v1302_v49 = vmul.f32 %v2707_v38, %v3057_v26  ;;  %v711_v2 = vmul.f32 %v2648_v60, %v2998_v36  ;;  %v4552_v6 = vld [vmem:[#allocation82_spill] sm:$0xff]  ;;  %v4555_v8 = vld [vmem:[#allocation131_spill] sm:$0xff] }
 0x113   : > { %v1372_v58 = vadd.f32 %v1368_v28, %v1298_v15  ;;  %v641_v32 = vadd.f32 %v637_v9, %v567_v3  ;;  %v416_v50 = vmul.f32 %v2629_v52, %v2940_v57  ;;  %v490_v10 = vmul.f32 %v2632_v53, %v2950_v48  ;;  %v4556_v14 = vld [vmem:[#allocation46_spill] sm:$0xff]  ;;  %v4557_v3 = vld [vmem:[#allocation111_spill] sm:$0xff] }
 0x114   : > { %v1373_v11 = vadd.f32 %v1369_v1, %v1299_v56  ;;  %v1232_v5 = vadd.f32 %v1228_v51, %v1158_v4  ;;  %v785_v22 = vmul.f32 %v4549_v30, %v3007_v43  ;;  %v502_v29 = vadd.f32 %v4551_v55, %v4550_v7  ;;  %v4558_v1 = vld [vmem:[#allocation122_spill] sm:$0xff]  ;;  %v4559_v4 = vld [vmem:[#allocation45_spill] sm:$0xff] }
 0x115   : > { %1432 = vrot.lane.b32.xlu0 %v1372_v58, %s2146_s10  ;;  %v715_v23 = vadd.f32 %v711_v2, %v641_v32  ;;  %v3189_v21 = vmul.f32 %v4553_v61, %v4552_v6  ;;  %v1376_v15 = vmul.f32 %v4556_v14, %v4555_v8  ;;  %v494_v28 = vadd.f32 %v490_v10, %v416_v50  ;;  %v4560_v58 = vld [vmem:[#allocation127_spill] sm:$0xff]  ;;  %v4561_v2 = vld [vmem:[#allocation132_spill] sm:$0xff]  ;;  %v4572_v26 = vld [vmem:[#allocation134_spill] sm:$0xff] }
 0x116   : > { %1434 = vrot.lane.b32.xlu1 %v1373_v11, %s2146_s10  ;;  %v1306_v35 = vadd.f32 %v1302_v49, %v1232_v5  ;;  %v564_v9 = vmul.f32 %v2642_v45, %v4557_v3  ;;  %v859_v51 = vmul.f32 %v4559_v4, %v4558_v1  ;;  %v933_v32 = vmul.f32 %v2688_v46, %v4560_v58  ;;  %v4562_v11 = vld [vmem:[#allocation133_spill] sm:$0xff]  ;;  %v4563_v5 = vld [vmem:[#allocation126_spill] sm:$0xff]  ;;  %s4726_s10 = sld [smem:[#allocation22_spill]] }
 0x117   : > { %4554 = vst [vmem:[#allocation44_spill] sm:$0xff] %v3189_v21  ;;  %v789_v56 = vadd.f32 %v785_v22, %v715_v23  ;;  %v1007_v7 = vmul.f32 %v2691_v37, %v4561_v2  ;;  %v1081_v49 = vmul.f32 %v2694_v47, %v4562_v11  ;;  %v1155_v50 = vmul.f32 %v2697_v12, %v4563_v5  ;;  %v4564_v22 = vld [vmem:[#allocation97_spill] sm:$0xff]  ;;  %v4565_v21 = vld [vmem:[#allocation98_spill] sm:$0xff]  ;;  %v4570_v11 = vld [vmem:[#allocation116_spill] sm:$0xff] }
 0x118   : > { %v1380_v55 = vadd.f32 %v1376_v15, %v1306_v35  ;;  %v568_v10 = vadd.f32 %v564_v9, %v494_v28  ;;  %v1229_v23 = vmul.f32 %v2704_v13, %v3107_v44  ;;  %v417_v61 = vmul.f32 %v2629_v52, %v4564_v22  ;;  %v4566_v28 = vld [vmem:[#allocation94_spill] sm:$0xff]  ;;  %v4568_v52 = vld [vmem:[#allocation99_spill] sm:$0xff] }
 0x119   : > { %v863_v6 = vadd.f32 %v859_v51, %v789_v56  ;;  %v491_v8 = vmul.f32 %v2632_v53, %v4565_v21  ;;  %v1303_v35 = vmul.f32 %v2707_v38, %v3119_v33  ;;  %v1377_v15 = vmul.f32 %v4556_v14, %v3137_v17  ;;  %v4567_v56 = vld [vmem:[#allocation104_spill] sm:$0xff]  ;;  %v4569_v53 = vld [vmem:[#allocation103_spill] sm:$0xff] }
 0x11a   : > { %1448 = vrot.lane.b32.xlu0 %v1380_v55, %s2147_s11  ;;  %v642_v9 = vadd.f32 %v4566_v28, %v568_v10  ;;  %v712_v51 = vmul.f32 %v2648_v60, %v4567_v56  ;;  %v565_v22 = vmul.f32 %v2642_v45, %v4568_v52  ;;  %v639_v21 = vmul.f32 %v2645_v59, %v4569_v53  ;;  %v4571_v2 = vld [vmem:[#allocation119_spill] sm:$0xff] }
 0x11b   : > { %v937_v44 = vadd.f32 %v933_v32, %v863_v6  ;;  %v495_v5 = vadd.f32 %v491_v8, %v417_v61  ;;  %v786_v33 = vmul.f32 %v4549_v30, %v4570_v11  ;;  %v860_v17 = vmul.f32 %v4559_v4, %v4571_v2 }
 0x11c   : > { %v716_v55 = vadd.f32 %v712_v51, %v642_v9  ;;  %v934_v10 = vmul.f32 %v2688_v46, %v4572_v26  ;;  %v1008_v6 = vmul.f32 %v2691_v37, %v3095_v34  ;;  %v1082_v45 = vmul.f32 %v2694_v47, %v3109_v24  ;;  %v4573_v9 = vld [vmem:[#allocation107_spill] sm:$0xff]  ;;  %v4574_v26 = vld [vmem:[#allocation114_spill] sm:$0xff] }
 0x11d   : > { %v1011_v28 = vadd.f32 %v1007_v7, %v937_v44  ;;  %v569_v61 = vadd.f32 %v565_v22, %v495_v5  ;;  %v1156_v59 = vmul.f32 %v2697_v12, %v3121_v42  ;;  %v1230_v32 = vmul.f32 %v2704_v13, %v3129_v31  ;;  %v4575_v5 = vld [vmem:[#allocation110_spill] sm:$0xff]  ;;  %v4577_v42 = vld [vmem:[#allocation51_spill] sm:$0xff] }
 0x11e   : > { %v790_v8 = vadd.f32 %v786_v33, %v716_v55  ;;  %v576_v51 = vadd.f32 %v4573_v9, %v502_v29  ;;  %v1304_v44 = vmul.f32 %v2707_v38, %v3141_v39  ;;  %v713_v34 = vmul.f32 %v2648_v60, %v4574_v26  ;;  %v4576_v55 = vld [vmem:[#allocation112_spill] sm:$0xff]  ;;  %v4580_v9 = vld [vmem:[#allocation138_spill] sm:$0xff] }
 0x11f   : > { %v1085_v2 = vadd.f32 %v1081_v49, %v1011_v28  ;;  %v643_v7 = vadd.f32 %v639_v21, %v569_v61  ;;  %v1378_v33 = vmul.f32 %v4556_v14, %v3154_v16  ;;  %v720_v24 = vmul.f32 %v4577_v42, %v4576_v55  ;;  %v4578_v29 = vld [vmem:[#allocation120_spill] sm:$0xff]  ;;  %v4579_v28 = vld [vmem:[#allocation123_spill] sm:$0xff]  ;;  %v4583_v26 = vld [vmem:[#allocation118_spill] sm:$0xff] }
 0x120   : > { %v864_v53 = vadd.f32 %v860_v17, %v790_v8  ;;  %v650_v22 = vadd.f32 %v4575_v5, %v576_v51  ;;  %v787_v49 = vmul.f32 %v4549_v30, %v4578_v29  ;;  %v861_v21 = vmul.f32 %v4559_v4, %v4579_v28  ;;  %v4581_v8 = vld [vmem:[#allocation115_spill] sm:$0xff]  ;;  %v4582_v16 = vld [vmem:[#allocation52_spill] sm:$0xff]  ;;  %v4584_v55 = vld [vmem:[#allocation53_spill] sm:$0xff] }
 0x121   : > { %v1159_v31 = vadd.f32 %v1155_v50, %v1085_v2  ;;  %v717_v52 = vadd.f32 %v713_v34, %v643_v7  ;;  %v935_v60 = vmul.f32 %v2688_v46, %v4580_v9  ;;  %v794_v39 = vmul.f32 %v4582_v16, %v4581_v8  ;;  %v4585_v34 = vld [vmem:[#allocation54_spill] sm:$0xff]  ;;  %v4586_v29 = vld [vmem:[#allocation108_spill] sm:$0xff]  ;;  %v4587_v4 = vld [vmem:[#allocation47_spill] sm:$0xff] }
 0x122   : > { %v938_v61 = vadd.f32 %v934_v10, %v864_v53  ;;  %v724_v17 = vadd.f32 %v720_v24, %v650_v22  ;;  %v868_v2 = vmul.f32 %v4584_v55, %v4583_v26  ;;  %v942_v50 = vmul.f32 %v4585_v34, %v3021_v0  ;;  %v4588_v10 = vld [vmem:[#allocation48_spill] sm:$0xff]  ;;  %v4591_v0 = vld [vmem:[#allocation139_spill] sm:$0xff] }
 0x123   : > { %v1233_v51 = vadd.f32 %v1229_v23, %v1159_v31  ;;  %v791_v5 = vadd.f32 %v787_v49, %v717_v52  ;;  %v425_v53 = vmul.f32 %v4587_v4, %v4586_v29  ;;  %v499_v46 = vmul.f32 %v4588_v10, %v2942_v62  ;;  %v4589_v23 = vld [vmem:[#allocation55_spill] sm:$0xff]  ;;  %v4593_v62 = vld [vmem:[#allocation50_spill] sm:$0xff] }
 0x124   : > { %v1012_v30 = vadd.f32 %v1008_v6, %v938_v61  ;;  %v798_v7 = vadd.f32 %v794_v39, %v724_v17  ;;  %v1009_v31 = vmul.f32 %v2691_v37, %v3099_v63  ;;  %v1016_v52 = vmul.f32 %v4589_v23, %v3023_v20  ;;  %v4590_v6 = vld [vmem:[#allocation49_spill] sm:$0xff] }
 0x125   : > { %v1307_v24 = vadd.f32 %v1303_v35, %v1233_v51  ;;  %v865_v22 = vadd.f32 %v861_v21, %v791_v5  ;;  %v503_v8 = vadd.f32 %v499_v46, %v425_v53  ;;  %v573_v39 = vmul.f32 %v4590_v6, %v2952_v19  ;;  %v4592_v35 = vld [vmem:[#allocation56_spill] sm:$0xff] }
 0x126   : > { %v1086_v49 = vadd.f32 %v1082_v45, %v1012_v30  ;;  %v872_v26 = vadd.f32 %v868_v2, %v798_v7  ;;  %v1083_v29 = vmul.f32 %v2694_v47, %v4591_v0  ;;  %v1090_v21 = vmul.f32 %v4592_v35, %v3025_v25  ;;  %v4594_v2 = vld [vmem:[#allocation135_spill] sm:$0xff]  ;;  %v4596_v47 = vld [vmem:[#allocation57_spill] sm:$0xff] }
 0x127   : > { %v1381_v61 = vadd.f32 %v1377_v15, %v1307_v24  ;;  %v939_v17 = vadd.f32 %v935_v60, %v865_v22  ;;  %v577_v37 = vadd.f32 %v573_v39, %v503_v8  ;;  %v647_v20 = vmul.f32 %v4593_v62, %v2963_v41  ;;  %v4595_v15 = vld [vmem:[#allocation136_spill] sm:$0xff] }
 0x128   : > { %v1160_v51 = vadd.f32 %v1156_v59, %v1086_v49  ;;  %v946_v5 = vadd.f32 %v942_v50, %v872_v26  ;;  %v1157_v30 = vmul.f32 %v2697_v12, %v4594_v2  ;;  %v1231_v60 = vmul.f32 %v2704_v13, %v4595_v15  ;;  %v4597_v50 = vld [vmem:[#allocation58_spill] sm:$0xff] }
 0x129   : > { %1450 = vrot.lane.b32.xlu1 %v1381_v61, %s2147_s11  ;;  %v1013_v45 = vadd.f32 %v1009_v31, %v939_v17  ;;  %v1164_v7 = vmul.f32 %v4596_v47, %v3049_v54  ;;  %v651_v59 = vadd.f32 %v647_v20, %v577_v37  ;;  %v721_v26 = vmul.f32 %v4577_v42, %v2998_v36 }
 0x12a   : > { %v1234_v53 = vadd.f32 %v1230_v32, %v1160_v51  ;;  %v1020_v46 = vadd.f32 %v1016_v52, %v946_v5  ;;  %v1238_v24 = vmul.f32 %v4597_v50, %v3051_v40  ;;  %v795_v22 = vmul.f32 %v4582_v16, %v3007_v43 }
 0x12b   : > { %v1087_v8 = vadd.f32 %v1083_v29, %v1013_v45  ;;  %v426_v12 = vmul.f32 %v4587_v4, %v2940_v57  ;;  %v725_v49 = vadd.f32 %v721_v26, %v651_v59  ;;  %v500_v32 = vmul.f32 %v4588_v10, %v2950_v48  ;;  %v4598_v45 = vld [vmem:[#allocation93_spill] sm:$0xff]  ;;  %v4600_v59 = vld [vmem:[#allocation130_spill] sm:$0xff]  ;;  %v4601_v26 = vld [vmem:[#allocation59_spill] sm:$0xff] }
 0x12c   : > { %v1308_v13 = vadd.f32 %v1304_v44, %v1234_v53  ;;  %v1094_v31 = vadd.f32 %v1090_v21, %v1020_v46  ;;  %v869_v52 = vmul.f32 %v4584_v55, %v4558_v1  ;;  %v943_v29 = vmul.f32 %v4585_v34, %v4560_v58 }
 0x12d   : > { %v1161_v20 = vadd.f32 %v1157_v30, %v1087_v8  ;;  %v574_v39 = vmul.f32 %v4590_v6, %v4557_v3  ;;  %v799_v51 = vadd.f32 %v795_v22, %v725_v49  ;;  %v504_v5 = vadd.f32 %v500_v32, %v426_v12  ;;  %v4599_v30 = vld [vmem:[#allocation64_spill] sm:$0xff]  ;;  %v4602_v12 = vld [vmem:[#allocation131_spill] sm:$0xff]  ;;  %v4605_v49 = vld [vmem:[#allocation133_spill] sm:$0xff] }
 0x12e   : > { %v1382_v61 = vadd.f32 %v1378_v33, %v1308_v13  ;;  %v1168_v17 = vadd.f32 %v1164_v7, %v1094_v31  ;;  %v1305_v21 = vmul.f32 %v2707_v38, %v3131_v27  ;;  %v1379_v37 = vmul.f32 %v4556_v14, %v3158_v18  ;;  %v4604_v31 = vld [vmem:[#allocation132_spill] sm:$0xff] }
 0x12f   : > { %v1235_v44 = vadd.f32 %v1231_v60, %v1161_v20  ;;  %v656_v53 = vmul.f32 %v4599_v30, %v4598_v45  ;;  %v1312_v8 = vmul.f32 %v4601_v26, %v4600_v59  ;;  %v873_v33 = vadd.f32 %v869_v52, %v799_v51  ;;  %v4603_v60 = vld [vmem:[#allocation60_spill] sm:$0xff]  ;;  %v4606_v45 = vld [vmem:[#allocation95_spill] sm:$0xff]  ;;  %v4607_v52 = vld [vmem:[#allocation126_spill] sm:$0xff] }
 0x130   : > { %1452 = vrot.lane.b32.xlu0 %v1382_v61, %s2147_s11  ;;  %v1242_v46 = vadd.f32 %v1238_v24, %v1168_v17  ;;  %v578_v7 = vadd.f32 %v574_v39, %v504_v5  ;;  %v1386_v13 = vmul.f32 %v4603_v60, %v4602_v12  ;;  %v1017_v38 = vmul.f32 %v4589_v23, %v4604_v31  ;;  %v4608_v51 = vld [vmem:[#allocation97_spill] sm:$0xff] }
 0x131   : > { %v1309_v22 = vadd.f32 %v1305_v21, %v1235_v44  ;;  %v1091_v14 = vmul.f32 %v4592_v35, %v4605_v49  ;;  %v947_v20 = vadd.f32 %v943_v29, %v873_v33  ;;  %v722_v24 = vmul.f32 %v4577_v42, %v4567_v56  ;;  %v4609_v44 = vld [vmem:[#allocation98_spill] sm:$0xff] }
 0x132   : > { %v1316_v32 = vadd.f32 %v1312_v8, %v1242_v46  ;;  %v652_v61 = vadd.f32 %v4606_v45, %v578_v7  ;;  %v1165_v39 = vmul.f32 %v4596_v47, %v4607_v52  ;;  %v427_v5 = vmul.f32 %v4587_v4, %v4608_v51  ;;  %v4610_v45 = vld [vmem:[#allocation140_spill] sm:$0xff]  ;;  %v4611_v8 = vld [vmem:[#allocation99_spill] sm:$0xff] }
 0x133   : > { %v1383_v17 = vadd.f32 %v1379_v37, %v1309_v22  ;;  %v501_v21 = vmul.f32 %v4588_v10, %v4609_v44  ;;  %v1021_v12 = vadd.f32 %v1017_v38, %v947_v20  ;;  %v796_v29 = vmul.f32 %v4582_v16, %v4570_v11  ;;  %v4612_v7 = vld [vmem:[#allocation103_spill] sm:$0xff]  ;;  %v4623_v11 = vld [vmem:[#allocation117_spill] sm:$0xff] }
 0x134   : > { %v1390_v31 = vadd.f32 %v1386_v13, %v1316_v32  ;;  %v726_v49 = vadd.f32 %v722_v24, %v652_v61  ;;  %v1239_v37 = vmul.f32 %v4597_v50, %v4610_v45  ;;  %v575_v33 = vmul.f32 %v4590_v6, %v4611_v8  ;;  %v4613_v13 = vld [vmem:[#allocation119_spill] sm:$0xff]  ;;  %v4614_v32 = vld [vmem:[#allocation134_spill] sm:$0xff] }
 0x135   : > { %1454 = vrot.lane.b32.xlu1 %v1383_v17, %s2147_s11  ;;  %v505_v46 = vadd.f32 %v501_v21, %v427_v5  ;;  %v649_v4 = vmul.f32 %v4593_v62, %v4612_v7  ;;  %v1095_v10 = vadd.f32 %v1091_v14, %v1021_v12  ;;  %v870_v38 = vmul.f32 %v4584_v55, %v4613_v13  ;;  %v4615_v61 = vld [vmem:[#allocation142_spill] sm:$0xff]  ;;  %v4616_v17 = vld [vmem:[#allocation145_spill] sm:$0xff]  ;;  %v4619_v14 = vld [vmem:[#allocation143_spill] sm:$0xff]  ;;  %s4727_s11 = sld [smem:[#allocation21_spill]] }
 0x136   : > { %1468 = vrot.lane.b32.xlu0 %v1390_v31, %s2148_s12  ;;  %v800_v22 = vadd.f32 %v796_v29, %v726_v49  ;;  %v944_v20 = vmul.f32 %v4585_v34, %v4614_v32  ;;  %v1313_v24 = vmul.f32 %v4601_v26, %v4615_v61  ;;  %v1387_v6 = vmul.f32 %v4603_v60, %v4616_v17  ;;  %v4617_v5 = vld [vmem:[#allocation137_spill] sm:$0xff]  ;;  %v4620_v13 = vld [vmem:[#allocation144_spill] sm:$0xff]  ;;  %v4621_v61 = vld [vmem:[#allocation114_spill] sm:$0xff] }
 0x137   : > { %v1018_v62 = vmul.f32 %v4589_v23, %v4617_v5  ;;  %v579_v21 = vadd.f32 %v575_v33, %v505_v46  ;;  %v1169_v45 = vadd.f32 %v1165_v39, %v1095_v10  ;;  %v4618_v12 = vld [vmem:[#allocation141_spill] sm:$0xff]  ;;  %v1166_v29 = vmul.f32 %v4596_v47, %v4619_v14  ;;  %v4624_v39 = vld [vmem:[#allocation146_spill] sm:$0xff]  ;;  %v4625_v10 = vld [vmem:[#allocation147_spill] sm:$0xff] }
 0x138   : > { %v874_v31 = vadd.f32 %v870_v38, %v800_v22  ;;  %v1092_v49 = vmul.f32 %v4592_v35, %v4618_v12  ;;  %v1240_v32 = vmul.f32 %v4597_v50, %v4620_v13  ;;  %v723_v8 = vmul.f32 %v4577_v42, %v4621_v61  ;;  %v4622_v17 = vld [vmem:[#allocation113_spill] sm:$0xff]  ;;  %v4626_v14 = vld [vmem:[#allocation120_spill] sm:$0xff] }
 0x139   : > { %v653_v7 = vadd.f32 %v649_v4, %v579_v21  ;;  %v512_v44 = vadd.f32 %v4623_v11, %v4622_v17  ;;  %v1243_v5 = vadd.f32 %v1239_v37, %v1169_v45  ;;  %v1314_v33 = vmul.f32 %v4601_v26, %v4624_v39  ;;  %v4627_v21 = vld [vmem:[#allocation44_spill] sm:$0xff] }
 0x13a   : > { %v948_v46 = vadd.f32 %v944_v20, %v874_v31  ;;  %v1388_v22 = vmul.f32 %v4603_v60, %v4625_v10  ;;  %v797_v12 = vmul.f32 %v4582_v16, %v4626_v14  ;;  %v871_v4 = vmul.f32 %v4584_v55, %v4579_v28  ;;  %v4628_v20 = vld [vmem:[#allocation112_spill] sm:$0xff]  ;;  %v4629_v16 = vld [vmem:[#allocation65_spill] sm:$0xff] }
 0x13b   : > { %v727_v38 = vadd.f32 %v723_v8, %v653_v7  ;;  %v586_v42 = vadd.f32 %v4627_v21, %v512_v44  ;;  %v1317_v13 = vadd.f32 %v1313_v24, %v1243_v5  ;;  %v945_v11 = vmul.f32 %v4585_v34, %v4580_v9  ;;  %v4630_v10 = vld [vmem:[#allocation108_spill] sm:$0xff]  ;;  %v4631_v44 = vld [vmem:[#allocation61_spill] sm:$0xff]  ;;  %v4635_v21 = vld [vmem:[#allocation66_spill] sm:$0xff] }
 0x13c   : > { %v1022_v61 = vadd.f32 %v1018_v62, %v948_v46  ;;  %v1019_v45 = vmul.f32 %v4589_v23, %v3099_v63  ;;  %v1093_v8 = vmul.f32 %v4592_v35, %v4591_v0  ;;  %v730_v17 = vmul.f32 %v4629_v16, %v4628_v20  ;;  %v4632_v5 = vld [vmem:[#allocation109_spill] sm:$0xff]  ;;  %v4633_v62 = vld [vmem:[#allocation62_spill] sm:$0xff] }
 0x13d   : > { %v801_v37 = vadd.f32 %v797_v12, %v727_v38  ;;  %v660_v7 = vadd.f32 %v656_v53, %v586_v42  ;;  %v1391_v31 = vadd.f32 %v1387_v6, %v1317_v13  ;;  %v435_v24 = vmul.f32 %v4631_v44, %v4630_v10  ;;  %v4634_v38 = vld [vmem:[#allocation115_spill] sm:$0xff] }
 0x13e   : > { %v1096_v55 = vadd.f32 %v1092_v49, %v1022_v61  ;;  %v509_v46 = vmul.f32 %v4633_v62, %v4632_v5  ;;  %v1167_v23 = vmul.f32 %v4596_v47, %v4594_v2  ;;  %v804_v35 = vmul.f32 %v4635_v21, %v4634_v38  ;;  %v4636_v6 = vld [vmem:[#allocation63_spill] sm:$0xff]  ;;  %v4639_v47 = vld [vmem:[#allocation124_spill] sm:$0xff] }
 0x13f   : > { %v875_v34 = vadd.f32 %v871_v4, %v801_v37  ;;  %v734_v12 = vadd.f32 %v730_v17, %v660_v7  ;;  %1470 = vrot.lane.b32.xlu1 %v1391_v31, %s2148_s12  ;;  %v1241_v13 = vmul.f32 %v4597_v50, %v4595_v15  ;;  %v583_v49 = vmul.f32 %v4636_v6, %v2952_v19  ;;  %v4637_v4 = vld [vmem:[#allocation118_spill] sm:$0xff]  ;;  %v4638_v37 = vld [vmem:[#allocation67_spill] sm:$0xff]  ;;  %v4640_v7 = vld [vmem:[#allocation68_spill] sm:$0xff] }
 0x140   : > { %v1170_v53 = vadd.f32 %v1166_v29, %v1096_v55  ;;  %v513_v61 = vadd.f32 %v509_v46, %v435_v24  ;;  %v878_v10 = vmul.f32 %v4638_v37, %v4637_v4  ;;  %v952_v17 = vmul.f32 %v4640_v7, %v4639_v47  ;;  %v4641_v46 = vld [vmem:[#allocation125_spill] sm:$0xff]  ;;  %v4643_v4 = vld [vmem:[#allocation70_spill] sm:$0xff] }
 0x141   : > { %v949_v42 = vadd.f32 %v945_v11, %v875_v34  ;;  %v808_v5 = vadd.f32 %v804_v35, %v734_v12  ;;  %v1315_v31 = vmul.f32 %v4601_v26, %v3131_v27  ;;  %v657_v50 = vmul.f32 %v4599_v30, %v2963_v41  ;;  %v4642_v34 = vld [vmem:[#allocation69_spill] sm:$0xff] }
 0x142   : > { %v1244_v2 = vadd.f32 %v1240_v32, %v1170_v53  ;;  %v587_v29 = vadd.f32 %v583_v49, %v513_v61  ;;  %v1389_v24 = vmul.f32 %v4603_v60, %v3158_v18  ;;  %v1026_v12 = vmul.f32 %v4642_v34, %v4641_v46 }
 0x143   : > { %v1023_v55 = vadd.f32 %v1019_v45, %v949_v42  ;;  %v882_v11 = vadd.f32 %v878_v10, %v808_v5  ;;  %v1100_v47 = vmul.f32 %v4643_v4, %v3025_v25  ;;  %v731_v26 = vmul.f32 %v4629_v16, %v2998_v36  ;;  %v4644_v5 = vld [vmem:[#allocation71_spill] sm:$0xff] }
 0x144   : > { %v1318_v35 = vadd.f32 %v1314_v33, %v1244_v2  ;;  %v661_v32 = vadd.f32 %v657_v50, %v587_v29  ;;  %v436_v45 = vmul.f32 %v4631_v44, %v2940_v57  ;;  %v510_v60 = vmul.f32 %v4633_v62, %v2950_v48 }
 0x145   : > { %v1097_v53 = vadd.f32 %v1093_v8, %v1023_v55  ;;  %v956_v61 = vadd.f32 %v952_v17, %v882_v11  ;;  %v1174_v49 = vmul.f32 %v4644_v5, %v3049_v54  ;;  %v805_v33 = vmul.f32 %v4635_v21, %v3007_v43  ;;  %v4645_v17 = vld [vmem:[#allocation72_spill] sm:$0xff] }
 0x146   : > { %v1392_v10 = vadd.f32 %v1388_v22, %v1318_v35  ;;  %v735_v2 = vadd.f32 %v731_v26, %v661_v32  ;;  %v514_v50 = vadd.f32 %v510_v60, %v436_v45  ;;  %v584_v8 = vmul.f32 %v4636_v6, %v4557_v3  ;;  %v4648_v45 = vld [vmem:[#allocation74_spill] sm:$0xff]  ;;  %v4649_v3 = vld [vmem:[#allocation132_spill] sm:$0xff] }
 0x147   : > { %v1171_v42 = vadd.f32 %v1167_v23, %v1097_v53  ;;  %v1030_v29 = vadd.f32 %v1026_v12, %v956_v61  ;;  %v1248_v55 = vmul.f32 %v4645_v17, %v3051_v40  ;;  %v879_v22 = vmul.f32 %v4638_v37, %v4558_v1  ;;  %v4646_v23 = vld [vmem:[#allocation73_spill] sm:$0xff]  ;;  %v4647_v61 = vld [vmem:[#allocation131_spill] sm:$0xff]  ;;  %v4651_v54 = vld [vmem:[#allocation96_spill] sm:$0xff] }
 0x148   : > { %1472 = vrot.lane.b32.xlu0 %v1392_v10, %s2148_s12  ;;  %v809_v11 = vadd.f32 %v805_v33, %v735_v2  ;;  %v953_v35 = vmul.f32 %v4640_v7, %v4560_v58  ;;  %v1322_v12 = vmul.f32 %v4646_v23, %v4600_v59  ;;  %v588_v53 = vadd.f32 %v584_v8, %v514_v50  ;;  %v4650_v2 = vld [vmem:[#allocation133_spill] sm:$0xff]  ;;  %v4652_v50 = vld [vmem:[#allocation98_spill] sm:$0xff] }
 0x149   : > { %v1245_v32 = vadd.f32 %v1241_v13, %v1171_v42  ;;  %v1104_v26 = vadd.f32 %v1100_v47, %v1030_v29  ;;  %v1396_v60 = vmul.f32 %v4648_v45, %v4647_v61  ;;  %v1027_v43 = vmul.f32 %v4642_v34, %v4649_v3 }
 0x14a   : > { %v883_v10 = vadd.f32 %v879_v22, %v809_v11  ;;  %v1101_v33 = vmul.f32 %v4643_v4, %v4650_v2  ;;  %v662_v58 = vadd.f32 %v4651_v54, %v588_v53  ;;  %v732_v13 = vmul.f32 %v4629_v16, %v4567_v56 }
 0x14b   : > { %v1319_v1 = vadd.f32 %v1315_v31, %v1245_v32  ;;  %v1178_v40 = vadd.f32 %v1174_v49, %v1104_v26  ;;  %v1175_v42 = vmul.f32 %v4644_v5, %v4607_v52  ;;  %v437_v29 = vmul.f32 %v4631_v44, %v4608_v51  ;;  %v4653_v31 = vld [vmem:[#allocation116_spill] sm:$0xff]  ;;  %v4654_v26 = vld [vmem:[#allocation99_spill] sm:$0xff] }
 0x14c   : > { %v957_v47 = vadd.f32 %v953_v35, %v883_v10  ;;  %v511_v8 = vmul.f32 %v4633_v62, %v4652_v50  ;;  %v736_v2 = vadd.f32 %v732_v13, %v662_v58  ;;  %v806_v49 = vmul.f32 %v4635_v21, %v4653_v31  ;;  %v4655_v35 = vld [vmem:[#allocation103_spill] sm:$0xff] }
 0x14d   : > { %v1393_v11 = vadd.f32 %v1389_v24, %v1319_v1  ;;  %v1252_v22 = vadd.f32 %v1248_v55, %v1178_v40  ;;  %v585_v56 = vmul.f32 %v4636_v6, %v4654_v26  ;;  %v659_v53 = vmul.f32 %v4599_v30, %v4655_v35  ;;  %v4656_v10 = vld [vmem:[#allocation119_spill] sm:$0xff]  ;;  %v4657_v40 = vld [vmem:[#allocation134_spill] sm:$0xff]  ;;  %v4658_v24 = vld [vmem:[#allocation140_spill] sm:$0xff] }
 0x14e   : > { %v1031_v54 = vadd.f32 %v1027_v43, %v957_v47  ;;  %v515_v32 = vadd.f32 %v511_v8, %v437_v29  ;;  %v810_v44 = vadd.f32 %v806_v49, %v736_v2  ;;  %v880_v1 = vmul.f32 %v4638_v37, %v4656_v10  ;;  %v4659_v55 = vld [vmem:[#allocation142_spill] sm:$0xff]  ;;  %v4660_v30 = vld [vmem:[#allocation145_spill] sm:$0xff]  ;;  %v4666_v35 = vld [vmem:[#allocation75_spill] sm:$0xff] }
 0x14f   : > { %1474 = vrot.lane.b32.xlu1 %v1393_v11, %s2148_s12  ;;  %v1326_v51 = vadd.f32 %v1322_v12, %v1252_v22  ;;  %v954_v58 = vmul.f32 %v4640_v7, %v4657_v40  ;;  %v1249_v43 = vmul.f32 %v4645_v17, %v4658_v24  ;;  %v1323_v6 = vmul.f32 %v4646_v23, %v4659_v55  ;;  %v4661_v2 = vld [vmem:[#allocation137_spill] sm:$0xff]  ;;  %v4663_v49 = vld [vmem:[#allocation114_spill] sm:$0xff]  ;;  %v4668_v10 = vld [vmem:[#allocation76_spill] sm:$0xff]  ;;  %s4728_s12 = sshll.u32 %s4727_s11, 8 }
 0x150   : > { %v1105_v62 = vadd.f32 %v1101_v33, %v1031_v54  ;;  %v589_v13 = vadd.f32 %v585_v56, %v515_v32  ;;  %v1397_v29 = vmul.f32 %v4648_v45, %v4660_v30  ;;  %v884_v12 = vadd.f32 %v880_v1, %v810_v44  ;;  %v4662_v11 = vld [vmem:[#allocation141_spill] sm:$0xff]  ;;  %v4665_v56 = vld [vmem:[#allocation80_spill] sm:$0xff] }
 0x151   : > { %v1400_v47 = vadd.f32 %v1396_v60, %v1326_v51  ;;  %v1028_v50 = vmul.f32 %v4642_v34, %v4661_v2  ;;  %v1102_v22 = vmul.f32 %v4643_v4, %v4662_v11  ;;  %v733_v54 = vmul.f32 %v4629_v16, %v4663_v49  ;;  %v4664_v60 = vld [vmem:[#allocation143_spill] sm:$0xff]  ;;  %v4667_v44 = vld [vmem:[#allocation81_spill] sm:$0xff] }
 0x152   : > { %v1179_v8 = vadd.f32 %v1175_v42, %v1105_v62  ;;  %v663_v33 = vadd.f32 %v659_v53, %v589_v13  ;;  %v958_v32 = vadd.f32 %v954_v58, %v884_v12  ;;  %v1176_v26 = vmul.f32 %v4644_v5, %v4664_v60  ;;  %v4669_v62 = vld [vmem:[#allocation144_spill] sm:$0xff]  ;;  %v4670_v12 = vld [vmem:[#allocation82_spill] sm:$0xff]  ;;  %v4671_v60 = vld [vmem:[#allocation77_spill] sm:$0xff] }
 0x153   : > { %1488 = vrot.lane.b32.xlu0 %v1400_v47, %s2149_s23  ;;  %v444_v51 = vmul.f32 %v4666_v35, %v4665_v56  ;;  %v518_v42 = vmul.f32 %v4668_v10, %v4667_v44  ;;  %v1250_v53 = vmul.f32 %v4645_v17, %v4669_v62  ;;  %v807_v16 = vmul.f32 %v4635_v21, %v4626_v14 }
 0x154   : > { %v1253_v1 = vadd.f32 %v1249_v43, %v1179_v8  ;;  %v737_v13 = vadd.f32 %v733_v54, %v663_v33  ;;  %v1032_v49 = vadd.f32 %v1028_v50, %v958_v32  ;;  %v1324_v58 = vmul.f32 %v4646_v23, %v4624_v39  ;;  %v4672_v54 = vld [vmem:[#allocation147_spill] sm:$0xff]  ;;  %v4673_v50 = vld [vmem:[#allocation93_spill] sm:$0xff]  ;;  %v4674_v32 = vld [vmem:[#allocation78_spill] sm:$0xff] }
 0x155   : > { %v522_v47 = vadd.f32 %v518_v42, %v444_v51  ;;  %v592_v11 = vmul.f32 %v4671_v60, %v4670_v12  ;;  %v881_v43 = vmul.f32 %v4638_v37, %v4579_v28  ;;  %v955_v8 = vmul.f32 %v4640_v7, %v4580_v9  ;;  %v4675_v7 = vld [vmem:[#allocation79_spill] sm:$0xff] }
 0x156   : > { %v1327_v56 = vadd.f32 %v1323_v6, %v1253_v1  ;;  %v811_v2 = vadd.f32 %v807_v16, %v737_v13  ;;  %v1106_v33 = vadd.f32 %v1102_v22, %v1032_v49  ;;  %v1398_v14 = vmul.f32 %v4648_v45, %v4672_v54  ;;  %v4676_v13 = vld [vmem:[#allocation108_spill] sm:$0xff]  ;;  %v4677_v49 = vld [vmem:[#allocation135_spill] sm:$0xff] }
 0x157   : > { %v596_v21 = vadd.f32 %v592_v11, %v522_v47  ;;  %v666_v44 = vmul.f32 %v4674_v32, %v4673_v50  ;;  %v1029_v6 = vmul.f32 %v4642_v34, %v3099_v63  ;;  %v1103_v1 = vmul.f32 %v4643_v4, %v4591_v0  ;;  %v4679_v12 = vld [vmem:[#allocation83_spill] sm:$0xff]  ;;  %v4681_v50 = vld [vmem:[#allocation84_spill] sm:$0xff] }
 0x158   : > { %v1401_v51 = vadd.f32 %v1397_v29, %v1327_v56  ;;  %v885_v42 = vadd.f32 %v881_v43, %v811_v2  ;;  %v1180_v28 = vadd.f32 %v1176_v26, %v1106_v33  ;;  %v740_v22 = vmul.f32 %v4675_v7, %v4628_v20  ;;  %v4678_v2 = vld [vmem:[#allocation109_spill] sm:$0xff] }
 0x159   : > { %v670_v37 = vadd.f32 %v666_v44, %v596_v21  ;;  %v445_v16 = vmul.f32 %v4666_v35, %v4676_v13  ;;  %v1177_v29 = vmul.f32 %v4644_v5, %v4677_v49  ;;  %v1251_v34 = vmul.f32 %v4645_v17, %v4595_v15  ;;  %v4680_v21 = vld [vmem:[#allocation118_spill] sm:$0xff]  ;;  %v4682_v44 = vld [vmem:[#allocation124_spill] sm:$0xff] }
 0x15a   : > { %1490 = vrot.lane.b32.xlu1 %v1401_v51, %s2149_s23  ;;  %v959_v11 = vadd.f32 %v955_v8, %v885_v42  ;;  %v519_v4 = vmul.f32 %v4668_v10, %v4678_v2  ;;  %v1254_v26 = vadd.f32 %v1250_v53, %v1180_v28  ;;  %v1325_v47 = vmul.f32 %v4646_v23, %v3131_v27  ;;  %v4683_v51 = vld [vmem:[#allocation85_spill] sm:$0xff]  ;;  %v4684_v28 = vld [vmem:[#allocation86_spill] sm:$0xff] }
 0x15b   : > { %v744_v20 = vadd.f32 %v740_v22, %v670_v37  ;;  %v814_v56 = vmul.f32 %v4679_v12, %v4634_v38  ;;  %v1399_v8 = vmul.f32 %v4648_v45, %v3158_v18  ;;  %v593_v5 = vmul.f32 %v4671_v60, %v2952_v19  ;;  %v4685_v19 = vld [vmem:[#allocation87_spill] sm:$0xff] }
 0x15c   : > { %v1033_v43 = vadd.f32 %v1029_v6, %v959_v11  ;;  %v523_v33 = vadd.f32 %v519_v4, %v445_v16  ;;  %v1328_v15 = vadd.f32 %v1324_v58, %v1254_v26  ;;  %v888_v53 = vmul.f32 %v4681_v50, %v4680_v21  ;;  %v4688_v4 = vld [vmem:[#allocation129_spill] sm:$0xff]  ;;  %v4689_v26 = vld [vmem:[#allocation90_spill] sm:$0xff] }
 0x15d   : > { %v818_v17 = vadd.f32 %v814_v56, %v744_v20  ;;  %v962_v23 = vmul.f32 %v4683_v51, %v4682_v44  ;;  %v1036_v38 = vmul.f32 %v4684_v28, %v4641_v46  ;;  %v667_v45 = vmul.f32 %v4674_v32, %v2963_v41  ;;  %v4686_v41 = vld [vmem:[#allocation128_spill] sm:$0xff]  ;;  %v4690_v20 = vld [vmem:[#allocation121_spill] sm:$0xff] }
 0x15e   : > { %v1107_v42 = vadd.f32 %v1103_v1, %v1033_v43  ;;  %v597_v6 = vadd.f32 %v593_v5, %v523_v33  ;;  %v1402_v37 = vadd.f32 %v1398_v14, %v1328_v15  ;;  %v1110_v58 = vmul.f32 %v4685_v19, %v3025_v25  ;;  %v4687_v14 = vld [vmem:[#allocation89_spill] sm:$0xff]  ;;  %v4691_v33 = vld [vmem:[#allocation111_spill] sm:$0xff] }
 0x15f   : > { %v892_v22 = vadd.f32 %v888_v53, %v818_v17  ;;  %v741_v13 = vmul.f32 %v4675_v7, %v2998_v36  ;;  %v446_v1 = vmul.f32 %v4666_v35, %v2940_v57  ;;  %v520_v46 = vmul.f32 %v4668_v10, %v2950_v48  ;;  %v4692_v48 = vld [vmem:[#allocation91_spill] sm:$0xff]  ;;  %v4693_v17 = vld [vmem:[#allocation92_spill] sm:$0xff]  ;;  %v4694_v53 = vld [vmem:[#allocation122_spill] sm:$0xff] }
 0x160   : > { %v1181_v16 = vadd.f32 %v1177_v29, %v1107_v42  ;;  %v671_v11 = vadd.f32 %v667_v45, %v597_v6  ;;  %1492 = vrot.lane.b32.xlu0 %v1402_v37, %s2149_s23  ;;  %v1184_v2 = vmul.f32 %v4687_v14, %v4686_v41  ;;  %v1258_v25 = vmul.f32 %v4689_v26, %v4688_v4  ;;  %v4695_v6 = vld [vmem:[#allocation127_spill] sm:$0xff]  ;;  %v3554_v4 = vld [vmem:[#allocation2 + $0x19] sm:$0xff] }
 0x161   : > { %v966_v49 = vadd.f32 %v962_v23, %v892_v22  ;;  %v815_v36 = vmul.f32 %v4679_v12, %v4690_v20  ;;  %v524_v43 = vadd.f32 %v520_v46, %v446_v1  ;;  %v594_v57 = vmul.f32 %v4671_v60, %v4691_v33  ;;  %v3544_v46 = vld [vmem:[#allocation2 + $0x18] sm:$0xff] }
 0x162   : > { %v1255_v29 = vadd.f32 %v1251_v34, %v1181_v16  ;;  %v745_v56 = vadd.f32 %v741_v13, %v671_v11  ;;  %v1332_v15 = vmul.f32 %v4692_v48, %v4600_v59  ;;  %v1406_v21 = vmul.f32 %v4693_v17, %v4647_v61  ;;  %v3539_v59 = vld [vmem:[#allocation2 + $0x14] sm:$0xff] }
 0x163   : > { %v1040_v5 = vadd.f32 %v1036_v38, %v966_v49  ;;  %v889_v44 = vmul.f32 %v4681_v50, %v4694_v53  ;;  %v963_v34 = vmul.f32 %v4683_v51, %v4695_v6  ;;  %v598_v45 = vadd.f32 %v594_v57, %v524_v43  ;;  %v4696_v38 = vld [vmem:[#allocation133_spill] sm:$0xff] }
 0x164   : > { %v1329_v23 = vadd.f32 %v1325_v47, %v1255_v29  ;;  %v819_v42 = vadd.f32 %v815_v36, %v745_v56  ;;  %v1037_v22 = vmul.f32 %v4684_v28, %v4649_v3  ;;  %v1111_v13 = vmul.f32 %v4685_v19, %v4696_v38  ;;  %v4697_v47 = vld [vmem:[#allocation100_spill] sm:$0xff]  ;;  %v4698_v53 = vld [vmem:[#allocation137_spill] sm:$0xff] }
 0x165   : > { %v1114_v37 = vadd.f32 %v1110_v58, %v1040_v5  ;;  %v742_v61 = vmul.f32 %v3539_v59, %v4675_v7  ;;  %v672_v1 = vadd.f32 %v4697_v47, %v598_v45  ;;  %v447_v58 = vmul.f32 %v3544_v46, %v4666_v35  ;;  %v3573_v57 = vld [vmem:[#allocation2 + $0x16] sm:$0xff] }
 0x166   : > { %v1403_v16 = vadd.f32 %v1399_v8, %v1329_v23  ;;  %v893_v11 = vadd.f32 %v889_v44, %v819_v42  ;;  %v1185_v49 = vmul.f32 %v4687_v14, %v4607_v52  ;;  %v1259_v41 = vmul.f32 %v4689_v26, %v4658_v24  ;;  %v3565_v24 = vld [vmem:[#allocation2 + $0x1a] sm:$0xff] }
 0x167   : > { %v1188_v3 = vadd.f32 %v1184_v2, %v1114_v37  ;;  %v521_v8 = vmul.f32 %v3554_v4, %v4668_v10  ;;  %v1333_v35 = vmul.f32 %v4692_v48, %v4659_v55  ;;  %v746_v36 = vadd.f32 %v742_v61, %v672_v1  ;;  %v3569_v10 = vld [vmem:[#allocation2 + $0x1b] sm:$0xff]  ;;  %v4702_v1 = vld [vmem:[#allocation143_spill] sm:$0xff] }
 0x168   : > { %1494 = vrot.lane.b32.xlu1 %v1403_v16, %s2149_s23  ;;  %v967_v20 = vadd.f32 %v963_v34, %v893_v11  ;;  %v816_v2 = vmul.f32 %v4679_v12, %v4653_v31  ;;  %v595_v56 = vmul.f32 %v3565_v24, %v4671_v60  ;;  %v669_v43 = vmul.f32 %v3569_v10, %v4674_v32  ;;  %v4699_v6 = vld [vmem:[#allocation141_spill] sm:$0xff]  ;;  %v3595_v37 = vld [vmem:[#allocation2] sm:$0xff]  ;;  %s4043_s23 = scalar_lea.vmem [#allocation8], %s4728_s12 }
 0x169   : > { %v1262_v52 = vadd.f32 %v1258_v25, %v1188_v3  ;;  %v525_v29 = vadd.f32 %v521_v8, %v447_v58  ;;  %v890_v31 = vmul.f32 %v3573_v57, %v4681_v50  ;;  %v964_v25 = vmul.f32 %v4683_v51, %v4657_v40  ;;  %v3587_v45 = vld [vmem:[#allocation2 + $0x1c] sm:$0xff] }
 0x16a   : > { %v1041_v33 = vadd.f32 %v1037_v22, %v967_v20  ;;  %v820_v55 = vadd.f32 %v816_v2, %v746_v36  ;;  %v1407_v60 = vmul.f32 %v4693_v17, %v4660_v30  ;;  %v1038_v44 = vmul.f32 %v4684_v28, %v4698_v53  ;;  %v4700_v22 = vld [vmem:[#allocation88_spill] sm:$0xff]  ;;  %v4701_v61 = vld [vmem:[#allocation101_spill] sm:$0xff]  ;;  %v4703_v36 = vld [vmem:[#allocation102_spill] sm:$0xff] }
 0x16b   : > { %v1336_v5 = vadd.f32 %v1332_v15, %v1262_v52  ;;  %v599_v32 = vadd.f32 %v595_v56, %v525_v29  ;;  %v1112_v34 = vmul.f32 %v4685_v19, %v4699_v6  ;;  %v743_v40 = vmul.f32 %v3587_v45, %v4675_v7  ;;  %v3611_v3 = vld [vmem:[#allocation2 + $0x1d] sm:$0xff] }
 0x16c   : > { %v1115_v23 = vadd.f32 %v1111_v13, %v1041_v33  ;;  %v894_v42 = vadd.f32 %v890_v31, %v820_v55  ;;  %v454_v38 = vmul.f32 %v3595_v37, %v4700_v22  ;;  %v3599_v13 = vld [vmem:[#allocation2 + $0x1] sm:$0xff]  ;;  %v1186_v7 = vmul.f32 %v4687_v14, %v4702_v1 }
 0x16d   : > { %v1410_v30 = vadd.f32 %v1406_v21, %v1336_v5  ;;  %v673_v15 = vadd.f32 %v669_v43, %v599_v32  ;;  %v528_v16 = vmul.f32 %v3599_v13, %v4701_v61  ;;  %v3606_v58 = vstv %s3548_s7  ;;  %v3619_v56 = vld [vmem:[#allocation2 + $0x1e] sm:$0xff]  ;;  %s4729_s7 = sld [smem:[#allocation16_spill]] }
 0x16e   : > { %v1189_v11 = vadd.f32 %v1185_v49, %v1115_v23  ;;  %v968_v47 = vadd.f32 %v964_v25, %v894_v42  ;;  %v817_v8 = vmul.f32 %v3611_v3, %v4679_v12  ;;  %v3615_v49 = vld [vmem:[#allocation2 + $0x2] sm:$0xff]  ;;  %v891_v43 = vmul.f32 %v3619_v56, %v4681_v50 }
 0x16f   : > { %1508 = vrot.lane.b32.xlu0 %v1410_v30, %s2150_s25  ;;  %v747_v21 = vadd.f32 %v743_v40, %v673_v15  ;;  %v532_v20 = vadd.f32 %v528_v16, %v454_v38  ;;  %v602_v2 = vmul.f32 %v3615_v49, %v4703_v36  ;;  %v3624_v33 = vstv %s3563_s16  ;;  %v3630_v25 = vld [vmem:[#allocation2 + $0x3] sm:$0xff] }
 0x170   : > { %v1263_v52 = vadd.f32 %v1259_v41, %v1189_v11  ;;  %v1042_v29 = vadd.f32 %v1038_v44, %v968_v47  ;;  %v965_v12 = vmul.f32 %v4683_v51, %v4580_v9  ;;  %v676_v41 = vmul.f32 %v3630_v25, %v3606_v58  ;;  %v3641_v51 = vld [vmem:[#allocation2 + $0x4] sm:$0xff] }
 0x171   : > { %v821_v55 = vadd.f32 %v817_v8, %v747_v21  ;;  %v606_v31 = vadd.f32 %v602_v2, %v532_v20  ;;  %v1260_v50 = vmul.f32 %v4689_v26, %v4669_v62  ;;  %v3637_v44 = vstv %s3579_s26  ;;  %v3669_v47 = vld [vmem:[#allocation2 + $0x6] sm:$0xff]  ;;  %s1678_s26 = sshll.u32 %s4043_s23, 4  ;;  %s4124_s26 = int_to_ptr.vmem [resolvable:$true] %s1678_s26 }
 0x172   : > { %v1337_v5 = vadd.f32 %v1333_v35, %v1263_v52  ;;  %v1116_v53 = vadd.f32 %v1112_v34, %v1042_v29  ;;  %v1039_v23 = vmul.f32 %v4684_v28, %v3099_v63  ;;  %v750_v42 = vmul.f32 %v3641_v51, %v3624_v33  ;;  %v3655_v28 = vld [vmem:[#allocation2 + $0x5] sm:$0xff] }
 0x173   : > { %v895_v32 = vadd.f32 %v891_v43, %v821_v55  ;;  %v680_v9 = vadd.f32 %v676_v41, %v606_v31  ;;  %v3648_v34 = vstv %s3591_s6  ;;  %v3651_v62 = vstv %s3593_s18  ;;  %v3688_v2 = vld [vmem:[#allocation2 + $0x9] sm:$0xff]  ;;  %s1881_s16 = sshll.u32 %s4729_s7, 12 }
 0x174   : > { %v1411_v35 = vadd.f32 %v1407_v60, %v1337_v5  ;;  %v1190_v6 = vadd.f32 %v1186_v7, %v1116_v53  ;;  %v1113_v30 = vmul.f32 %v4685_v19, %v4591_v0  ;;  %v824_v15 = vmul.f32 %v3655_v28, %v3637_v44  ;;  %v3673_v7 = vld [vmem:[#allocation2 + $0x28] sm:$0xff] }
 0x175   : > { %v969_v40 = vadd.f32 %v965_v12, %v895_v32  ;;  %v754_v63 = vadd.f32 %v750_v42, %v680_v9  ;;  %v1334_v38 = vmul.f32 %v4692_v48, %v4624_v39  ;;  %v1408_v16 = vmul.f32 %v4693_v17, %v4672_v54  ;;  %v3684_v54 = vld [vmem:[#allocation2 + $0x8] sm:$0xff] }
 0x176   : > { %1510 = vrot.lane.b32.xlu1 %v1411_v35, %s2150_s25  ;;  %v1264_v60 = vadd.f32 %v1260_v50, %v1190_v6  ;;  %v3667_v11 = vstv %s3608_s17  ;;  %v898_v1 = vmul.f32 %v3669_v47, %v3648_v34  ;;  %v972_v21 = vmul.f32 %v3673_v7, %v3651_v62  ;;  %v3692_v43 = vld [vmem:[#allocation2 + $0x43] sm:$0xff]  ;;  %s4730_s17 = sld [smem:[#allocation150_spill]] }
 0x177   : > { %v1043_v0 = vadd.f32 %v1039_v23, %v969_v40  ;;  %v828_v19 = vadd.f32 %v824_v15, %v754_v63  ;;  %v3680_v8 = vstv %s3626_s27  ;;  %v455_v20 = vmul.f32 %v3684_v54, %v4700_v22  ;;  %v3696_v31 = vld [vmem:[#allocation2 + $0x29] sm:$0xff]  ;;  %s4731_s27 = sld [smem:[#allocation19_spill]] }
 0x178   : > { %v1338_v39 = vadd.f32 %v1334_v38, %v1264_v60  ;;  %v529_v52 = vmul.f32 %v3688_v2, %v4701_v61  ;;  %v1187_v55 = vmul.f32 %v3692_v43, %v4687_v14  ;;  %v1046_v41 = vmul.f32 %v3696_v31, %v3667_v11  ;;  %v3700_v53 = vld [vmem:[#allocation2 + $0x44] sm:$0xff] }
 0x179   : > { %v1117_v29 = vadd.f32 %v1113_v30, %v1043_v0  ;;  %v902_v12 = vadd.f32 %v898_v1, %v828_v19  ;;  %v1261_v50 = vmul.f32 %v3700_v53, %v4689_v26  ;;  %v3704_v23 = vld [vmem:[#allocation2 + $0xa] sm:$0xff]  ;;  %v3713_v40 = vstv %s3645_s22  ;;  %s1665_s22 = scalar_lea.sflag [#allocation5], %s4727_s11 }
 0x17a   : > { %v1412_v5 = vadd.f32 %v1408_v16, %v1338_v39  ;;  %v533_v32 = vadd.f32 %v529_v52, %v455_v20  ;;  %v603_v9 = vmul.f32 %v3704_v23, %v4703_v36  ;;  %v3708_v35 = vld [vmem:[#allocation2 + $0x2a] sm:$0xff]  ;;  %v1335_v26 = vmul.f32 %v4692_v48, %v3131_v27 }
 0x17b   : > { %v1191_v14 = vadd.f32 %v1187_v55, %v1117_v29  ;;  %v976_v42 = vadd.f32 %v972_v21, %v902_v12  ;;  %v1120_v6 = vmul.f32 %v3708_v35, %v3680_v8  ;;  %v3718_v63 = vld [vmem:[#allocation2 + $0xb] sm:$0xff]  ;;  %v1409_v38 = vmul.f32 %v4693_v17, %v3158_v18 }
 0x17c   : > { %1512 = vrot.lane.b32.xlu0 %v1412_v5, %s2150_s25  ;;  %v607_v30 = vadd.f32 %v603_v9, %v533_v32  ;;  %v677_v15 = vmul.f32 %v3718_v63, %v3606_v58  ;;  %v3725_v0 = vstv %s3659_s28  ;;  %v3727_v19 = vld [vmem:[#allocation2 + $0x2b] sm:$0xff]  ;;  %v3740_v52 = vstv %s3677_s3  ;;  %s2068_s28 = scalar_lea.vmem %s4124_s26, 4096  ;;  %s2152_s3 = smov [#allocation8]  }
 0x17d   : > { %v1265_v60 = vadd.f32 %v1261_v50, %v1191_v14  ;;  %v1050_v16 = vadd.f32 %v1046_v41, %v976_v42  ;;  %4704 = vst [vmem:[#allocation105_spill] sm:$0xff] %v3727_v19  ;;  %v1194_v27 = vmul.f32 %v3727_v19, %v3713_v40  ;;  %v3731_v1 = vld [vmem:[#allocation2 + $0xc] sm:$0xff]  ;;  %v3751_v5 = vstv %s3682_s30  ;;  %p2069_p13 = scmp.ne.s32.totalorder %s4124_s26, %s2068_s28  ;;  %p4732_p3 = scmp.ne.s32.totalorder %s4731_s27, 0 }
 0x17e   : > { %v681_v48 = vadd.f32 %v677_v15, %v607_v30  ;;  %v751_v21 = vmul.f32 %v3731_v1, %v3624_v33  ;;  %v3735_v39 = vld [vmem:[#allocation2 + $0x10] sm:$0xff]  ;;  %s2072_s30 = sshll.u32 %s2152_s3, 4  ;;  %s2073_s30 = int_to_ptr.vmem [resolvable:$false] %s2072_s30 }
 0x17f   : > { %v456_v18 = vmul.f32 %v3735_v39, %v4700_v22  ;;  %v1339_v17 = vadd.f32 %v1335_v26, %v1265_v60  ;;  %v1124_v20 = vadd.f32 %v1120_v6, %v1050_v16  ;;  %v3742_v29 = vld [vmem:[#allocation2 + $0x11] sm:$0xff]  ;;  %p2070_p8 = pnand %p2069_p13, %p4732_p3  ;;  %p2075_p10 = scmp.lt.s32.totalorder %s4124_s26, %s2073_s30 }
 0x180   : > { %v530_v55 = vmul.f32 %v3742_v29, %v4701_v61  ;;  %v3746_v12 = vld [vmem:[#allocation2 + $0x2c] sm:$0xff]  ;;  %v755_v50 = vadd.f32 %v751_v21, %v681_v48 }
 0x181   : > { %4705 = vst [vmem:[#allocation106_spill] sm:$0xff] %v3746_v12  ;;  %v1268_v41 = vmul.f32 %v3746_v12, %v3725_v0  ;;  %v3753_v32 = vld [vmem:[#allocation2 + $0xd] sm:$0xff]  ;;  %v1413_v14 = vadd.f32 %v1409_v38, %v1339_v17  ;;  %v1198_v42 = vadd.f32 %v1194_v27, %v1124_v20  ;;  %p2071_p9 = pneg %p2070_p8 }
 0x182   : > { %v825_v9 = vmul.f32 %v3753_v32, %v3637_v44  ;;  %v534_v6 = vadd.f32 %v530_v55, %v456_v18  ;;  %v3757_v26 = vld [vmem:[#allocation2 + $0x12] sm:$0xff] }
 0x183   : > { %v604_v30 = vmul.f32 %v3757_v26, %v4703_v36  ;;  %v3761_v60 = vld [vmem:[#allocation2 + $0xe] sm:$0xff]  ;;  %1514 = vrot.lane.b32.xlu1 %v1413_v14, %s2150_s25  ;;  %v1272_v38 = vadd.f32 %v1268_v41, %v1198_v42  ;;  %v457_v41 = vmul.f32 %v3544_v46, %v4700_v22  ;;  %v605_v22 = vmul.f32 %v3565_v24, %v4703_v36  ;;  %v3807_v36 = vld [vmem:[#allocation2 + $0x38] sm:$0xff]  ;;  %s4122_s25 = scalar_lea.hbm %s4730_s17, %s1881_s16 }
 0x184   : > { %v829_v15 = vadd.f32 %v825_v9, %v755_v50  ;;  %4706 = vst [vmem:[#allocation46_spill] sm:$0xff] %v3761_v60  ;;  %v899_v16 = vmul.f32 %v3761_v60, %v3648_v34  ;;  %v3765_v48 = vld [vmem:[#allocation2 + $0x30] sm:$0xff] }
 0x185   : > { %4707 = vst [vmem:[#allocation45_spill] sm:$0xff] %v3765_v48  ;;  %v973_v21 = vmul.f32 %v3765_v48, %v3651_v62  ;;  %v3770_v27 = vld [vmem:[#allocation2 + $0x2d] sm:$0xff]  ;;  %v608_v17 = vadd.f32 %v604_v30, %v534_v6  ;;  %v531_v6 = vmul.f32 %v3554_v4, %v4701_v61  ;;  %v3792_v60 = vld [vmem:[#allocation2 + $0x15] sm:$0xff]  ;;  %v679_v61 = vmul.f32 %v3569_v10, %v3606_v58 }
 0x186   : > { %4708 = vst [vmem:[#allocation94_spill] sm:$0xff] %v3770_v27  ;;  %v1342_v18 = vmul.f32 %v3770_v27, %v3740_v52  ;;  %v3774_v20 = vld [vmem:[#allocation2 + $0x13] sm:$0xff]  ;;  %v903_v12 = vadd.f32 %v899_v16, %v829_v15  ;;  %v752_v27 = vmul.f32 %v3539_v59, %v3624_v33  ;;  %v826_v15 = vmul.f32 %v3792_v60, %v3637_v44 }
 0x187   : > { %v678_v55 = vmul.f32 %v3774_v20, %v3606_v58  ;;  %v3778_v50 = vld [vmem:[#allocation2 + $0x2e] sm:$0xff] }
 0x188   : > { %4709 = vst [vmem:[#allocation104_spill] sm:$0xff] %v3778_v50  ;;  %v1416_v9 = vmul.f32 %v3778_v50, %v3751_v5  ;;  %v1346_v14 = vadd.f32 %v1342_v18, %v1272_v38  ;;  %v977_v30 = vadd.f32 %v973_v21, %v903_v12  ;;  %v3788_v19 = vld [vmem:[#allocation2 + $0x31] sm:$0xff]  ;;  %v535_v18 = vadd.f32 %v531_v6, %v457_v41 }
 0x189   : > { %v682_v42 = vadd.f32 %v678_v55, %v608_v17  ;;  %v1047_v48 = vmul.f32 %v3788_v19, %v3667_v11  ;;  %v3800_v21 = vld [vmem:[#allocation2 + $0x32] sm:$0xff]  ;;  %v900_v50 = vmul.f32 %v3573_v57, %v3648_v34  ;;  %v753_v6 = vmul.f32 %v3587_v45, %v3624_v33 }
 0x18a   : > { %v1420_v16 = vadd.f32 %v1416_v9, %v1346_v14  ;;  %4710 = vst [vmem:[#allocation107_spill] sm:$0xff] %v3800_v21  ;;  %v1121_v17 = vmul.f32 %v3800_v21, %v3680_v8  ;;  %v609_v9 = vadd.f32 %v605_v22, %v535_v18  ;;  %v3821_v21 = vld [vmem:[#allocation2 + $0x39] sm:$0xff] }
 0x18b   : > { %v756_v38 = vadd.f32 %v752_v27, %v682_v42  ;;  %v1051_v12 = vadd.f32 %v1047_v48, %v977_v30  ;;  %v974_v27 = vmul.f32 %v3807_v36, %v3651_v62  ;;  %v3811_v48 = vld [vmem:[#allocation2 + $0x33] sm:$0xff]  ;;  %v1048_v22 = vmul.f32 %v3821_v21, %v3667_v11 }
 0x18c   : > { %1528 = vrot.lane.b32.xlu0 %v1420_v16, %s2151_s4  ;;  %v1195_v41 = vmul.f32 %v3811_v48, %v3713_v40  ;;  %v683_v42 = vadd.f32 %v679_v61, %v609_v9 }
 0x18d   : > { %v830_v55 = vadd.f32 %v826_v15, %v756_v38  ;;  %v1125_v58 = vadd.f32 %v1121_v17, %v1051_v12  ;;  %v3817_v15 = vld [vmem:[#allocation2 + $0x34] sm:$0xff] }
 0x18e   : > { %v1269_v16 = vmul.f32 %v3817_v15, %v3725_v0  ;;  %v757_v18 = vadd.f32 %v753_v6, %v683_v42  ;;  %v3827_v12 = vld [vmem:[#allocation2 + $0x35] sm:$0xff] }
 0x18f   : > { %v904_v14 = vadd.f32 %v900_v50, %v830_v55  ;;  %v1199_v30 = vadd.f32 %v1195_v41, %v1125_v58  ;;  %v827_v50 = vmul.f32 %v3611_v3, %v3637_v44  ;;  %v1343_v33 = vmul.f32 %v3827_v12, %v3740_v52  ;;  %v3831_v17 = vld [vmem:[#allocation2 + $0x3a] sm:$0xff] }
 0x190   : > { %v1122_v55 = vmul.f32 %v3831_v17, %v3680_v8  ;;  %v901_v58 = vmul.f32 %v3619_v56, %v3648_v34  ;;  %v3837_v41 = vld [vmem:[#allocation2 + $0x40] sm:$0xff]  ;;  %v3841_v42 = vld [vmem:[#allocation2 + $0x36] sm:$0xff] }
 0x191   : > { %v978_v38 = vadd.f32 %v974_v27, %v904_v14  ;;  %v1273_v61 = vadd.f32 %v1269_v16, %v1199_v30  ;;  %v831_v9 = vadd.f32 %v827_v50, %v757_v18  ;;  %v975_v44 = vmul.f32 %v3837_v41, %v3651_v62  ;;  %4711 = vst [vmem:[#allocation110_spill] sm:$0xff] %v3841_v42  ;;  %v3845_v16 = vld [vmem:[#allocation2 + $0x3b] sm:$0xff] }
 0x192   : > { %v1417_v6 = vmul.f32 %v3841_v42, %v3751_v5  ;;  %v3849_v18 = vld [vmem:[#allocation2 + $0x41] sm:$0xff] }
 0x193   : > { %v1052_v27 = vadd.f32 %v1048_v22, %v978_v38  ;;  %v1347_v14 = vadd.f32 %v1343_v33, %v1273_v61  ;;  %v1196_v38 = vmul.f32 %v3845_v16, %v3713_v40  ;;  %v905_v22 = vadd.f32 %v901_v58, %v831_v9  ;;  %v3853_v61 = vld [vmem:[#allocation2 + $0x3c] sm:$0xff] }
 0x194   : > { %v1049_v34 = vmul.f32 %v3849_v18, %v3667_v11  ;;  %4712 = vst [vmem:[#allocation51_spill] sm:$0xff] %v3853_v61  ;;  %v1270_v33 = vmul.f32 %v3853_v61, %v3725_v0  ;;  %v3862_v58 = vld [vmem:[#allocation2 + $0x3d] sm:$0xff] }
 0x195   : > { %v1126_v30 = vadd.f32 %v1122_v55, %v1052_v27  ;;  %v1421_v50 = vadd.f32 %v1417_v6, %v1347_v14  ;;  %v979_v42 = vadd.f32 %v975_v44, %v905_v22  ;;  %v3857_v55 = vld [vmem:[#allocation2 + $0x42] sm:$0xff]  ;;  %v1344_v11 = vmul.f32 %v3862_v58, %v3740_v52 }
 0x196   : > { %v1123_v27 = vmul.f32 %v3857_v55, %v3680_v8  ;;  %v1197_v22 = vmul.f32 %v3692_v43, %v3713_v40 }
 0x197   : > { %v1200_v62 = vadd.f32 %v1196_v38, %v1126_v30  ;;  %1530 = vrot.lane.b32.xlu1 %v1421_v50, %s2151_s4  ;;  %v1053_v14 = vadd.f32 %v1049_v34, %v979_v42  ;;  %v3866_v30 = vld [vmem:[#allocation2 + $0x3e] sm:$0xff]  ;;  %v1271_v50 = vmul.f32 %v3700_v53, %v3725_v0  ;;  %v393_v0 = vstv %s392_s8 }
 0x198   : > { %v1418_v44 = vmul.f32 %v3866_v30, %v3751_v5 }
 0x199   : > { %v1274_v9 = vadd.f32 %v1270_v33, %v1200_v62  ;;  %v1127_v38 = vadd.f32 %v1123_v27, %v1053_v14  ;;  %v3875_v33 = vld [vmem:[#allocation2 + $0x45] sm:$0xff] }
 0x19a   : > { %v1345_v42 = vmul.f32 %v3875_v33, %v3740_v52  ;;  %v541_v52 = vstv %s1787_s5 }
 0x19b   : > { %v1348_v6 = vadd.f32 %v1344_v11, %v1274_v9  ;;  %v1201_v61 = vadd.f32 %v1197_v22, %v1127_v38  ;;  %v3879_v9 = vld [vmem:[#allocation2 + $0x46] sm:$0xff]  ;;  %v467_v11 = vstv %s1780_s14  ;;  %v615_v38 = vstv %s1794_s19 }
 0x19c   : > { %v1419_v27 = vmul.f32 %v3879_v9, %v3751_v5  ;;  %v468_v14 = vmul.f32 %v3599_v13, %v467_v11  ;;  %v542_v5 = vmul.f32 %v3615_v49, %v541_v52  ;;  %v469_v13 = vmul.f32 %v3688_v2, %v467_v11  ;;  %v3898_v49 = vpop.permute.xlu1 %1430 }
 0x19d   : > { %v1422_v8 = vadd.f32 %v1418_v44, %v1348_v6  ;;  %v1275_v62 = vadd.f32 %v1271_v50, %v1201_v61  ;;  %v394_v61 = vmul.f32 %v3595_v37, %v393_v0  ;;  %v3886_v6 = vpop.permute.xlu0 %1428  ;;  %v616_v50 = vmul.f32 %v3630_v25, %v615_v38 }
 0x19e   : > { %v395_v37 = vmul.f32 %v3684_v54, %v393_v0  ;;  %v396_v2 = vmul.f32 %v3735_v39, %v393_v0 }
 0x19f   : > { %1532 = vrot.lane.b32.xlu0 %v1422_v8, %s2151_s4  ;;  %v1349_v34 = vadd.f32 %v1345_v42, %v1275_v62  ;;  %v472_v44 = vadd.f32 %v468_v14, %v394_v61  ;;  %v3892_v62 = vstv %s1801_s9  ;;  %v543_v14 = vmul.f32 %v3704_v23, %v541_v52 }
 0x1a1   : > { %v1423_v40 = vadd.f32 %v1419_v27, %v1349_v34  ;;  %v546_v22 = vadd.f32 %v542_v5, %v472_v44  ;;  %v3889_v8 = vpop.permute.xlu0 %1432  ;;  %v690_v34 = vmul.f32 %v3641_v51, %v3892_v62  ;;  %v3900_v27 = vstv %s1808_s20 }
 0x1a2   : > { %v764_v54 = vmul.f32 %v3655_v28, %v3900_v27  ;;  %v470_v44 = vmul.f32 %v3742_v29, %v467_v11  ;;  %v3909_v5 = vstv %s1815_s0 }
 0x1a3   : > { %1534 = vrot.lane.b32.xlu1 %v1423_v40, %s2151_s4  ;;  %v620_v42 = vadd.f32 %v616_v50, %v546_v22  ;;  %v473_v40 = vadd.f32 %v469_v13, %v395_v37  ;;  %v3911_v50 = vstv %s1822_s24  ;;  %v3913_v37 = vpop.permute.xlu1 %1434  ;;  %v617_v13 = vmul.f32 %v3718_v63, %v615_v38  ;;  %s2074_s4 = scalar_lea.vmem %s2073_s30, 8192 }
 0x1a4   : > { %4713 = vst [vmem:[#allocation123_spill] sm:$0xff] %v3913_v37  ;;  %v838_v28 = vmul.f32 %v3669_v47, %v3909_v5  ;;  %v474_v23 = vadd.f32 %v470_v44, %v396_v2  ;;  %v912_v39 = vmul.f32 %v3673_v7, %v3911_v50  ;;  %v691_v63 = vmul.f32 %v3731_v1, %v3892_v62  ;;  %p2076_p1 = scmp.lt.s32.totalorder %s2074_s4, %s2068_s28 }
 0x1a5   : > { %v3902_v61 = vpop.permute.xlu0 %1448  ;;  %v694_v25 = vadd.f32 %v690_v34, %v620_v42  ;;  %v547_v51 = vadd.f32 %v543_v14, %v473_v40  ;;  %v544_v40 = vmul.f32 %v3757_v26, %v541_v52  ;;  %v471_v14 = vmul.f32 %v3554_v4, %v467_v11 }
 0x1a6   : > { %v3931_v47 = vstv %s1836_s15  ;;  %v618_v4 = vmul.f32 %v3774_v20, %v615_v38  ;;  %v545_v11 = vmul.f32 %v3565_v24, %v541_v52  ;;  %v3952_v52 = vstv %s1843_s2  ;;  %p2077_p4 = por %p2076_p1, %p2075_p10 }
 0x1a7   : > { %v768_v22 = vadd.f32 %v764_v54, %v694_v25  ;;  %v621_v29 = vadd.f32 %v617_v13, %v547_v51  ;;  %v397_v25 = vmul.f32 %v3544_v46, %v393_v0  ;;  %v3925_v54 = vstv %s1829_s1 }
 0x1a8   : > { %v548_v37 = vadd.f32 %v544_v40, %v474_v23  ;;  %v986_v46 = vmul.f32 %v3696_v31, %v3925_v54  ;;  %v765_v0 = vmul.f32 %v3753_v32, %v3900_v27  ;;  %v1060_v51 = vmul.f32 %v3708_v35, %v3931_v47  ;;  %p2078_p11 = pnand %p2077_p4, %p2071_p9 }
 0x1a9   : > { %v3916_v42 = vpop.permute.xlu0 %1452  ;;  %v842_v34 = vadd.f32 %v838_v28, %v768_v22  ;;  %v695_v7 = vadd.f32 %v691_v63, %v621_v29  ;;  %v475_v26 = vadd.f32 %v471_v14, %v397_v25  ;;  %v692_v28 = vmul.f32 %v3539_v59, %v3892_v62  ;;  %v4716_v29 = vld [vmem:[#allocation45_spill] sm:$0xff] }
 0x1aa   : > { %4714 = vst [vmem:[#allocation138_spill] sm:$0xff] %v3916_v42  ;;  %v3929_v42 = vpop.permute.xlu1 %1450  ;;  %v622_v1 = vadd.f32 %v618_v4, %v548_v37  ;;  %v619_v31 = vmul.f32 %v3569_v10, %v615_v38  ;;  %v766_v59 = vmul.f32 %v3792_v60, %v3900_v27  ;;  %v4717_v38 = vld [vmem:[#allocation105_spill] sm:$0xff]  ;;  %v693_v63 = vmul.f32 %v3587_v45, %v3892_v62 }
 0x1ab   : > { %v916_v44 = vadd.f32 %v912_v39, %v842_v34  ;;  %v769_v22 = vadd.f32 %v765_v0, %v695_v7  ;;  %v549_v23 = vadd.f32 %v545_v11, %v475_v26  ;;  %v4715_v39 = vld [vmem:[#allocation46_spill] sm:$0xff]  ;;  %v913_v34 = vmul.f32 %v4716_v29, %v3911_v50 }
 0x1ac   : > { %v839_v32 = vmul.f32 %v4715_v39, %v3909_v5  ;;  %v696_v24 = vadd.f32 %v692_v28, %v622_v1  ;;  %v1134_v25 = vmul.f32 %v4717_v38, %v3952_v52  ;;  %v840_v0 = vmul.f32 %v3573_v57, %v3909_v5  ;;  %v4718_v11 = vld [vmem:[#allocation106_spill] sm:$0xff]  ;;  %v4719_v39 = vld [vmem:[#allocation107_spill] sm:$0xff] }
 0x1ad   : > { %v3933_v2 = vpop.permute.xlu0 %1468  ;;  %v990_v13 = vadd.f32 %v986_v46, %v916_v44  ;;  %v623_v10 = vadd.f32 %v619_v31, %v549_v23  ;;  %v3964_v44 = vstv %s1850_s13  ;;  %v987_v1 = vmul.f32 %v3788_v19, %v3925_v54 }
 0x1ae   : > { %v3946_v20 = vpop.permute.xlu1 %1454  ;;  %v843_v35 = vadd.f32 %v839_v32, %v769_v22  ;;  %v770_v14 = vadd.f32 %v766_v59, %v696_v24  ;;  %v914_v45 = vmul.f32 %v3807_v36, %v3911_v50  ;;  %v767_v62 = vmul.f32 %v3611_v3, %v3900_v27  ;;  %v4720_v24 = vld [vmem:[#allocation94_spill] sm:$0xff] }
 0x1af   : > { %v1064_v40 = vadd.f32 %v1060_v51, %v990_v13  ;;  %v697_v60 = vadd.f32 %v693_v63, %v623_v10  ;;  %v1208_v51 = vmul.f32 %v4718_v11, %v3964_v44  ;;  %v3976_v13 = vstv %s1857_s21 }
 0x1b0   : > { %v917_v46 = vadd.f32 %v913_v34, %v843_v35  ;;  %v844_v22 = vadd.f32 %v840_v0, %v770_v14  ;;  %v1061_v19 = vmul.f32 %v4719_v39, %v3931_v47  ;;  %v1282_v35 = vmul.f32 %v4720_v24, %v3976_v13  ;;  %v4723_v39 = vld [vmem:[#allocation110_spill] sm:$0xff] }
 0x1b1   : > { %v1138_v26 = vadd.f32 %v1134_v25, %v1064_v40  ;;  %v771_v31 = vadd.f32 %v767_v62, %v697_v60  ;;  %v841_v36 = vmul.f32 %v3619_v56, %v3909_v5  ;;  %v1355_v3 = vstv %s1864_s29  ;;  %v4721_v25 = vld [vmem:[#allocation104_spill] sm:$0xff] }
 0x1b2   : > { %v3962_v7 = vpop.permute.xlu1 %1470  ;;  %v991_v28 = vadd.f32 %v987_v1, %v917_v46  ;;  %v918_v29 = vadd.f32 %v914_v45, %v844_v22  ;;  %v988_v40 = vmul.f32 %v3821_v21, %v3925_v54  ;;  %v915_v10 = vmul.f32 %v3837_v41, %v3911_v50 }
 0x1b3   : > { %v1212_v23 = vadd.f32 %v1208_v51, %v1138_v26  ;;  %v845_v59 = vadd.f32 %v841_v36, %v771_v31  ;;  %v1135_v38 = vmul.f32 %v3811_v48, %v3952_v52  ;;  %v1356_v14 = vmul.f32 %v4721_v25, %v1355_v3 }
 0x1b4   : > { %v1065_v27 = vadd.f32 %v1061_v19, %v991_v28  ;;  %v992_v63 = vadd.f32 %v988_v40, %v918_v29  ;;  %v1062_v5 = vmul.f32 %v3831_v17, %v3931_v47  ;;  %v989_v21 = vmul.f32 %v3849_v18, %v3925_v54  ;;  %v4722_v28 = vld [vmem:[#allocation51_spill] sm:$0xff] }
 0x1b5   : > { %v1286_v34 = vadd.f32 %v1282_v35, %v1212_v23  ;;  %v919_v60 = vadd.f32 %v915_v10, %v845_v59  ;;  %v1209_v41 = vmul.f32 %v3817_v15, %v3964_v44  ;;  %v1136_v11 = vmul.f32 %v3845_v16, %v3952_v52 }
 0x1b6   : > { %v1139_v26 = vadd.f32 %v1135_v38, %v1065_v27  ;;  %v1066_v48 = vadd.f32 %v1062_v5, %v992_v63  ;;  %v1063_v51 = vmul.f32 %v3857_v55, %v3931_v47  ;;  %v1283_v18 = vmul.f32 %v3827_v12, %v3976_v13 }
 0x1b7   : > { %v1360_v56 = vadd.f32 %v1356_v14, %v1286_v34  ;;  %v993_v22 = vadd.f32 %v989_v21, %v919_v60  ;;  %v1210_v23 = vmul.f32 %v4722_v28, %v3964_v44  ;;  %v1357_v19 = vmul.f32 %v4723_v39, %v1355_v3  ;;  %v4725_v60 = vld [vmem:[#allocation123_spill] sm:$0xff] }
 0x1b8   : > { %v1213_v1 = vadd.f32 %v1209_v41, %v1139_v26  ;;  %v1140_v62 = vadd.f32 %v1136_v11, %v1066_v48  ;;  %v1284_v29 = vmul.f32 %v3862_v58, %v3976_v13  ;;  %v1285_v58 = vmul.f32 %v3875_v33, %v3976_v13  ;;  %v1568_v11 = vld [vmem:[%s4726_s10] sm:$0xff] }
 0x1b9   : > { %v1440_v50 = vadd.f32 %v3886_v6, %v1360_v56  ;;  %v1067_v31 = vadd.f32 %v1063_v51, %v993_v22  ;;  %v1572_v51 = vld [vmem:[%s4726_s10 + $0x20] sm:$0xff] }
 0x1ba   : > { %v3950_v37 = vpop.permute.xlu0 %1472  ;;  %v1287_v6 = vadd.f32 %v1283_v18, %v1213_v1  ;;  %v1214_v55 = vadd.f32 %v1210_v23, %v1140_v62  ;;  %v1580_v18 = vld [vmem:[%s4726_s10 + $0x60] sm:$0xff] }
 0x1bb   : > { %v1460_v17 = vadd.f32 %v3902_v61, %v1440_v50  ;;  %v1137_v61 = vmul.f32 %v3692_v43, %v3952_v52  ;;  %v1358_v43 = vmul.f32 %v3866_v30, %v1355_v3  ;;  %v1588_v62 = vld [vmem:[%s4726_s10 + $0xa0] sm:$0xff] }
 0x1bc   : > { %v1361_v35 = vadd.f32 %v1357_v19, %v1287_v6  ;;  %v1288_v34 = vadd.f32 %v1284_v29, %v1214_v55  ;;  %v1596_v6 = vld [vmem:[%s4726_s10 + $0xe0] sm:$0xff]  ;;  %v1573_v29 = vld [vmem:[%s4726_s10 + $0x28] sm:$0xff] }
 0x1bd   : > { %v1480_v15 = vadd.f32 %v3933_v2, %v1460_v17  ;;  %v1141_v2 = vadd.f32 %v1137_v61, %v1067_v31  ;;  %v1576_v17 = vld [vmem:[%s4726_s10 + $0x40] sm:$0xff] }
 0x1be   : > { %v1441_v27 = vadd.f32 %v3898_v49, %v1361_v35  ;;  %v1362_v25 = vadd.f32 %v1358_v43, %v1288_v34  ;;  %v1589_v34 = vld [vmem:[%s4726_s10 + $0xa8] sm:$0xff] }
 0x1c0   : > { %v1461_v59 = vadd.f32 %v3929_v42, %v1441_v27  ;;  %v1442_v49 = vadd.f32 %v3889_v8, %v1362_v25  ;;  %v1585_v27 = vld [vmem:[%s4726_s10 + $0x88] sm:$0xff] }
 0x1c1   : > { %v3978_v57 = vpop.permute.xlu1 %1474 }
 0x1c2   : > { %v1481_v38 = vadd.f32 %v3962_v7, %v1461_v59 }
 0x1c5   : > { %v1489_v4 = vpop.permute.xlu0 %1488 }
 0x1c6   : > { %v1500_v16 = vadd.f32 %v1489_v4, %v1480_v15  ;;  %v1211_v4 = vmul.f32 %v3700_v53, %v3964_v44  ;;  %v1359_v53 = vmul.f32 %v3879_v9, %v1355_v3  ;;  %v4724_v44 = vld [vmem:[#allocation138_spill] sm:$0xff] }
 0x1c7   : > { %v1462_v42 = vadd.f32 %v4724_v44, %v1442_v49  ;;  %v1592_v15 = vld [vmem:[%s4726_s10 + $0xc0] sm:$0xff]  ;;  %v1578_v44 = vld [vmem:[%s4726_s10 + $0x50] sm:$0xff] }
 0x1c8   : > { %v1215_v52 = vadd.f32 %v1211_v4, %v1141_v2  ;;  %v1577_v2 = vld [vmem:[%s4726_s10 + $0x48] sm:$0xff] }
 0x1c9   : > { %v1482_v5 = vadd.f32 %v3950_v37, %v1462_v42  ;;  %v1593_v4 = vld [vmem:[%s4726_s10 + $0xc8] sm:$0xff]  ;;  %v1582_v42 = vld [vmem:[%s4726_s10 + $0x70] sm:$0xff] }
 0x1ca   : > { %v1289_v63 = vadd.f32 %v1285_v58, %v1215_v52 }
 0x1cc   : > { %v1491_v46 = vpop.permute.xlu1 %1490  ;;  %v1363_v56 = vadd.f32 %v1359_v53, %v1289_v63  ;;  %v1574_v53 = vld [vmem:[%s4726_s10 + $0x30] sm:$0xff] }
 0x1cd   : > { %v1501_v14 = vadd.f32 %v1491_v46, %v1481_v38 }
 0x1ce   : > { %v1443_v41 = vadd.f32 %v4725_v60, %v1363_v56  ;;  %v1590_v56 = vld [vmem:[%s4726_s10 + $0xb0] sm:$0xff] }
 0x1d0   : > { %v1463_v9 = vadd.f32 %v3946_v20, %v1443_v41 }
 0x1d2   : > { %v3982_v32 = vpop.permute.xlu0 %1492  ;;  %v1483_v37 = vadd.f32 %v3978_v57, %v1463_v9 }
 0x1d3   : > { %v1502_v33 = vadd.f32 %v3982_v32, %v1482_v5  ;;  %v1594_v5 = vld [vmem:[%s4726_s10 + $0xd0] sm:$0xff] }
 0x1da   : > { %v1495_v45 = vpop.permute.xlu1 %1494 }
 0x1db   : > { %v1503_v50 = vadd.f32 %v1495_v45, %v1483_v37 }
 0x1e1   : > { %v1509_v0 = vpop.permute.xlu0 %1508 }
 0x1e2   : > { %v1520_v47 = vadd.f32 %v1509_v0, %v1500_v16 }
 0x1e8   : > { %v1511_v24 = vpop.permute.xlu1 %1510 }
 0x1e9   : > { %v1521_v26 = vadd.f32 %v1511_v24, %v1501_v14 }
 0x1ee   : > { %v1513_v54 = vpop.permute.xlu0 %1512 }
 0x1ef   : > { %v1522_v13 = vadd.f32 %v1513_v54, %v1502_v33  ;;  %v1584_v54 = vld [vmem:[%s4726_s10 + $0x80] sm:$0xff] }
 0x1f5   : > { %v1515_v10 = vpop.permute.xlu1 %1514 }
 0x1f6   : > { %v1523_v1 = vadd.f32 %v1515_v10, %v1503_v50  ;;  %v1575_v50 = vld [vmem:[%s4726_s10 + $0x38] sm:$0xff] }
 0x1fe   : > { %v1529_v12 = vpop.permute.xlu0 %1528 }
 0x1ff   : > { %v1540_v36 = vadd.f32 %v1529_v12, %v1520_v47  ;;  %v1569_v12 = vld [vmem:[%s4726_s10 + $0x8] sm:$0xff] }
 0x201   : > { %v1871_v40 = vmul.f32 -1.442695, %v1540_v36  ;;  %v1581_v36 = vld [vmem:[%s4726_s10 + $0x68] sm:$0xff] }
 0x203   : > { %1951 = vpow2.f32 %v1871_v40  ;;  %v1597_v40 = vld [vmem:[%s4726_s10 + $0xe8] sm:$0xff] }
 0x209   : > { %v1531_v0 = vpop.permute.xlu1 %1530 }
 0x20a   : > { %v1541_v30 = vadd.f32 %v1531_v0, %v1521_v26  ;;  %v1570_v26 = vld [vmem:[%s4726_s10 + $0x10] sm:$0xff] }
 0x20b   : > { %v1586_v0 = vld [vmem:[%s4726_s10 + $0x90] sm:$0xff] }
 0x20c   : > { %v1872_v21 = vmul.f32 -1.442695, %v1541_v30 }
 0x20d   : > { %v1952_v7 = vpop.eup %1951 }
 0x20e   : > { %v1556_v8 = vadd.f32 1.0, %v1952_v7  ;;  %1953 = vpow2.f32 %v1872_v21  ;;  %v1598_v21 = vld [vmem:[%s4726_s10 + $0xf0] sm:$0xff] }
 0x210   : > { %1955 = vrcp.f32 %v1556_v8 }
 0x211   : > { %v1533_v3 = vpop.permute.xlu0 %1532 }
 0x212   : > { %v1542_v46 = vadd.f32 %v1533_v3, %v1522_v13 }
 0x214   : > { %v1873_v48 = vmul.f32 -1.442695, %v1542_v46  ;;  %v1571_v46 = vld [vmem:[%s4726_s10 + $0x18] sm:$0xff] }
 0x215   : > { %v1535_v32 = vpop.permute.xlu1 %1534 }
 0x216   : > { %1957 = vpow2.f32 %v1873_v48  ;;  %v1543_v22 = vadd.f32 %v1535_v32, %v1523_v1  ;;  %v1579_v48 = vld [vmem:[%s4726_s10 + $0x58] sm:$0xff] }
 0x217   : > { %v1583_v1 = vld [vmem:[%s4726_s10 + $0x78] sm:$0xff] }
 0x218   : > { %v1954_v20 = vpop.eup %1953  ;;  %v1874_v23 = vmul.f32 -1.442695, %v1543_v22  ;;  %v1587_v32 = vld [vmem:[%s4726_s10 + $0x98] sm:$0xff] }
 0x219   : > { %v1557_v28 = vadd.f32 1.0, %v1954_v20  ;;  %v1599_v22 = vld [vmem:[%s4726_s10 + $0xf8] sm:$0xff] }
 0x21a   : > { %v1956_v57 = vpop.eup %1955 }
 0x21b   : > { %v1600_v31 = vmul.f32 %v1956_v57, %v1568_v11  ;;  %v1604_v45 = vmul.f32 %v1956_v57, %v1572_v51  ;;  %v1608_v16 = vmul.f32 %v1956_v57, %v1576_v17  ;;  %v1612_v39 = vmul.f32 %v1956_v57, %v1580_v18  ;;  %v1591_v11 = vld [vmem:[%s4726_s10 + $0xb8] sm:$0xff] }
 0x21c   : > { %v1616_v19 = vmul.f32 %v1956_v57, %v1584_v54  ;;  %v1620_v55 = vmul.f32 %v1956_v57, %v1588_v62  ;;  %v1624_v61 = vmul.f32 %v1956_v57, %v1592_v15  ;;  %v1628_v47 = vmul.f32 %v1956_v57, %v1596_v6  ;;  %v1595_v51 = vld [vmem:[%s4726_s10 + $0xd8] sm:$0xff] }
 0x21d   : > { %1632 = vst.msk [vmem:[%s4043_s23] sm:$0xff] %vm220_vm0, %v1600_v31  ;;  %1636 = vst.msk [vmem:[%s4043_s23 + $0x20] sm:$0xff] %vm220_vm0, %v1604_v45  ;;  %1959 = vrcp.f32 %v1557_v28 }
 0x21e   : > { %1640 = vst.msk [vmem:[%s4043_s23 + $0x40] sm:$0xff] %vm220_vm0, %v1608_v16  ;;  %1644 = vst.msk [vmem:[%s4043_s23 + $0x60] sm:$0xff] %vm220_vm0, %v1612_v39  ;;  %1961 = vpow2.f32 %v1874_v23 }
 0x21f   : > { %1648 = vst.msk [vmem:[%s4043_s23 + $0x80] sm:$0xff] %vm220_vm0, %v1616_v19  ;;  %1652 = vst.msk [vmem:[%s4043_s23 + $0xa0] sm:$0xff] %vm220_vm0, %v1620_v55 }
 0x220   : > { %1656 = vst.msk [vmem:[%s4043_s23 + $0xc0] sm:$0xff] %vm220_vm0, %v1624_v61  ;;  %1660 = vst.msk [vmem:[%s4043_s23 + $0xe0] sm:$0xff] %vm220_vm0, %v1628_v47  ;;  %v1958_v24 = vpop.eup %1957 }
 0x221   : > { %v1558_v35 = vadd.f32 1.0, %v1958_v24 }
 0x223   : > { %1963 = vrcp.f32 %v1558_v35 }
 0x227   : > { %v1960_v59 = vpop.eup %1959 }
 0x228   : > { %v1962_v43 = vpop.eup %1961  ;;  %v1601_v52 = vmul.f32 %v1960_v59, %v1569_v12  ;;  %v1605_v10 = vmul.f32 %v1960_v59, %v1573_v29  ;;  %v1609_v38 = vmul.f32 %v1960_v59, %v1577_v2  ;;  %v1613_v25 = vmul.f32 %v1960_v59, %v1581_v36 }
 0x229   : > { %v1617_v58 = vmul.f32 %v1960_v59, %v1585_v27  ;;  %v1621_v14 = vmul.f32 %v1960_v59, %v1589_v34  ;;  %v1625_v49 = vmul.f32 %v1960_v59, %v1593_v4  ;;  %v1629_v63 = vmul.f32 %v1960_v59, %v1597_v40 }
 0x22a   : > { %1633 = vst.msk [vmem:[%s4043_s23 + $0x8] sm:$0xff] %vm220_vm0, %v1601_v52  ;;  %1637 = vst.msk [vmem:[%s4043_s23 + $0x28] sm:$0xff] %vm220_vm0, %v1605_v10  ;;  %v1559_v30 = vadd.f32 1.0, %v1962_v43 }
 0x22b   : > { %1641 = vst.msk [vmem:[%s4043_s23 + $0x48] sm:$0xff] %vm220_vm0, %v1609_v38  ;;  %1645 = vst.msk [vmem:[%s4043_s23 + $0x68] sm:$0xff] %vm220_vm0, %v1613_v25 }
 0x22c   : > { %1649 = vst.msk [vmem:[%s4043_s23 + $0x88] sm:$0xff] %vm220_vm0, %v1617_v58  ;;  %1653 = vst.msk [vmem:[%s4043_s23 + $0xa8] sm:$0xff] %vm220_vm0, %v1621_v14  ;;  %1965 = vrcp.f32 %v1559_v30 }
 0x22d   : > { %1657 = vst.msk [vmem:[%s4043_s23 + $0xc8] sm:$0xff] %vm220_vm0, %v1625_v49  ;;  %1661 = vst.msk [vmem:[%s4043_s23 + $0xe8] sm:$0xff] %vm220_vm0, %v1629_v63  ;;  %v1964_v7 = vpop.eup %1963 }
 0x22e   : > { %v1602_v60 = vmul.f32 %v1964_v7, %v1570_v26  ;;  %v1606_v41 = vmul.f32 %v1964_v7, %v1574_v53  ;;  %v1610_v33 = vmul.f32 %v1964_v7, %v1578_v44  ;;  %v1614_v8 = vmul.f32 %v1964_v7, %v1582_v42 }
 0x22f   : > { %v1618_v9 = vmul.f32 %v1964_v7, %v1586_v0  ;;  %v1622_v13 = vmul.f32 %v1964_v7, %v1590_v56  ;;  %v1626_v3 = vmul.f32 %v1964_v7, %v1594_v5  ;;  %v1630_v37 = vmul.f32 %v1964_v7, %v1598_v21 }
 0x230   : > { %1634 = vst.msk [vmem:[%s4043_s23 + $0x10] sm:$0xff] %vm220_vm0, %v1602_v60  ;;  %1638 = vst.msk [vmem:[%s4043_s23 + $0x30] sm:$0xff] %vm220_vm0, %v1606_v41 }
 0x231   : > { %1642 = vst.msk [vmem:[%s4043_s23 + $0x50] sm:$0xff] %vm220_vm0, %v1610_v33  ;;  %1646 = vst.msk [vmem:[%s4043_s23 + $0x70] sm:$0xff] %vm220_vm0, %v1614_v8 }
 0x232   : > { %1650 = vst.msk [vmem:[%s4043_s23 + $0x90] sm:$0xff] %vm220_vm0, %v1618_v9  ;;  %1654 = vst.msk [vmem:[%s4043_s23 + $0xb0] sm:$0xff] %vm220_vm0, %v1622_v13 }
 0x233   : > { %1658 = vst.msk [vmem:[%s4043_s23 + $0xd0] sm:$0xff] %vm220_vm0, %v1626_v3  ;;  %1662 = vst.msk [vmem:[%s4043_s23 + $0xf0] sm:$0xff] %vm220_vm0, %v1630_v37 }
 0x236   : > { %v1966_v20 = vpop.eup %1965 }
 0x237   : > { %v1603_v17 = vmul.f32 %v1966_v20, %v1571_v46  ;;  %v1607_v18 = vmul.f32 %v1966_v20, %v1575_v50  ;;  %v1611_v54 = vmul.f32 %v1966_v20, %v1579_v48  ;;  %v1615_v62 = vmul.f32 %v1966_v20, %v1583_v1 }
 0x238   : > { %v1619_v15 = vmul.f32 %v1966_v20, %v1587_v32  ;;  %v1623_v6 = vmul.f32 %v1966_v20, %v1591_v11  ;;  %v1627_v28 = vmul.f32 %v1966_v20, %v1595_v51  ;;  %v1631_v57 = vmul.f32 %v1966_v20, %v1599_v22 }
 0x239   : > { %1635 = vst.msk [vmem:[%s4043_s23 + $0x18] sm:$0xff] %vm220_vm0, %v1603_v17  ;;  %1639 = vst.msk [vmem:[%s4043_s23 + $0x38] sm:$0xff] %vm220_vm0, %v1607_v18 }
 0x23a   : > { %1643 = vst.msk [vmem:[%s4043_s23 + $0x58] sm:$0xff] %vm220_vm0, %v1611_v54  ;;  %1647 = vst.msk [vmem:[%s4043_s23 + $0x78] sm:$0xff] %vm220_vm0, %v1615_v62 }
 0x23b   : > { %1651 = vst.msk [vmem:[%s4043_s23 + $0x98] sm:$0xff] %vm220_vm0, %v1619_v15  ;;  %1655 = vst.msk [vmem:[%s4043_s23 + $0xb8] sm:$0xff] %vm220_vm0, %v1623_v6 }
 0x23c   : > { %1659 = vst.msk [vmem:[%s4043_s23 + $0xd8] sm:$0xff] %vm220_vm0, %v1627_v28  ;;  %1663 = vst.msk [vmem:[%s4043_s23 + $0xf8] sm:$0xff] %vm220_vm0, %v1631_v57 }
 0x23d   : > { %2081 = shalt.err (!%p2078_p11)
}
 0x23e   : > { %s2082_s8 = scalar_lea.hbm %s4122_s25, 4096  ;;  %s2086_s19 = scalar_lea.hbm %s4730_s17, 8192 }
 0x23f   : > { %p2083_p0 = scmp.ne.s32.totalorder %s4122_s25, %s2082_s8  ;;  %p2087_p5 = scmp.lt.u32.totalorder %s4122_s25, %s4730_s17 }
 0x240   : > { %p2088_p12 = scmp.lt.u32.totalorder %s2086_s19, %s2082_s8  ;;  %p2090_p13 = scmp.lt.u32.totalorder %s2082_s8, %s4122_s25 }
 0x241   : > { %p2084_p2 = pnand %p2083_p0, %p4732_p3 }
 0x242   : > { %p2089_p6 = por %p2088_p12, %p2087_p5 }
 0x243   : > { %p2085_p7 = pneg %p2084_p2 }
 0x244   : > { %p2091_p8 = por %p2090_p13, %p2089_p6 }
 0x246   : > { %p2092_p9 = pnand %p2091_p8, %p2085_p7 }
 0x248   : > { %2095 = shalt.err (!%p2092_p9)
}
 0x249   : > { %s2153_s0 = smov 128   ;;  %s2154_s24 = smov 8  }
 0x24a   : > { %1888 = dma.vmem_to_hbm [thread:$0]  (%p4732_p3), %s4124_s26, 4096, %s4122_s25, %s1665_s22, %s2153_s0, %s2153_s0, %s2154_s24  }
 0x24b PF: > { %s4733_s1 = sld [smem:[#allocation12_spill]]  ;;  %s4734_s15 = sld [smem:[#allocation20_spill]] }
 0x24c   : > { %s4735_s2 = sld [smem:[#allocation15_spill]] }
 0x251   : > { %s1693_s13 = sand.u32 1, %s4733_s1   ;;  %p4736_p10 = scmp.ne.s32.totalorder %s4734_s15, 0 }
 0x252   : > { %p4737_p1 = scmp.ge.s32.totalorder %s4735_s2, 2  ;;  %s1694_s21 = scalar_lea.sflag [#allocation5], %s1693_s13 }
 0x254   : > { %p1899_p4 = pnand %p4737_p1, %p4736_p10 }
 0x256   : > { %2121 = dma.done.wait (!%p1899_p4), %s1694_s21, 4096  }
 0x257   : > { %2123 = vsyncadd (!%p1899_p4), %s1694_s21, 4294963200  ;;  %s4738_s12 = sld [smem:[#allocation17_spill]]  ;;  %s4739_s9 = sld [smem:[#allocation13_spill]] }
 0x258   : > { %s4740_s10 = sld [smem:[#allocation14_spill]]  ;;  %s4741_s11 = sld [smem:[#allocation18_spill]] }
 0x25d   : > { %p16_p11 = scmp.ge.s32.totalorder %s4738_s12, 4  }
 0x25f   :  { %18 = sbr.rel (!%p16_p11) target bundleno = 10 (0xa), region = 79 }
 0x266   :  { %1699 = vsyncpa [#allocation4], 1 }
 0x267   :  { %1701 = vsyncpa [#allocation4 + $0x1], 1 }
 0x268   :  { %1702 = vsyncpa [#allocation5], 1 }
 0x269   :  { %1704 = vsyncpa [#allocation5 + $0x1], 1 }
 0x26a   :  { %1705 = vsyncpa [#allocation6], 1 }
 0x26b   :  { %1707 = vsyncpa [#allocation6 + $0x1], 1 }

</bundles_post_ra>
